<compile_context>
chip_gen: v5e
topology: v5e:2x2
jax: 0.10.0
libtpu: 0.0.40
codegen_flags: <defaults>
</compile_context>

<pallas_src>
import jax
import jax.numpy as jnp
from jax.experimental import pallas as pl
from jax.experimental.pallas import tpu as pltpu

HIDDEN_DIM = 16            # config.hidden_dim
N = HIDDEN_DIM * 2         # 2H
IS_COVERAGE = True         # config.is_coverage


def _round_up(x, m):
    return ((x + m - 1) // m) * m


def _pad_to(x, shape):
    return jnp.pad(x, [(0, s - d) for s, d in zip(shape, x.shape)])


def _attention_kernel(role_s_ref,
                      dec_ref, enc_out_ref, enc_feat_ref,
                      pad_ref, rolem_ref, cov_s_ref, cov_l_ref,
                      wc_ref, wv_ref,
                      ct_ref, attn_ref, cov_out_ref, mscore_ref):
    role_val = role_s_ref[0]                                   # SMEM scalar

    # combined pad & role mask, (BB, 1, T) with T on lanes
    mask_b = jnp.logical_and(pad_ref[...] != 0, rolem_ref[...] == role_val)
    mask = mask_b.astype(jnp.float32)

    # attention features, (BB, T, N); dec_ref is (BB, 1, N) -> sublane broadcast
    att = enc_feat_ref[...] + dec_ref[...]
    if IS_COVERAGE:
        # (BB, T, 1) * (1, 1, N) -> (BB, T, N)   (no in-kernel transpose)
        att = att + cov_s_ref[...] * wc_ref[...]
    e = jnp.tanh(att)                                          # (BB, T, N)  EUP

    # scores: contract N, result lands with T on lanes -> (BB, 1, T)
    scores = jnp.einsum('bqn,btn->bqt', wv_ref[...], e,
                        preferred_element_type=jnp.float32)

    # masked softmax + renormalization (mathematically identical to the
    # reference softmax*mask/sum, but robust to T/batch padding);
    # guard all-masked rows against 0/0.
    s_m = jnp.where(mask_b, scores, jnp.float32(-1e30))
    m = jnp.max(s_m, axis=-1, keepdims=True)                   # (BB, 1, 1)
    ex = jnp.exp(s_m - m) * mask
    denom = jnp.sum(ex, axis=-1, keepdims=True)
    denom = jnp.where(denom > 0.0, denom, jnp.float32(1.0))
    attn = ex / denom                                          # (BB, 1, T)

    # context vector: (BB,1,T) x (BB,T,N) -> (BB,1,N)
    c_t = jnp.einsum('bqt,btn->bqn', attn, enc_out_ref[...],
                     preferred_element_type=jnp.float32)

    ct_ref[...] = c_t
    attn_ref[...] = attn
    if IS_COVERAGE:
        cov_out_ref[...] = cov_l_ref[...] + attn
    else:
        cov_out_ref[...] = cov_l_ref[...]
    mscore_ref[...] = scores * mask


def attention_forward(s_t_hat, encoder_outputs, encoder_feature, enc_padding_mask,
                      coverage, role_mask, role_type, params, *, block_b=8):
    b, t_k, n = encoder_outputs.shape
    assert n == N
    f32 = jnp.float32

    bb = block_b
    grid = int(pl.cdiv(b, bb))          # keep >= 2 steps on real batches (v7x: 2 TCs)
    b_pad = grid * bb
    t_pad = _round_up(t_k, 128)         # lane-dense T

    # ---- wrapper glue (layout plumbing + one hoisted XLA matmul) ---------------
    # decoder projection hoisted to a single batched matmul (perf review item 2)
    dec_fea = s_t_hat.astype(f32) @ params["decode_proj_w"].T.astype(f32) \
              + params["decode_proj_b"].astype(f32)                     # (B, 2H)
    dec3 = _pad_to(dec_fea.reshape(b, 1, n), (b_pad, 1, n))             # (Bp,1,2H)

    enc_out3 = _pad_to(encoder_outputs.astype(f32), (b_pad, t_pad, n))
    enc_feat3 = _pad_to(encoder_feature.reshape(b, t_k, n).astype(f32),
                        (b_pad, t_pad, n))
    pad3 = _pad_to(enc_padding_mask.astype(jnp.int32).reshape(b, 1, t_k),
                   (b_pad, 1, t_pad))
    role3 = _pad_to(role_mask.astype(jnp.int32).reshape(b, 1, t_k),
                    (b_pad, 1, t_pad))
    cov_s3 = _pad_to(coverage.astype(f32).reshape(b, t_k, 1), (b_pad, t_pad, 1))
    cov_l3 = _pad_to(coverage.astype(f32).reshape(b, 1, t_k), (b_pad, 1, t_pad))

    wc3 = params["w_c"].astype(f32).reshape(1, 1, n)                    # (1,1,2H)
    wv3 = jnp.broadcast_to(params["v_w"].astype(f32).reshape(1, 1, n),
                           (bb, 1, n))                                  # (BB,1,2H)

    role_val = jnp.array([1 if role_type == 'user' else 2], jnp.int32)

    def bmap(i, _):
        return (i, 0, 0)

    def zmap(i, _):
        return (0, 0, 0)

    in_specs = [
        pl.BlockSpec((bb, 1, n), bmap),         # dec_fea
        pl.BlockSpec((bb, t_pad, n), bmap),     # encoder_outputs
        pl.BlockSpec((bb, t_pad, n), bmap),     # encoder_feature
        pl.BlockSpec((bb, 1, t_pad), bmap),     # enc_padding_mask
        pl.BlockSpec((bb, 1, t_pad), bmap),     # role_mask
        pl.BlockSpec((bb, t_pad, 1), bmap),     # coverage (T on sublanes)
        pl.BlockSpec((bb, 1, t_pad), bmap),     # coverage (T on lanes)
        pl.BlockSpec((1, 1, n), zmap),          # W_c row
        pl.BlockSpec((bb, 1, n), zmap),         # v row (pre-broadcast over BB)
    ]
    out_specs = [
        pl.BlockSpec((bb, 1, n), bmap),         # c_t
        pl.BlockSpec((bb, 1, t_pad), bmap),     # attn_dist
        pl.BlockSpec((bb, 1, t_pad), bmap),     # coverage_out
        pl.BlockSpec((bb, 1, t_pad), bmap),     # scores * mask
    ]
    out_shape = (
        jax.ShapeDtypeStruct((b_pad, 1, n), f32),
        jax.ShapeDtypeStruct((b_pad, 1, t_pad), f32),
        jax.ShapeDtypeStruct((b_pad, 1, t_pad), f32),
        jax.ShapeDtypeStruct((b_pad, 1, t_pad), f32),
    )

    c_t3, attn3, cov3, mscore3 = pl.pallas_call(
        _attention_kernel,
        out_shape=out_shape,
        grid_spec=pltpu.PrefetchScalarGridSpec(
            num_scalar_prefetch=1,
            grid=(grid,),
            in_specs=in_specs,
            out_specs=out_specs,
        ),
        compiler_params=pltpu.CompilerParams(
            dimension_semantics=("parallel",),
            vmem_limit_bytes=32 * 1024 * 1024,
        ),
    )(role_val, dec3, enc_out3, enc_feat3, pad3, role3, cov_s3, cov_l3, wc3, wv3)

    c_t = c_t3[:b, 0, :]
    attn_dist = attn3[:b, 0, :t_k]
    coverage_out = cov3[:b, 0, :t_k]
    masked_scores = mscore3[:b, 0, :t_k]
    return c_t, attn_dist, coverage_out, masked_scores


def reference_forward(s_t_hat, encoder_outputs, encoder_feature, enc_padding_mask,
                      coverage, role_mask, role_type, params):
    """Pure-JAX mirror of the PyTorch forward (for verification)."""
    b, t_k, n = encoder_outputs.shape
    role_val = 1 if role_type == 'user' else 2
    mask = ((enc_padding_mask != 0) & (role_mask == role_val)).astype(jnp.float32)

    dec_fea = s_t_hat @ params["decode_proj_w"].T + params["decode_proj_b"]  # (b, 2H)
    dec_fea_exp = jnp.broadcast_to(dec_fea[:, None, :], (b, t_k, n)).reshape(-1, n)
    att = encoder_feature + dec_fea_exp
    if IS_COVERAGE:
        cov_feat = coverage.reshape(-1, 1) @ params["w_c"].T                 # (b*t, 2H)
        att = att + cov_feat
    e = jnp.tanh(att)
    scores = (e @ params["v_w"].T).reshape(b, t_k)
    attn_ = jax.nn.softmax(scores, axis=1) * mask
    attn = attn_ / jnp.sum(attn_, axis=1, keepdims=True)
    c_t = jnp.einsum('bt,btn->bn', attn, encoder_outputs)
    cov_out = coverage + attn if IS_COVERAGE else coverage
    return c_t, attn, cov_out, scores * mask


if __name__ == "__main__":
    key = jax.random.PRNGKey(0)
    b, t_k = 10, 37   # small, non-aligned shapes: exercises batch blocking + padding

    ks = jax.random.split(key, 10)
    s_t_hat = jax.random.normal(ks[0], (b, N), jnp.float32)
    encoder_outputs = jax.random.normal(ks[1], (b, t_k, N), jnp.float32)
    encoder_feature = jax.random.normal(ks[2], (b * t_k, N), jnp.float32)
    enc_padding_mask = (jax.random.uniform(ks[3], (b, t_k)) < 0.9).astype(jnp.int32)
    coverage = jax.random.uniform(ks[4], (b, t_k), jnp.float32)
    role_mask = jax.random.randint(ks[5], (b, t_k), 1, 3)   # values in {1, 2}

    # guarantee every row has >=1 valid position for each role (so the reference's
    # un-guarded renormalization never divides by zero)
    enc_padding_mask = enc_padding_mask.at[:, 0].set(1).at[:, 1].set(1)
    role_mask = role_mask.at[:, 0].set(1).at[:, 1].set(2)

    params = {
        "decode_proj_w": 0.1 * jax.random.normal(ks[6], (N, N), jnp.float32),
        "decode_proj_b": 0.05 * jax.random.normal(ks[7], (N,), jnp.float32),
        "w_c": 0.1 * jax.random.normal(ks[8], (N, 1), jnp.float32),
        "v_w": 0.1 * jax.random.normal(ks[9], (1, N), jnp.float32),
    }

    names = ("c_t", "attn_dist", "coverage", "masked_scores")
    for role_type in ("user", "agent"):
        outs = attention_forward(s_t_hat, encoder_outputs, encoder_feature,
                                 enc_padding_mask, coverage, role_mask,
                                 role_type, params, block_b=8)
        outs = jax.block_until_ready(outs)
        refs = reference_forward(s_t_hat, encoder_outputs, encoder_feature,
                                 enc_padding_mask, coverage, role_mask,
                                 role_type, params)
        for name, got, ref in zip(names, outs, refs):
            assert got.shape == ref.shape, (role_type, name, got.shape, ref.shape)
            assert bool(jnp.allclose(got, ref, atol=1e-4, rtol=1e-4)), (role_type, name)

    print("KERNEL_OK")
</pallas_src>

<mosaic_0001>
module attributes {stable_mosaic.version = 11 : i64} {
  func.func @_attention_kernel(%arg0: i32, %arg1: memref<1xi32, #tpu.memory_space<smem>>, %arg2: memref<8x1x32xf32, #tpu.memory_space<vmem>>, %arg3: memref<8x128x32xf32, #tpu.memory_space<vmem>>, %arg4: memref<8x128x32xf32, #tpu.memory_space<vmem>>, %arg5: memref<8x1x128xi32, #tpu.memory_space<vmem>>, %arg6: memref<8x1x128xi32, #tpu.memory_space<vmem>>, %arg7: memref<8x128x1xf32, #tpu.memory_space<vmem>>, %arg8: memref<8x1x128xf32, #tpu.memory_space<vmem>>, %arg9: memref<1x1x32xf32, #tpu.memory_space<vmem>>, %arg10: memref<8x1x32xf32, #tpu.memory_space<vmem>>, %arg11: memref<8x1x32xf32, #tpu.memory_space<vmem>>, %arg12: memref<8x1x128xf32, #tpu.memory_space<vmem>>, %arg13: memref<8x1x128xf32, #tpu.memory_space<vmem>>, %arg14: memref<8x1x128xf32, #tpu.memory_space<vmem>>) attributes {dimension_semantics = [#tpu.dimension_semantics<parallel>], iteration_bounds = array<i64: 2>, scalar_prefetch = 1 : i64, scratch_operands = 0 : i64, tpu.core_type = #tpu.core_type<tc>, window_params = [{transform_indices = @transform_0, window_bounds = array<i64: 8, 1, 32>}, {transform_indices = @transform_1, window_bounds = array<i64: 8, 128, 32>}, {transform_indices = @transform_2, window_bounds = array<i64: 8, 128, 32>}, {transform_indices = @transform_3, window_bounds = array<i64: 8, 1, 128>}, {transform_indices = @transform_4, window_bounds = array<i64: 8, 1, 128>}, {transform_indices = @transform_5, window_bounds = array<i64: 8, 128, 1>}, {transform_indices = @transform_6, window_bounds = array<i64: 8, 1, 128>}, {pipeline_mode = #tpu.pipeline_mode<synchronous>, transform_indices = @transform_7, window_bounds = array<i64: 1, 1, 32>}, {pipeline_mode = #tpu.pipeline_mode<synchronous>, transform_indices = @transform_8, window_bounds = array<i64: 8, 1, 32>}, {transform_indices = @transform_9, window_bounds = array<i64: 8, 1, 32>}, {transform_indices = @transform_10, window_bounds = array<i64: 8, 1, 128>}, {transform_indices = @transform_11, window_bounds = array<i64: 8, 1, 128>}, {transform_indices = @transform_12, window_bounds = array<i64: 8, 1, 128>}]} {
    %c0 = arith.constant 0 : index
    %0 = memref.load %arg1[%c0] : memref<1xi32, #tpu.memory_space<smem>>
    %c0_0 = arith.constant 0 : index
    %c0_1 = arith.constant 0 : index
    %c0_2 = arith.constant 0 : index
    %1 = vector.load %arg5[%c0_0, %c0_1, %c0_2] : memref<8x1x128xi32, #tpu.memory_space<vmem>>, vector<8x1x128xi32>
    %c0_i32 = arith.constant 0 : i32
    %2 = vector.broadcast %c0_i32 : i32 to vector<8x1x128xi32>
    %3 = arith.cmpi ne, %1, %2 : vector<8x1x128xi32>
    %c0_3 = arith.constant 0 : index
    %c0_4 = arith.constant 0 : index
    %c0_5 = arith.constant 0 : index
    %4 = vector.load %arg6[%c0_3, %c0_4, %c0_5] : memref<8x1x128xi32, #tpu.memory_space<vmem>>, vector<8x1x128xi32>
    %5 = vector.broadcast %0 : i32 to vector<8x1x128xi32>
    %6 = arith.cmpi eq, %4, %5 : vector<8x1x128xi32>
    %7 = arith.andi %3, %6 : vector<8x1x128xi1>
    %8 = arith.extui %7 : vector<8x1x128xi1> to vector<8x1x128xi32>
    %9 = arith.sitofp %8 : vector<8x1x128xi32> to vector<8x1x128xf32>
    %c0_6 = arith.constant 0 : index
    %c0_7 = arith.constant 0 : index
    %c0_8 = arith.constant 0 : index
    %10 = vector.load %arg4[%c0_6, %c0_7, %c0_8] : memref<8x128x32xf32, #tpu.memory_space<vmem>>, vector<8x128x32xf32>
    %c0_9 = arith.constant 0 : index
    %c0_10 = arith.constant 0 : index
    %c0_11 = arith.constant 0 : index
    %11 = vector.load %arg2[%c0_9, %c0_10, %c0_11] : memref<8x1x32xf32, #tpu.memory_space<vmem>>, vector<8x1x32xf32>
    %12 = vector.broadcast %11 : vector<8x1x32xf32> to vector<8x128x32xf32>
    %13 = arith.addf %10, %12 : vector<8x128x32xf32>
    %c0_12 = arith.constant 0 : index
    %c0_13 = arith.constant 0 : index
    %c0_14 = arith.constant 0 : index
    %14 = vector.load %arg7[%c0_12, %c0_13, %c0_14] : memref<8x128x1xf32, #tpu.memory_space<vmem>>, vector<8x128x1xf32>
    %c0_15 = arith.constant 0 : index
    %c0_16 = arith.constant 0 : index
    %c0_17 = arith.constant 0 : index
    %15 = vector.load %arg9[%c0_15, %c0_16, %c0_17] : memref<1x1x32xf32, #tpu.memory_space<vmem>>, vector<1x1x32xf32>
    %16 = vector.broadcast %14 : vector<8x128x1xf32> to vector<8x128x32xf32>
    %17 = vector.broadcast %15 : vector<1x1x32xf32> to vector<8x128x32xf32>
    %18 = arith.mulf %16, %17 : vector<8x128x32xf32>
    %19 = arith.addf %13, %18 : vector<8x128x32xf32>
    %20 = math.tanh %19 : vector<8x128x32xf32>
    %c0_18 = arith.constant 0 : index
    %c0_19 = arith.constant 0 : index
    %c0_20 = arith.constant 0 : index
    %21 = vector.load %arg10[%c0_18, %c0_19, %c0_20] : memref<8x1x32xf32, #tpu.memory_space<vmem>>, vector<8x1x32xf32>
    "tpu.trace_start"() <{level = 10 : i32, message = "bqn,btn->bqt"}> : () -> ()
    %cst = arith.constant dense<0.000000e+00> : vector<8x1x128xf32>
    %22 = tpu.matmul %21, %20, %cst {dimension_numbers = #tpu.dot_dimension_numbers<[2], [2], [1], [1], [0, 0, 0, 1, 1, 1], [0], [0]>} : vector<8x1x32xf32>, vector<8x128x32xf32>, vector<8x1x128xf32> -> vector<8x1x128xf32>
    %cst_21 = arith.constant -1.000000e+30 : f32
    "tpu.trace_stop"() : () -> ()
    %23 = vector.broadcast %cst_21 : f32 to vector<8x1x128xf32>
    %24 = arith.select %7, %22, %23 : vector<8x1x128xi1>, vector<8x1x128xf32>
    %cst_22 = arith.constant dense<0xFF800000> : vector<8x1xf32>
    %25 = vector.multi_reduction <maximumf>, %24, %cst_22 [2] : vector<8x1x128xf32> to vector<8x1xf32>
    %26 = vector.shape_cast %25 : vector<8x1xf32> to vector<8x1x1xf32>
    %27 = vector.broadcast %26 : vector<8x1x1xf32> to vector<8x1x128xf32>
    %28 = arith.subf %24, %27 : vector<8x1x128xf32>
    %29 = math.exp %28 : vector<8x1x128xf32>
    %30 = arith.mulf %29, %9 : vector<8x1x128xf32>
    %cst_23 = arith.constant dense<0.000000e+00> : vector<8x1xf32>
    %31 = vector.multi_reduction <add>, %30, %cst_23 [2] : vector<8x1x128xf32> to vector<8x1xf32>
    %32 = vector.shape_cast %31 : vector<8x1xf32> to vector<8x1x1xf32>
    %cst_24 = arith.constant 0.000000e+00 : f32
    %33 = vector.broadcast %cst_24 : f32 to vector<8x1x1xf32>
    %34 = arith.cmpf ogt, %32, %33 : vector<8x1x1xf32>
    %cst_25 = arith.constant 1.000000e+00 : f32
    %35 = vector.broadcast %cst_25 : f32 to vector<8x1x1xf32>
    %36 = arith.select %34, %32, %35 : vector<8x1x1xi1>, vector<8x1x1xf32>
    %37 = vector.broadcast %36 : vector<8x1x1xf32> to vector<8x1x128xf32>
    %38 = arith.divf %30, %37 : vector<8x1x128xf32>
    %c0_26 = arith.constant 0 : index
    %c0_27 = arith.constant 0 : index
    %c0_28 = arith.constant 0 : index
    %39 = vector.load %arg3[%c0_26, %c0_27, %c0_28] : memref<8x128x32xf32, #tpu.memory_space<vmem>>, vector<8x128x32xf32>
    "tpu.trace_start"() <{level = 10 : i32, message = "bqt,btn->bqn"}> : () -> ()
    %cst_29 = arith.constant dense<0.000000e+00> : vector<8x1x32xf32>
    %40 = tpu.matmul %38, %39, %cst_29 {dimension_numbers = #tpu.dot_dimension_numbers<[2], [1], [1], [2], [0, 0, 0, 1, 1, 2], [0], [0]>} : vector<8x1x128xf32>, vector<8x128x32xf32>, vector<8x1x32xf32> -> vector<8x1x32xf32>
    "tpu.trace_stop"() : () -> ()
    %c0_30 = arith.constant 0 : index
    %c0_31 = arith.constant 0 : index
    %c0_32 = arith.constant 0 : index
    %41 = vector.load %arg11[%c0_30, %c0_31, %c0_32] : memref<8x1x32xf32, #tpu.memory_space<vmem>>, vector<8x1x32xf32>
    tpu.vector_store %arg11[%c0_30, %c0_31, %c0_32], %40 {strides = array<i32>} : memref<8x1x32xf32, #tpu.memory_space<vmem>>, vector<8x1x32xf32>,
    %c0_33 = arith.constant 0 : index
    %c0_34 = arith.constant 0 : index
    %c0_35 = arith.constant 0 : index
    %42 = vector.load %arg12[%c0_33, %c0_34, %c0_35] : memref<8x1x128xf32, #tpu.memory_space<vmem>>, vector<8x1x128xf32>
    tpu.vector_store %arg12[%c0_33, %c0_34, %c0_35], %38 {strides = array<i32>} : memref<8x1x128xf32, #tpu.memory_space<vmem>>, vector<8x1x128xf32>,
    %c0_36 = arith.constant 0 : index
    %c0_37 = arith.constant 0 : index
    %c0_38 = arith.constant 0 : index
    %43 = vector.load %arg8[%c0_36, %c0_37, %c0_38] : memref<8x1x128xf32, #tpu.memory_space<vmem>>, vector<8x1x128xf32>
    %44 = arith.addf %43, %38 : vector<8x1x128xf32>
    %c0_39 = arith.constant 0 : index
    %c0_40 = arith.constant 0 : index
    %c0_41 = arith.constant 0 : index
    %45 = vector.load %arg13[%c0_39, %c0_40, %c0_41] : memref<8x1x128xf32, #tpu.memory_space<vmem>>, vector<8x1x128xf32>
    tpu.vector_store %arg13[%c0_39, %c0_40, %c0_41], %44 {strides = array<i32>} : memref<8x1x128xf32, #tpu.memory_space<vmem>>, vector<8x1x128xf32>,
    %46 = arith.mulf %22, %9 : vector<8x1x128xf32>
    %c0_42 = arith.constant 0 : index
    %c0_43 = arith.constant 0 : index
    %c0_44 = arith.constant 0 : index
    %47 = vector.load %arg14[%c0_42, %c0_43, %c0_44] : memref<8x1x128xf32, #tpu.memory_space<vmem>>, vector<8x1x128xf32>
    tpu.vector_store %arg14[%c0_42, %c0_43, %c0_44], %46 {strides = array<i32>} : memref<8x1x128xf32, #tpu.memory_space<vmem>>, vector<8x1x128xf32>,
    return
  }
  func.func @transform_0(%arg0: i32, %arg1: memref<1xi32, #tpu.memory_space<smem>>) -> (i32, i32, i32) {
    %c0_i32 = arith.constant 0 : i32
    %c0_i32_0 = arith.constant 0 : i32
    %c0_i32_1 = arith.constant 0 : i32
    return %arg0, %c0_i32, %c0_i32_0 : i32, i32, i32
  }
  func.func @transform_1(%arg0: i32, %arg1: memref<1xi32, #tpu.memory_space<smem>>) -> (i32, i32, i32) {
    %c0_i32 = arith.constant 0 : i32
    %c0_i32_0 = arith.constant 0 : i32
    %c0_i32_1 = arith.constant 0 : i32
    return %arg0, %c0_i32, %c0_i32_0 : i32, i32, i32
  }
  func.func @transform_2(%arg0: i32, %arg1: memref<1xi32, #tpu.memory_space<smem>>) -> (i32, i32, i32) {
    %c0_i32 = arith.constant 0 : i32
    %c0_i32_0 = arith.constant 0 : i32
    %c0_i32_1 = arith.constant 0 : i32
    return %arg0, %c0_i32, %c0_i32_0 : i32, i32, i32
  }
  func.func @transform_3(%arg0: i32, %arg1: memref<1xi32, #tpu.memory_space<smem>>) -> (i32, i32, i32) {
    %c0_i32 = arith.constant 0 : i32
    %c0_i32_0 = arith.constant 0 : i32
    %c0_i32_1 = arith.constant 0 : i32
    return %arg0, %c0_i32, %c0_i32_0 : i32, i32, i32
  }
  func.func @transform_4(%arg0: i32, %arg1: memref<1xi32, #tpu.memory_space<smem>>) -> (i32, i32, i32) {
    %c0_i32 = arith.constant 0 : i32
    %c0_i32_0 = arith.constant 0 : i32
    %c0_i32_1 = arith.constant 0 : i32
    return %arg0, %c0_i32, %c0_i32_0 : i32, i32, i32
  }
  func.func @transform_5(%arg0: i32, %arg1: memref<1xi32, #tpu.memory_space<smem>>) -> (i32, i32, i32) {
    %c0_i32 = arith.constant 0 : i32
    %c0_i32_0 = arith.constant 0 : i32
    %c0_i32_1 = arith.constant 0 : i32
    return %arg0, %c0_i32, %c0_i32_0 : i32, i32, i32
  }
  func.func @transform_6(%arg0: i32, %arg1: memref<1xi32, #tpu.memory_space<smem>>) -> (i32, i32, i32) {
    %c0_i32 = arith.constant 0 : i32
    %c0_i32_0 = arith.constant 0 : i32
    %c0_i32_1 = arith.constant 0 : i32
    return %arg0, %c0_i32, %c0_i32_0 : i32, i32, i32
  }
  func.func @transform_7(%arg0: i32, %arg1: memref<1xi32, #tpu.memory_space<smem>>) -> (i32, i32, i32) {
    %c0_i32 = arith.constant 0 : i32
    %c0_i32_0 = arith.constant 0 : i32
    %c0_i32_1 = arith.constant 0 : i32
    %c0_i32_2 = arith.constant 0 : i32
    return %c0_i32, %c0_i32_0, %c0_i32_1 : i32, i32, i32
  }
  func.func @transform_8(%arg0: i32, %arg1: memref<1xi32, #tpu.memory_space<smem>>) -> (i32, i32, i32) {
    %c0_i32 = arith.constant 0 : i32
    %c0_i32_0 = arith.constant 0 : i32
    %c0_i32_1 = arith.constant 0 : i32
    %c0_i32_2 = arith.constant 0 : i32
    return %c0_i32, %c0_i32_0, %c0_i32_1 : i32, i32, i32
  }
  func.func @transform_9(%arg0: i32, %arg1: memref<1xi32, #tpu.memory_space<smem>>) -> (i32, i32, i32) {
    %c0_i32 = arith.constant 0 : i32
    %c0_i32_0 = arith.constant 0 : i32
    %c0_i32_1 = arith.constant 0 : i32
    return %arg0, %c0_i32, %c0_i32_0 : i32, i32, i32
  }
  func.func @transform_10(%arg0: i32, %arg1: memref<1xi32, #tpu.memory_space<smem>>) -> (i32, i32, i32) {
    %c0_i32 = arith.constant 0 : i32
    %c0_i32_0 = arith.constant 0 : i32
    %c0_i32_1 = arith.constant 0 : i32
    return %arg0, %c0_i32, %c0_i32_0 : i32, i32, i32
  }
  func.func @transform_11(%arg0: i32, %arg1: memref<1xi32, #tpu.memory_space<smem>>) -> (i32, i32, i32) {
    %c0_i32 = arith.constant 0 : i32
    %c0_i32_0 = arith.constant 0 : i32
    %c0_i32_1 = arith.constant 0 : i32
    return %arg0, %c0_i32, %c0_i32_0 : i32, i32, i32
  }
  func.func @transform_12(%arg0: i32, %arg1: memref<1xi32, #tpu.memory_space<smem>>) -> (i32, i32, i32) {
    %c0_i32 = arith.constant 0 : i32
    %c0_i32_0 = arith.constant 0 : i32
    %c0_i32_1 = arith.constant 0 : i32
    return %arg0, %c0_i32, %c0_i32_0 : i32, i32, i32
  }
}

</mosaic_0001>

<bundles_post_ra>
// kernel: tpu_custom_call.1
= control target key start
LH: loop header
LB: loop body
LE: loop exit
PB: predicated region body
PF: predicated region fallthrough
CT: control target
= control target key end

     0   :  { %s5823_s0 = inlined_call_operand.<no memory space> [shape: s32[1], index: 0, kind: input, shape index: {}]   ;;  %s5824_s1 = inlined_call_operand.vmem [shape: f32[16,1,32], index: 1, kind: input, shape index: {}]   ;;  %s5825_s2 = inlined_call_operand.vmem [shape: f32[16,128,32], index: 2, kind: input, shape index: {}]   ;;  %s5826_s3 = inlined_call_operand.vmem [shape: f32[16,128,32], index: 3, kind: input, shape index: {}]   ;;  %s5827_s4 = inlined_call_operand.vmem [shape: s32[16,1,128], index: 4, kind: input, shape index: {}]   ;;  %s5828_s5 = inlined_call_operand.vmem [shape: s32[16,1,128], index: 5, kind: input, shape index: {}]   ;;  %s5829_s6 = inlined_call_operand.vmem [shape: f32[16,128,1], index: 6, kind: input, shape index: {}]   ;;  %s5830_s7 = inlined_call_operand.vmem [shape: f32[16,1,128], index: 7, kind: input, shape index: {}]   ;;  %s5831_s8 = inlined_call_operand.vmem [shape: f32[1,1,32], index: 8, kind: input, shape index: {}]   ;;  %s5832_s9 = inlined_call_operand.vmem [shape: f32[8,1,32], index: 9, kind: input, shape index: {}]   ;;  %s5833_s10 = inlined_call_operand.hbm [shape: f32[16,1,32], index: 10, kind: output, shape index: {0}]   ;;  %s5834_s11 = inlined_call_operand.hbm [shape: f32[16,1,128], index: 11, kind: output, shape index: {1}]   ;;  %s5835_s12 = inlined_call_operand.hbm [shape: f32[16,1,128], index: 12, kind: output, shape index: {2}]   ;;  %s5836_s13 = inlined_call_operand.hbm [shape: f32[16,1,128], index: 13, kind: output, shape index: {3}]  }
   0x1   :  { %5838 = sst [smem:[#allocation14_spill]] %s5824_s1 }
   0x2   :  { %5839 = sst [smem:[#allocation15_spill]] %s5825_s2 }
   0x3   :  { %5840 = sst [smem:[#allocation16_spill]] %s5826_s3 }
   0x4   :  { %5841 = sst [smem:[#allocation17_spill]] %s5827_s4 }
   0x5   :  { %5842 = sst [smem:[#allocation18_spill]] %s5828_s5 }
   0x6   :  { %5843 = sst [smem:[#allocation19_spill]] %s5829_s6 }
   0x7   :  { %5844 = sst [smem:[#allocation20_spill]] %s5830_s7 }
   0x8   :  { %5845 = sst [smem:[#allocation21_spill]] %s5831_s8 }
   0x9   :  { %5846 = sst [smem:[#allocation22_spill]] %s5832_s9 }
   0xa   :  { %5847 = sst [smem:[#allocation23_spill]] %s5834_s11 }
   0xb   :  { %19 = sst [smem:[#allocation3]] %s5823_s0 }
   0xc   :  { %20 = vsyncpa [#allocation5], 0 }
   0xd   :  { %22 = vsyncpa [#allocation5 + $0x1], 0 }
   0xe   :  { %23 = vsyncpa [#allocation7], 0 }
   0xf   :  { %25 = vsyncpa [#allocation7 + $0x1], 0 }
  0x10   :  { %26 = vsyncpa [#allocation10], 0 }
  0x11   :  { %28 = vsyncpa [#allocation10 + $0x1], 0  ;;  %s4296_s27 = smov 0   ;;  %s4298_s28 = smov 0  }
  0x12   :  { %s4300_s29 = smov 0   ;;  %s4302_s30 = smov 0  }
  0x13 LB: > { %s4317_s0 = sadd.s32 4294967295, %s4217_s30   ;;  %s5837_s14 = sadd.s32 4294967294, %s4217_s30   ;;  %s4217_s30 = sphi %s4302_s30, %s5872_s30   ;;  %s4213_s29 = sphi %s4300_s29, %s5871_s29   ;;  %s4209_s28 = sphi %s4298_s28, %s5870_s28   ;;  %s4205_s27 = sphi %s4296_s27, %s5869_s27  }
  0x14   : > { %s4321_s15 = sadd.s32 1, %s4217_s30   ;;  %s265_s16 = sadd.s32 1, %s4213_s29 }
  0x15   : > { %s262_s17 = ssub.s32 %s4217_s30, %s4321_s15  ;;  %p275_p0 = scmp.ne.s32.totalorder %s4213_s29, %s4209_s28 }
  0x16   : > { %p263_p1 = scmp.eq.s32.totalorder %s262_s17, 0  ;;  %p276_p2 = scmp.eq.s32.totalorder %s4317_s0, 1 }
  0x17   : > { %p281_p3 = scmp.ne.s32.totalorder %s4209_s28, %s4205_s27  ;;  %p282_p4 = scmp.eq.s32.totalorder %s5837_s14, 1 }
  0x18   : > { %s4334_s18 = scalar_select %p263_p1, %s4213_s29, %s265_s16  }
  0x19   : > { %p4336_p5 = por %p276_p2, %p275_p0  ;;  %p4340_p6 = por %p282_p4, %p281_p3 }
  0x1a   : > { %p3525_p7 = scmp.ge.s32.totalorder %s4217_s30, 1  ;;  %p446_p8 = scmp.lt.s32.totalorder %s4217_s30, 3 }
  0x1c   : > { %p447_p9 = pnand %p3525_p7, %p446_p8 }
  0x1d   : > { %s4347_s21 = sshll.u32 (!%p447_p9), %s4317_s0, 3  ;;  %s5850_s1 = sld [smem:[#allocation14_spill]] (!%p447_p9) }
  0x1e   : > { %450 = sbr.rel (%p447_p9) target bundleno = 1032 (0x408), region = 56  ;;  %p533_p10 = scmp.lt.s32.totalorder (!%p447_p9), %s4347_s21, 15 }
  0x1f   : > { %s5851_s6 = sld [smem:[#allocation19_spill]] (!%p447_p9) }
  0x20   : > { %s5852_s3 = sld [smem:[#allocation16_spill]] (!%p447_p9) }
  0x21   : > { %s5853_s8 = sld [smem:[#allocation21_spill]] (!%p447_p9) }
  0x22   : > { %s5854_s9 = sld [smem:[#allocation22_spill]] (!%p447_p9) }
  0x23   : > { %v4219_v0 = vmov 0   ;;  %s4351_s22 = scalar_select %p533_p10, %s4347_s21, 15  ;;  %vm2087_vm0 = vcmask 261120   ;;  %vm2664_vm9 = vcmask 1040384  }
  0x24   : > { %3760 = vset.pattern.permute.xlu2 %v4219_v0  ;;  %3759 = vset.pattern.permute.xlu1 %v4219_v0  ;;  %s5233_s17 = sld [smem:[#allocation3]] }
  0x25   : > { %3758 = vset.pattern.permute.xlu0 %v4219_v0  ;;  %s4354_s23 = sshll.u32 %s4351_s22, 7  ;;  %s4360_s26 = scalar_lea.vmem %s5850_s1, %s4351_s22 }
  0x26   : > { %s4366_s14 = scalar_lea.vmem %s5851_s6, %s4354_s23  ;;  %s4461_s16 = scalar_lea.vmem %s5852_s3, %s4354_s23 }
  0x27   : > { %v927_v1 = vld [vmem:[%s4366_s14 + $0x20] sm:$0xff]  ;;  %v925_v2 = vld [vmem:[%s4366_s14 + $0x10] sm:$0xff]  ;;  %v928_v4 = vld [vmem:[%s4366_s14 + $0x28] sm:$0xff]  ;;  %s5855_s4 = sld [smem:[#allocation17_spill]]  ;;  %s3284_s1 = scalar_lea.hbm %s5835_s12, %s4347_s21 }
  0x28   : > { %v923_v3 = vld [vmem:[%s4366_s14] sm:$0xff]  ;;  %1074 = vperm.xlu2 %3760, %v927_v1   ;;  %1064 = vperm.xlu1 %3759, %v925_v2   ;;  %v926_v5 = vld [vmem:[%s4366_s14 + $0x18] sm:$0xff]  ;;  %v924_v6 = vld [vmem:[%s4366_s14 + $0x8] sm:$0xff]  ;;  %s5856_s5 = sld [smem:[#allocation18_spill]] }
  0x29   : > { %1054 = vperm.xlu0 %3758, %v923_v3   ;;  %v931_v7 = vld [vmem:[%s4366_s14 + $0x40] sm:$0xff]  ;;  %v930_v8 = vld [vmem:[%s4366_s14 + $0x38] sm:$0xff]  ;;  %v929_v9 = vld [vmem:[%s4366_s14 + $0x30] sm:$0xff]  ;;  %s5865_s2 = sld [smem:[#allocation15_spill]] }
  0x2a   : > { %v934_v10 = vld [vmem:[%s4366_s14 + $0x58] sm:$0xff]  ;;  %v933_v11 = vld [vmem:[%s4366_s14 + $0x50] sm:$0xff]  ;;  %v932_v12 = vld [vmem:[%s4366_s14 + $0x48] sm:$0xff]  ;;  %s5866_s7 = sld [smem:[#allocation20_spill]] }
  0x2b   : > { %v937_v13 = vld [vmem:[%s4366_s14 + $0x70] sm:$0xff]  ;;  %v936_v14 = vld [vmem:[%s4366_s14 + $0x68] sm:$0xff]  ;;  %v935_v15 = vld [vmem:[%s4366_s14 + $0x60] sm:$0xff]  ;;  %s5867_s11 = sld [smem:[#allocation23_spill]] }
  0x2c   : > { %v940_v16 = vld [vmem:[%s4366_s14 + $0x88] sm:$0xff]  ;;  %v939_v17 = vld [vmem:[%s4366_s14 + $0x80] sm:$0xff]  ;;  %v938_v18 = vld [vmem:[%s4366_s14 + $0x78] sm:$0xff] }
  0x2d   : > { %v943_v19 = vld [vmem:[%s4366_s14 + $0xa0] sm:$0xff]  ;;  %v942_v20 = vld [vmem:[%s4366_s14 + $0x98] sm:$0xff]  ;;  %v941_v21 = vld [vmem:[%s4366_s14 + $0x90] sm:$0xff]  ;;  %s5260_s24 = scalar_lea.vmem %s5855_s4, %s4351_s22 }
  0x2e   : > { %v946_v22 = vld [vmem:[%s4366_s14 + $0xb8] sm:$0xff]  ;;  %v945_v23 = vld [vmem:[%s4366_s14 + $0xb0] sm:$0xff]  ;;  %v944_v24 = vld [vmem:[%s4366_s14 + $0xa8] sm:$0xff]  ;;  %s5266_s6 = scalar_lea.vmem %s5856_s5, %s4351_s22 }
  0x2f   : > { %v949_v25 = vld [vmem:[%s4366_s14 + $0xd0] sm:$0xff]  ;;  %v948_v26 = vld [vmem:[%s4366_s14 + $0xc8] sm:$0xff]  ;;  %v947_v27 = vld [vmem:[%s4366_s14 + $0xc0] sm:$0xff]  ;;  %s5490_s25 = scalar_lea.vmem %s5865_s2, %s4354_s23  ;;  %s3231_s23 = sand.u32 1, %s4317_s0  }
  0x30   : > { %1079 = vperm.xlu2 %3760, %v928_v4   ;;  %1069 = vperm.xlu1 %3759, %v926_v5   ;;  %v952_v28 = vld [vmem:[%s4366_s14 + $0xe8] sm:$0xff]  ;;  %v951_v29 = vld [vmem:[%s4366_s14 + $0xe0] sm:$0xff]  ;;  %v950_v30 = vld [vmem:[%s4366_s14 + $0xd8] sm:$0xff] }
  0x31   : > { %1059 = vperm.xlu0 %3758, %v924_v6   ;;  %v955_v31 = vld [vmem:[%s4366_s14 + $0x100] sm:$0xff]  ;;  %v954_v32 = vld [vmem:[%s4366_s14 + $0xf8] sm:$0xff]  ;;  %v953_v33 = vld [vmem:[%s4366_s14 + $0xf0] sm:$0xff] }
  0x32   : > { %v958_v34 = vld [vmem:[%s4366_s14 + $0x118] sm:$0xff]  ;;  %v957_v35 = vld [vmem:[%s4366_s14 + $0x110] sm:$0xff]  ;;  %v956_v36 = vld [vmem:[%s4366_s14 + $0x108] sm:$0xff] }
  0x33   : > { %v961_v38 = vld [vmem:[%s4366_s14 + $0x130] sm:$0xff]  ;;  %v960_v39 = vld [vmem:[%s4366_s14 + $0x128] sm:$0xff]  ;;  %v959_v40 = vld [vmem:[%s4366_s14 + $0x120] sm:$0xff] }
  0x34   : > { %v964_v42 = vld [vmem:[%s4366_s14 + $0x148] sm:$0xff]  ;;  %v963_v43 = vld [vmem:[%s4366_s14 + $0x140] sm:$0xff]  ;;  %v962_v44 = vld [vmem:[%s4366_s14 + $0x138] sm:$0xff] }
  0x35   : > { %v967_v46 = vld [vmem:[%s4366_s14 + $0x160] sm:$0xff]  ;;  %v966_v47 = vld [vmem:[%s4366_s14 + $0x158] sm:$0xff]  ;;  %v965_v48 = vld [vmem:[%s4366_s14 + $0x150] sm:$0xff] }
  0x36   : > { %v970_v52 = vld [vmem:[%s4366_s14 + $0x178] sm:$0xff]  ;;  %v969_v53 = vld [vmem:[%s4366_s14 + $0x170] sm:$0xff]  ;;  %v968_v54 = vld [vmem:[%s4366_s14 + $0x168] sm:$0xff] }
  0x37   : > { %v973_v58 = vld [vmem:[%s4366_s14 + $0x190] sm:$0xff]  ;;  %v972_v59 = vld [vmem:[%s4366_s14 + $0x188] sm:$0xff]  ;;  %v971_v60 = vld [vmem:[%s4366_s14 + $0x180] sm:$0xff] }
  0x38   : > { %1094 = vperm.xlu2 %3760, %v931_v7   ;;  %1089 = vperm.xlu1 %3759, %v930_v8   ;;  %v976_v0 = vld [vmem:[%s4366_s14 + $0x1a8] sm:$0xff]  ;;  %v975_v1 = vld [vmem:[%s4366_s14 + $0x1a0] sm:$0xff]  ;;  %v974_v2 = vld [vmem:[%s4366_s14 + $0x198] sm:$0xff] }
  0x39   : > { %1084 = vperm.xlu0 %3758, %v929_v9   ;;  %v984_v6 = vld [vmem:[%s4366_s14 + $0x1e8] sm:$0xff]  ;;  %v985_v7 = vld [vmem:[%s4366_s14 + $0x1f0] sm:$0xff]  ;;  %v986_v8 = vld [vmem:[%s4366_s14 + $0x1f8] sm:$0xff] }
  0x40   : > { %1109 = vperm.xlu2 %3760, %v934_v10   ;;  %1104 = vperm.xlu1 %3759, %v933_v11  }
  0x41   : > { %1099 = vperm.xlu0 %3758, %v932_v12   ;;  %v983_v12 = vld [vmem:[%s4366_s14 + $0x1e0] sm:$0xff] }
  0x48   : > { %1124 = vperm.xlu2 %3760, %v937_v13   ;;  %1119 = vperm.xlu1 %3759, %v936_v14   ;;  %v1050_v13 = vld [vmem:[%s4366_s14 + $0x3f8] sm:$0xff] }
  0x49   : > { %1114 = vperm.xlu0 %3758, %v935_v15   ;;  %v1034_v14 = vld [vmem:[%s4366_s14 + $0x378] sm:$0xff] }
  0x4a   : > { %v650_v15 = vld [vmem:[%s4461_s16 + $0x78] sm:$0xff] }
  0x50   : > { %1139 = vperm.xlu2 %3760, %v940_v16   ;;  %1134 = vperm.xlu1 %3759, %v939_v17   ;;  %v4466_v16 = vld [vmem:[%s4360_s26] ss:$0 sm:$0xff] }
  0x51   : > { %1129 = vperm.xlu0 %3758, %v938_v18   ;;  %v4471_v17 = vld [vmem:[%s5853_s8] ss:$0 sm:$0xff]  ;;  %v649_v18 = vld [vmem:[%s4461_s16 + $0x70] sm:$0xff] }
  0x58   : > { %1154 = vperm.xlu2 %3760, %v943_v19   ;;  %1149 = vperm.xlu1 %3759, %v942_v20  }
  0x59   : > { %1144 = vperm.xlu0 %3758, %v941_v21   ;;  %v810_v21 = vadd.f32 %v4466_v16, %v650_v15 }
  0x60   : > { %1169 = vperm.xlu2 %3760, %v946_v22   ;;  %1164 = vperm.xlu1 %3759, %v945_v23  }
  0x61   : > { %1159 = vperm.xlu0 %3758, %v944_v24   ;;  %v809_v24 = vadd.f32 %v4466_v16, %v649_v18 }
  0x68   : > { %1184 = vperm.xlu2 %3760, %v949_v25   ;;  %1179 = vperm.xlu1 %3759, %v948_v26   ;;  %v982_v26 = vld [vmem:[%s4366_s14 + $0x1d8] sm:$0xff] }
  0x69   : > { %1174 = vperm.xlu0 %3758, %v947_v27   ;;  %v1049_v27 = vld [vmem:[%s4366_s14 + $0x3f0] sm:$0xff] }
  0x70   : > { %1199 = vperm.xlu2 %3760, %v952_v28   ;;  %1194 = vperm.xlu1 %3759, %v951_v29   ;;  %v648_v28 = vld [vmem:[%s4461_s16 + $0x68] sm:$0xff] }
  0x71   : > { %1189 = vperm.xlu0 %3758, %v950_v30   ;;  %v1033_v30 = vld [vmem:[%s4366_s14 + $0x370] sm:$0xff] }
  0x78   : > { %1214 = vperm.xlu2 %3760, %v955_v31   ;;  %1209 = vperm.xlu1 %3759, %v954_v32   ;;  %v808_v32 = vadd.f32 %v4466_v16, %v648_v28  ;;  %v1047_v28 = vld [vmem:[%s4366_s14 + $0x3e0] sm:$0xff] }
  0x79   : > { %1204 = vperm.xlu0 %3758, %v953_v33  }
  0x80   : > { %1229 = vperm.xlu2 %3760, %v958_v34   ;;  %1224 = vperm.xlu1 %3759, %v957_v35   ;;  %v647_v34 = vld [vmem:[%s4461_s16 + $0x60] sm:$0xff] }
  0x81   : > { %1219 = vperm.xlu0 %3758, %v956_v36  }
  0x82   : > { %v4404_v37 = vpop.permute.xlu2 %1074 }
  0x88   : > { %1244 = vperm.xlu2 %3760, %v961_v38   ;;  %1239 = vperm.xlu1 %3759, %v960_v39   ;;  %v807_v39 = vadd.f32 %v4466_v16, %v647_v34 }
  0x89   : > { %1234 = vperm.xlu0 %3758, %v959_v40  }
  0x8a   : > { %v4409_v41 = vpop.permute.xlu2 %1079 }
  0x90   : > { %1259 = vperm.xlu2 %3760, %v964_v42   ;;  %1254 = vperm.xlu1 %3759, %v963_v43   ;;  %v981_v43 = vld [vmem:[%s4366_s14 + $0x1d0] sm:$0xff] }
  0x91   : > { %1249 = vperm.xlu0 %3758, %v962_v44   ;;  %v646_v44 = vld [vmem:[%s4461_s16 + $0x58] sm:$0xff] }
  0x92   : > { %v4414_v45 = vpop.permute.xlu2 %1094 }
  0x98   : > { %1274 = vperm.xlu2 %3760, %v967_v46   ;;  %1269 = vperm.xlu1 %3759, %v966_v47   ;;  %v1048_v46 = vld [vmem:[%s4366_s14 + $0x3e8] sm:$0xff] }
  0x99   : > { %1264 = vperm.xlu0 %3758, %v965_v48   ;;  %v1032_v47 = vld [vmem:[%s4366_s14 + $0x368] sm:$0xff] }
  0x9a   : > { %v4419_v49 = vpop.permute.xlu2 %1109  ;;  %v4421_v50 = vpop.permute.xlu1 %1064 }
  0x9b   : > { %v4423_v51 = vpop.permute.xlu0 %1054 }
  0xa0   : > { %1289 = vperm.xlu2 %3760, %v970_v52   ;;  %1284 = vperm.xlu1 %3759, %v969_v53   ;;  %v806_v52 = vadd.f32 %v4466_v16, %v646_v44  ;;  %v1706_v53 = vmul.f32 %v4471_v17, %v4419_v49 }
  0xa1   : > { %1279 = vperm.xlu0 %3758, %v968_v54  }
  0xa2   : > { %v1125_v55 = vpop.permute.xlu2 %1124  ;;  %v4428_v56 = vpop.permute.xlu1 %1069 }
  0xa3   : > { %v4430_v57 = vpop.permute.xlu0 %1059  ;;  %v1709_v25 = vmul.f32 %v4471_v17, %v1125_v55  ;;  %v645_v55 = vld [vmem:[%s4461_s16 + $0x50] sm:$0xff] }
  0xa4   : > { %v805_v49 = vadd.f32 %v4466_v16, %v645_v55 }
  0xa5   : > { %v1837_v31 = vadd.f32 %v1709_v25, %v809_v24  ;;  %v1703_v24 = vmul.f32 %v4471_v17, %v4414_v45  ;;  %v1001_v25 = vld [vmem:[%s4366_s14 + $0x270] sm:$0xff] }
  0xa6   : > { %v641_v45 = vld [vmem:[%s4461_s16 + $0x30] sm:$0xff] }
  0xa8   : > { %1304 = vperm.xlu2 %3760, %v973_v58   ;;  %1299 = vperm.xlu1 %3759, %v972_v59  }
  0xa9   : > { %1294 = vperm.xlu0 %3758, %v971_v60  }
  0xaa   : > { %v4435_v61 = vpop.permute.xlu2 %1139  ;;  %v4437_v62 = vpop.permute.xlu1 %1089 }
  0xab   : > { %v4439_v63 = vpop.permute.xlu0 %1084 }
  0xac   : > { %v1701_v44 = vmul.f32 %v4471_v17, %v4439_v63 }
  0xb0   : > { %1319 = vperm.xlu2 %3760, %v976_v0   ;;  %1314 = vperm.xlu1 %3759, %v975_v1   ;;  %v1834_v1 = vadd.f32 %v1706_v53, %v806_v52  ;;  %v666_v52 = vld [vmem:[%s4461_s16 + $0xf8] sm:$0xff] }
  0xb1   : > { %1309 = vperm.xlu0 %3758, %v974_v2  }
  0xb2   : > { %v4444_v3 = vpop.permute.xlu2 %1154  ;;  %v4446_v4 = vpop.permute.xlu1 %1104 }
  0xb3   : > { %v4448_v5 = vpop.permute.xlu0 %1099  ;;  %v1705_v2 = vmul.f32 %v4471_v17, %v4446_v4  ;;  %v643_v4 = vld [vmem:[%s4461_s16 + $0x40] sm:$0xff] }
  0xb8   : > { %1359 = vperm.xlu2 %3760, %v984_v6   ;;  %1364 = vperm.xlu1 %3759, %v985_v7   ;;  %v1031_v6 = vld [vmem:[%s4366_s14 + $0x360] sm:$0xff]  ;;  %v644_v7 = vld [vmem:[%s4461_s16 + $0x48] sm:$0xff] }
  0xb9   : > { %1369 = vperm.xlu0 %3758, %v986_v8   ;;  %v1018_v8 = vld [vmem:[%s4366_s14 + $0x2f8] sm:$0xff] }
  0xba   : > { %v4453_v9 = vpop.permute.xlu2 %1169  ;;  %v1120_v10 = vpop.permute.xlu1 %1119 }
  0xbb   : > { %v1115_v11 = vpop.permute.xlu0 %1114  ;;  %v1708_v33 = vmul.f32 %v4471_v17, %v1120_v10  ;;  %v1002_v10 = vld [vmem:[%s4366_s14 + $0x278] sm:$0xff] }
  0xbc   : > { %v1707_v42 = vmul.f32 %v4471_v17, %v1115_v11 }
  0xbd   : > { %v1836_v40 = vadd.f32 %v1708_v33, %v808_v32  ;;  %v1702_v32 = vmul.f32 %v4471_v17, %v4437_v62 }
  0xbe   : > { %v1835_v54 = vadd.f32 %v1707_v42, %v807_v39  ;;  %v640_v42 = vld [vmem:[%s4461_s16 + $0x28] sm:$0xff] }
  0xbf   : > { %v800_v55 = vadd.f32 %v4466_v16, %v640_v42 }
  0xc0   : > { %1354 = vperm.xlu2 %3760, %v983_v12   ;;  %1689 = vperm.xlu1 %3759, %v1050_v13   ;;  %v1833_v12 = vadd.f32 %v1705_v2, %v805_v49  ;;  %v804_v13 = vadd.f32 %v4466_v16, %v644_v7  ;;  %v665_v2 = vld [vmem:[%s4461_s16 + $0xf0] sm:$0xff] }
  0xc1   : > { %1609 = vperm.xlu0 %3758, %v1034_v14   ;;  %v1704_v14 = vmul.f32 %v4471_v17, %v4448_v5 }
  0xc2   : > { %v4474_v19 = vpop.permute.xlu2 %1184  ;;  %v4476_v20 = vpop.permute.xlu1 %1134 }
  0xc3   : > { %v1130_v22 = vpop.permute.xlu0 %1129  ;;  %v1832_v5 = vadd.f32 %v1704_v14, %v804_v13  ;;  %v1699_v14 = vmul.f32 %v4471_v17, %v4404_v37 }
  0xc4   : > { %v1710_v23 = vmul.f32 %v4471_v17, %v1130_v22 }
  0xc6   : > { %v1838_v29 = vadd.f32 %v1710_v23, %v810_v21  ;;  %v803_v23 = vadd.f32 %v4466_v16, %v643_v4 }
  0xc8   : > { %1349 = vperm.xlu2 %3760, %v982_v26   ;;  %1684 = vperm.xlu1 %3759, %v1049_v27   ;;  %3770 = vtanh.f32 %v1838_v29  ;;  %v642_v26 = vld [vmem:[%s4461_s16 + $0x38] sm:$0xff]  ;;  %v980_v27 = vld [vmem:[%s4366_s14 + $0x1c8] sm:$0xff] }
  0xc9   : > { %1604 = vperm.xlu0 %3758, %v1033_v30   ;;  %3772 = vtanh.f32 %v1837_v31  ;;  %v1831_v30 = vadd.f32 %v1703_v24, %v803_v23  ;;  %v802_v31 = vadd.f32 %v4466_v16, %v642_v26  ;;  %v1016_v24 = vld [vmem:[%s4366_s14 + $0x2e8] sm:$0xff]  ;;  %v979_v26 = vld [vmem:[%s4366_s14 + $0x1c0] sm:$0xff] }
  0xca   : > { %v4489_v35 = vpop.permute.xlu2 %1199  ;;  %v4491_v36 = vpop.permute.xlu1 %1149  ;;  %3774 = vtanh.f32 %v1836_v40 }
  0xcb   : > { %v4493_v38 = vpop.permute.xlu0 %1144  ;;  %3776 = vtanh.f32 %v1835_v54  ;;  %v1830_v62 = vadd.f32 %v1702_v32, %v802_v31  ;;  %v4560_v54 = vld [vmem:[%s4360_s26 + $0x1] ss:$0 sm:$0xff]  ;;  %v1698_v32 = vmul.f32 %v4471_v17, %v4428_v56 }
  0xcc   : > { %3778 = vtanh.f32 %v1834_v1  ;;  %v1700_v1 = vmul.f32 %v4471_v17, %v4409_v41  ;;  %v826_v63 = vadd.f32 %v4560_v54, %v666_v52  ;;  %v1697_v52 = vmul.f32 %v4471_v17, %v4421_v50 }
  0xcd   : > { %3780 = vtanh.f32 %v1833_v12  ;;  %v825_v12 = vadd.f32 %v4560_v54, %v665_v2  ;;  %v682_v2 = vld [vmem:[%s4461_s16 + $0x178] sm:$0xff] }
  0xce   : > { %v3771_v48 = vpop.eup %3770  ;;  %3782 = vtanh.f32 %v1832_v5  ;;  %v1828_v4 = vadd.f32 %v1700_v1, %v800_v55  ;;  %v638_v5 = vld [vmem:[%s4461_s16 + $0x18] sm:$0xff] }
  0xcf   : > { %3551 = vmatpush.xpose.msk.msra.mxu0 %vm2087_vm0, %v3771_v48  ;;  %v3773_v60 = vpop.eup %3772  ;;  %3784 = vtanh.f32 %v1831_v30  ;;  %v1017_v48 = vld [vmem:[%s4366_s14 + $0x2f0] sm:$0xff]  ;;  %v798_v31 = vadd.f32 %v4466_v16, %v638_v5  ;;  %v662_v55 = vld [vmem:[%s4461_s16 + $0xd8] sm:$0xff] }
  0xd0   : > { %1344 = vperm.xlu2 %3760, %v981_v43   ;;  %1679 = vperm.xlu1 %3759, %v1048_v46   ;;  %v3775_v11 = vpop.eup %3774  ;;  %v801_v43 = vadd.f32 %v4466_v16, %v641_v45  ;;  %v1046_v46 = vld [vmem:[%s4366_s14 + $0x3d8] sm:$0xff]  ;;  %3786 = vtanh.f32 %v1830_v62  ;;  %v663_v45 = vld [vmem:[%s4461_s16 + $0xe0] sm:$0xff]  ;;  %v822_v50 = vadd.f32 %v4560_v54, %v662_v55 }
  0xd1   : > { %1599 = vperm.xlu0 %3758, %v1032_v47   ;;  %v3777_v21 = vpop.eup %3776  ;;  %v1030_v47 = vld [vmem:[%s4366_s14 + $0x358] sm:$0xff]  ;;  %v823_v56 = vadd.f32 %v4560_v54, %v663_v45  ;;  %v1015_v45 = vld [vmem:[%s4366_s14 + $0x2e0] sm:$0xff] }
  0xd2   : > { %v4506_v58 = vpop.permute.xlu2 %1214  ;;  %v4508_v59 = vpop.permute.xlu1 %1164  ;;  %v1829_v49 = vadd.f32 %v1701_v44, %v801_v43  ;;  %v636_v44 = vld [vmem:[%s4461_s16 + $0x8] sm:$0xff] }
  0xd3   : > { %v4510_v0 = vpop.permute.xlu0 %1159  ;;  %3552 = vmatpush.xpose.msk.msra.mxu0 %vm2087_vm0, %v3773_v60  ;;  %v3779_v29 = vpop.eup %3778  ;;  %v639_v60 = vld [vmem:[%s4461_s16 + $0x20] sm:$0xff] }
  0xd4   : > { %v3781_v39 = vpop.eup %3780  ;;  %v799_v41 = vadd.f32 %v4466_v16, %v639_v60  ;;  %3788 = vtanh.f32 %v1829_v49  ;;  %v978_v60 = vld [vmem:[%s4366_s14 + $0x1b8] sm:$0xff]  ;;  %v1045_v49 = vld [vmem:[%s4366_s14 + $0x3d0] sm:$0xff] }
  0xd5   : > { %v3783_v53 = vpop.eup %3782 }
  0xd6   : > { %v1827_v37 = vadd.f32 %v1699_v14, %v799_v41  ;;  %v661_v14 = vld [vmem:[%s4461_s16 + $0xd0] sm:$0xff] }
  0xd7   : > { %3553 = vmatpush.xpose.msk.msra.mxu0 %vm2087_vm0, %v3775_v11 }
  0xd8   : > { %1594 = vperm.xlu2 %3760, %v1031_v6   ;;  %1529 = vperm.xlu1 %3759, %v1018_v8   ;;  %v3785_v8 = vpop.eup %3784 }
  0xd9   : > { %1449 = vperm.xlu0 %3758, %v1002_v10  }
  0xda   : > { %v4525_v15 = vpop.permute.xlu2 %1229  ;;  %v4527_v18 = vpop.permute.xlu1 %1179 }
  0xdb   : > { %v4529_v22 = vpop.permute.xlu0 %1174  ;;  %3554 = vmatpush.xpose.msk.msra.mxu0 %vm2087_vm0, %v3777_v21  ;;  %v664_v21 = vld [vmem:[%s4461_s16 + $0xe8] sm:$0xff] }
  0xdf   : > { %3555 = vmatpush.xpose.msk.msra.mxu0 %vm2087_vm0, %v3779_v29  ;;  %v1724_v29 = vmul.f32 %v4471_v17, %v4489_v35 }
  0xe0   : > { %1444 = vperm.xlu2 %3760, %v1001_v25   ;;  %1339 = vperm.xlu1 %3759, %v980_v27   ;;  %v1000_v25 = vld [vmem:[%s4366_s14 + $0x268] sm:$0xff]  ;;  %v3787_v27 = vpop.eup %3786 }
  0xe1   : > { %1674 = vperm.xlu0 %3758, %v1047_v28   ;;  %v824_v28 = vadd.f32 %v4560_v54, %v664_v21  ;;  %v3789_v62 = vpop.eup %3788 }
  0xe2   : > { %v4544_v33 = vpop.permute.xlu2 %1244  ;;  %v4546_v34 = vpop.permute.xlu1 %1194 }
  0xe3   : > { %v4548_v40 = vpop.permute.xlu0 %1189  ;;  %3556 = vmatpush.xpose.msk.msra.mxu0 %vm2087_vm0, %v3781_v39  ;;  %v637_v39 = vld [vmem:[%s4461_s16 + $0x10] sm:$0xff] }
  0xe4   : > { %v1722_v41 = vmul.f32 %v4471_v17, %v4548_v40 }
  0xe7   : > { %3557 = vmatpush.xpose.msk.msra.mxu0 %vm2087_vm0, %v3783_v53  ;;  %v1826_v53 = vadd.f32 %v1698_v32, %v798_v31  ;;  %v1028_v31 = vld [vmem:[%s4366_s14 + $0x348] sm:$0xff] }
  0xe8   : > { %1669 = vperm.xlu2 %3760, %v1046_v46   ;;  %1589 = vperm.xlu1 %3759, %v1030_v47   ;;  %v1852_v46 = vadd.f32 %v1724_v29, %v824_v28  ;;  %v1723_v47 = vmul.f32 %v4471_v17, %v4546_v34  ;;  %v796_v34 = vadd.f32 %v4466_v16, %v636_v44 }
  0xe9   : > { %1524 = vperm.xlu0 %3758, %v1017_v48   ;;  %v797_v48 = vadd.f32 %v4466_v16, %v637_v39  ;;  %v1850_v28 = vadd.f32 %v1722_v41, %v822_v50  ;;  %v999_v39 = vld [vmem:[%s4366_s14 + $0x260] sm:$0xff] }
  0xea   : > { %v4569_v6 = vpop.permute.xlu2 %1259  ;;  %v1210_v7 = vpop.permute.xlu1 %1209 }
  0xeb   : > { %v1726_v10 = vmul.f32 %v4471_v17, %v1210_v7  ;;  %v1205_v11 = vpop.permute.xlu0 %1204  ;;  %3558 = vmatpush.xpose.msk.msra.mxu0 %vm2087_vm0, %v3785_v8  ;;  %v4613_v8 = vld [vmem:[%s4360_s26 + $0x2] ss:$0 sm:$0xff] }
  0xec   : > { %v1725_v13 = vmul.f32 %v4471_v17, %v1205_v11  ;;  %v1851_v11 = vadd.f32 %v1723_v47, %v823_v56  ;;  %v659_v56 = vld [vmem:[%s4461_s16 + $0xc0] sm:$0xff] }
  0xed   : > { %v1854_v23 = vadd.f32 %v1726_v10, %v826_v63  ;;  %v1029_v63 = vld [vmem:[%s4366_s14 + $0x350] sm:$0xff]  ;;  %v635_v10 = vld [vmem:[%s4461_s16] sm:$0xff] }
  0xee   : > { %v1853_v30 = vadd.f32 %v1725_v13, %v825_v12  ;;  %v1825_v12 = vadd.f32 %v1697_v52, %v797_v48  ;;  %v1696_v13 = vmul.f32 %v4471_v17, %v4430_v57  ;;  %v795_v5 = vadd.f32 %v4466_v16, %v635_v10  ;;  %v1044_v10 = vld [vmem:[%s4366_s14 + $0x3c8] sm:$0xff] }
  0xef   : > { %3790 = vtanh.f32 %v1854_v23  ;;  %3559 = vmatpush.xpose.msk.msra.mxu0 %vm2087_vm0, %v3787_v27  ;;  %v821_v57 = vadd.f32 %v4560_v54, %v661_v14  ;;  %v1721_v27 = vmul.f32 %v4471_v17, %v4474_v19  ;;  %v1695_v16 = vmul.f32 %v4471_v17, %v4423_v51 }
  0xf0   : > { %1519 = vperm.xlu2 %3760, %v1016_v24   ;;  %3792 = vtanh.f32 %v1828_v4  ;;  %1439 = vperm.xlu1 %3759, %v1000_v25   ;;  %v842_v4 = vadd.f32 %v4613_v8, %v682_v2  ;;  %v1824_v29 = vadd.f32 %v1696_v13, %v796_v34  ;;  %v998_v2 = vld [vmem:[%s4366_s14 + $0x258] sm:$0xff]  ;;  %v977_v34 = vld [vmem:[%s4366_s14 + $0x1b0] sm:$0xff] }
  0xf1   : > { %1334 = vperm.xlu0 %3758, %v979_v26   ;;  %3794 = vtanh.f32 %v1853_v30  ;;  %v660_v30 = vld [vmem:[%s4461_s16 + $0xc8] sm:$0xff]  ;;  %v1849_v19 = vadd.f32 %v1721_v27, %v821_v57  ;;  %v1823_v51 = vadd.f32 %v1695_v16, %v795_v5  ;;  %v1717_v5 = vmul.f32 %v4471_v17, %v4508_v59  ;;  %v1043_v57 = vld [vmem:[%s4366_s14 + $0x3c0] sm:$0xff]  ;;  %v1014_v16 = vld [vmem:[%s4366_s14 + $0x2d8] sm:$0xff] }
  0xf2   : > { %v4592_v35 = vpop.permute.xlu2 %1274  ;;  %v4594_v42 = vpop.permute.xlu1 %1224  ;;  %3796 = vtanh.f32 %v1827_v37  ;;  %v820_v44 = vadd.f32 %v4560_v54, %v660_v30 }
  0xf3   : > { %v4596_v43 = vpop.permute.xlu0 %1219  ;;  %3560 = vmatpush.xpose.msk.msra.mxu0 %vm2087_vm0, %v3789_v62  ;;  %3798 = vtanh.f32 %v1852_v46  ;;  %v1720_v46 = vmul.f32 %v4471_v17, %v4527_v18 }
  0xf4   : > { %3800 = vtanh.f32 %v1826_v53 }
  0xf5   : > { %v3791_v1 = vpop.eup %3790  ;;  %3802 = vtanh.f32 %v1851_v11  ;;  %v1848_v55 = vadd.f32 %v1720_v46, %v820_v44  ;;  %v1715_v44 = vmul.f32 %v4471_v17, %v4444_v3  ;;  %v997_v3 = vld [vmem:[%s4366_s14 + $0x250] sm:$0xff] }
  0xf6   : > { %v3793_v7 = vpop.eup %3792  ;;  %3568 = vmatpush.xpose.msk.msra.mxu1 %vm2087_vm0, %v3791_v1  ;;  %3804 = vtanh.f32 %v1825_v12  ;;  %v1719_v1 = vmul.f32 %v4471_v17, %v4529_v22  ;;  %v1718_v22 = vmul.f32 %v4471_v17, %v4453_v9  ;;  %v657_v12 = vld [vmem:[%s4461_s16 + $0xb0] sm:$0xff] }
  0xf7   : > { %3561 = vmatpush.xpose.msk.msra.mxu0 %vm2087_vm0, %v3793_v7  ;;  %v3795_v21 = vpop.eup %3794 }
  0xf8   : > { %1329 = vperm.xlu2 %3760, %v978_v60   ;;  %1664 = vperm.xlu1 %3759, %v1045_v49   ;;  %v3797_v40 = vpop.eup %3796  ;;  %v819_v60 = vadd.f32 %v4560_v54, %v659_v56 }
  0xf9   : > { %1584 = vperm.xlu0 %3758, %v1029_v63   ;;  %v3799_v32 = vpop.eup %3798  ;;  %v658_v63 = vld [vmem:[%s4461_s16 + $0xb8] sm:$0xff] }
  0xfa   : > { %v1290_v23 = vpop.permute.xlu2 %1289  ;;  %v4625_v24 = vpop.permute.xlu1 %1239  ;;  %3569 = vmatpush.xpose.msk.msra.mxu1 %vm2087_vm0, %v3795_v21  ;;  %v818_v50 = vadd.f32 %v4560_v54, %v658_v63  ;;  %v1847_v41 = vadd.f32 %v1719_v1, %v819_v60  ;;  %v679_v60 = vld [vmem:[%s4461_s16 + $0x160] sm:$0xff] }
  0xfb   : > { %v1742_v25 = vmul.f32 %v4471_v17, %v1290_v23  ;;  %v4629_v26 = vpop.permute.xlu0 %1234  ;;  %3562 = vmatpush.xpose.msk.msra.mxu0 %vm2087_vm0, %v3797_v40  ;;  %v3801_v62 = vpop.eup %3800  ;;  %v817_v40 = vadd.f32 %v4560_v54, %v657_v12  ;;  %v678_v12 = vld [vmem:[%s4461_s16 + $0x158] sm:$0xff] }
  0xfc   : > { %v3803_v47 = vpop.eup %3802  ;;  %v1846_v23 = vadd.f32 %v1718_v22, %v818_v50  ;;  %v839_v50 = vadd.f32 %v4613_v8, %v679_v60  ;;  %v1739_v22 = vmul.f32 %v4471_v17, %v4592_v35 }
  0xfd   : > { %v1870_v37 = vadd.f32 %v1742_v25, %v842_v4  ;;  %v3805_v53 = vpop.eup %3804  ;;  %v656_v25 = vld [vmem:[%s4461_s16 + $0xa8] sm:$0xff]  ;;  %v1845_v59 = vadd.f32 %v1717_v5, %v817_v40  ;;  %v1713_v40 = vmul.f32 %v4471_v17, %v4493_v38  ;;  %v1042_v38 = vld [vmem:[%s4366_s14 + $0x3b8] sm:$0xff] }
  0xfe   : > { %3570 = vmatpush.xpose.msk.msra.mxu1 %vm2087_vm0, %v3799_v32  ;;  %v816_v30 = vadd.f32 %v4560_v54, %v656_v25  ;;  %v652_v25 = vld [vmem:[%s4461_s16 + $0x88] sm:$0xff] }
  0xff   : > { %3806 = vtanh.f32 %v1870_v37  ;;  %3563 = vmatpush.xpose.msk.msra.mxu0 %vm2087_vm0, %v3801_v62  ;;  %v1716_v37 = vmul.f32 %v4471_v17, %v4510_v0 }
 0x100   : > { %3808 = vtanh.f32 %v1850_v28  ;;  %1579 = vperm.xlu2 %3760, %v1028_v31   ;;  %1514 = vperm.xlu1 %3759, %v1015_v45   ;;  %v1027_v28 = vld [vmem:[%s4366_s14 + $0x340] sm:$0xff]  ;;  %v680_v45 = vld [vmem:[%s4461_s16 + $0x168] sm:$0xff] }
 0x101   : > { %3810 = vtanh.f32 %v1824_v29  ;;  %1434 = vperm.xlu0 %3758, %v999_v39   ;;  %v681_v29 = vld [vmem:[%s4461_s16 + $0x170] sm:$0xff]  ;;  %v655_v31 = vld [vmem:[%s4461_s16 + $0xa0] sm:$0xff]  ;;  %v1844_v46 = vadd.f32 %v1716_v37, %v816_v30  ;;  %v1012_v30 = vld [vmem:[%s4366_s14 + $0x2c8] sm:$0xff] }
 0x102   : > { %v4648_v48 = vpop.permute.xlu2 %1304  ;;  %v4650_v52 = vpop.permute.xlu1 %1254  ;;  %3571 = vmatpush.xpose.msk.msra.mxu1 %vm2087_vm0, %v3803_v47  ;;  %3812 = vtanh.f32 %v1849_v19  ;;  %v841_v32 = vadd.f32 %v4613_v8, %v681_v29  ;;  %v815_v0 = vadd.f32 %v4560_v54, %v655_v31  ;;  %v654_v47 = vld [vmem:[%s4461_s16 + $0x98] sm:$0xff]  ;;  %v677_v29 = vld [vmem:[%s4461_s16 + $0x150] sm:$0xff]  ;;  %v996_v31 = vld [vmem:[%s4366_s14 + $0x248] sm:$0xff] }
 0x103   : > { %v4652_v18 = vpop.permute.xlu0 %1249  ;;  %3564 = vmatpush.xpose.msk.msra.mxu0 %vm2087_vm0, %v3805_v53  ;;  %3814 = vtanh.f32 %v1823_v51  ;;  %v840_v53 = vadd.f32 %v4613_v8, %v680_v45 }
 0x104   : > { %3816 = vtanh.f32 %v1848_v55 }
 0x105   : > { %v3807_v49 = vpop.eup %3806  ;;  %3818 = vtanh.f32 %v1847_v41 }
 0x106   : > { %v3809_v7 = vpop.eup %3808  ;;  %3585 = vmatpush.xpose.msk.msra.mxu2 %vm2087_vm0, %v3807_v49  ;;  %3820 = vtanh.f32 %v1846_v23  ;;  %v1026_v49 = vld [vmem:[%s4366_s14 + $0x338] sm:$0xff] }
 0x107   : > { %v3811_v11 = vpop.eup %3810  ;;  %3572 = vmatpush.xpose.msk.msra.mxu1 %vm2087_vm0, %v3809_v7  ;;  %3822 = vtanh.f32 %v1845_v59  ;;  %v1843_v7 = vadd.f32 %v1715_v44, %v815_v0  ;;  %v812_v59 = vadd.f32 %v4560_v54, %v652_v25 }
 0x108   : > { %3565 = vmatpush.xpose.msk.msra.mxu0 %vm2087_vm0, %v3811_v11  ;;  %1429 = vperm.xlu2 %3760, %v998_v2   ;;  %v3813_v13 = vpop.eup %3812  ;;  %v1013_v2 = vld [vmem:[%s4366_s14 + $0x2d0] sm:$0xff]  ;;  %3824 = vtanh.f32 %v1844_v46  ;;  %v676_v46 = vld [vmem:[%s4461_s16 + $0x148] sm:$0xff] }
 0x109   : > { %1324 = vperm.xlu1 %3759, %v977_v34   ;;  %1659 = vperm.xlu0 %3758, %v1044_v10   ;;  %v3815_v21 = vpop.eup %3814  ;;  %v814_v34 = vadd.f32 %v4560_v54, %v654_v47  ;;  %v1714_v10 = vmul.f32 %v4471_v17, %v4491_v36  ;;  %v653_v11 = vld [vmem:[%s4461_s16 + $0x90] sm:$0xff]  ;;  %v836_v60 = vadd.f32 %v4613_v8, %v676_v46  ;;  %v672_v46 = vld [vmem:[%s4461_s16 + $0x128] sm:$0xff] }
 0x10a   : > { %v4670_v14 = vpop.permute.xlu2 %1319  ;;  %v4672_v4 = vpop.permute.xlu1 %1269  ;;  %v813_v35 = vadd.f32 %v4560_v54, %v653_v11 }
 0x10b   : > { %v4674_v9 = vpop.permute.xlu0 %1264  ;;  %3573 = vmatpush.xpose.msk.msra.mxu1 %vm2087_vm0, %v3813_v13  ;;  %v3817_v27 = vpop.eup %3816  ;;  %v1842_v23 = vadd.f32 %v1714_v10, %v814_v34  ;;  %v698_v10 = vld [vmem:[%s4461_s16 + $0x1f8] sm:$0xff] }
 0x10c   : > { %3566 = vmatpush.xpose.msk.msra.mxu0 %vm2087_vm0, %v3815_v21  ;;  %v3819_v39 = vpop.eup %3818  ;;  %v1841_v45 = vadd.f32 %v1713_v40, %v813_v35  ;;  %v1737_v0 = vmul.f32 %v4471_v17, %v4674_v9  ;;  %v1711_v9 = vmul.f32 %v4471_v17, %v4476_v20  ;;  %v995_v20 = vld [vmem:[%s4366_s14 + $0x240] sm:$0xff]  ;;  %v697_v40 = vld [vmem:[%s4461_s16 + $0x1f0] sm:$0xff] }
 0x10d   : > { %v3821_v63 = vpop.eup %3820 }
 0x10e   : > { %v3823_v13 = vpop.eup %3822 }
 0x10f   : > { %3574 = vmatpush.xpose.msk.msra.mxu1 %vm2087_vm0, %v3817_v27  ;;  %v838_v27 = vadd.f32 %v4613_v8, %v678_v12 }
 0x110   : > { %1654 = vperm.xlu2 %3760, %v1043_v57   ;;  %v1867_v57 = vadd.f32 %v1739_v22, %v839_v50  ;;  %v4766_v50 = vld [vmem:[%s4360_s26 + $0x3] ss:$0 sm:$0xff]  ;;  %v1735_v22 = vmul.f32 %v4471_v17, %v4650_v52 }
 0x111   : > { %1574 = vperm.xlu1 %3759, %v1027_v28   ;;  %1509 = vperm.xlu0 %3758, %v1014_v16   ;;  %v1738_v28 = vmul.f32 %v4471_v17, %v4672_v4  ;;  %v3825_v16 = vpop.eup %3824  ;;  %v651_v4 = vld [vmem:[%s4461_s16 + $0x80] sm:$0xff]  ;;  %v858_v25 = vadd.f32 %v4766_v50, %v698_v10 }
 0x112   : > { %v4693_v62 = vpop.permute.xlu2 %1359  ;;  %v1285_v19 = vpop.permute.xlu1 %1284 }
 0x113   : > { %v1741_v51 = vmul.f32 %v4471_v17, %v1285_v19  ;;  %v1280_v56 = vpop.permute.xlu0 %1279  ;;  %3575 = vmatpush.xpose.msk.msra.mxu1 %vm2087_vm0, %v3819_v39  ;;  %v1866_v39 = vadd.f32 %v1738_v28, %v838_v27  ;;  %v837_v19 = vadd.f32 %v4613_v8, %v677_v29  ;;  %v1734_v28 = vmul.f32 %v4471_v17, %v4652_v18 }
 0x114   : > { %v1740_v55 = vmul.f32 %v4471_v17, %v1280_v56 }
 0x115   : > { %v1869_v1 = vadd.f32 %v1741_v51, %v841_v32  ;;  %v1712_v32 = vmul.f32 %v4471_v17, %v4435_v61 }
 0x116   : > { %v1868_v41 = vadd.f32 %v1740_v55, %v840_v53  ;;  %v811_v53 = vadd.f32 %v4560_v54, %v651_v4  ;;  %v1024_v4 = vld [vmem:[%s4366_s14 + $0x328] sm:$0xff] }
 0x117   : > { %3576 = vmatpush.xpose.msk.msra.mxu1 %vm2087_vm0, %v3821_v63  ;;  %3826 = vtanh.f32 %v1869_v1  ;;  %v1840_v47 = vadd.f32 %v1712_v32, %v812_v59  ;;  %v1736_v1 = vmul.f32 %v4471_v17, %v4569_v6  ;;  %v675_v63 = vld [vmem:[%s4461_s16 + $0x140] sm:$0xff]  ;;  %v696_v32 = vld [vmem:[%s4461_s16 + $0x1e8] sm:$0xff] }
 0x118   : > { %1569 = vperm.xlu2 %3760, %v1026_v49   ;;  %3828 = vtanh.f32 %v1843_v7  ;;  %v1865_v49 = vadd.f32 %v1737_v0, %v837_v19  ;;  %v1025_v7 = vld [vmem:[%s4366_s14 + $0x330] sm:$0xff]  ;;  %v1839_v34 = vadd.f32 %v1711_v9, %v811_v53  ;;  %v835_v6 = vadd.f32 %v4613_v8, %v675_v63 }
 0x119   : > { %1504 = vperm.xlu1 %3759, %v1013_v2   ;;  %1424 = vperm.xlu0 %3758, %v997_v3   ;;  %3830 = vtanh.f32 %v1868_v41  ;;  %v1041_v3 = vld [vmem:[%s4366_s14 + $0x3b0] sm:$0xff]  ;;  %v1864_v11 = vadd.f32 %v1736_v1, %v836_v60  ;;  %v674_v41 = vld [vmem:[%s4461_s16 + $0x138] sm:$0xff]  ;;  %v1733_v19 = vmul.f32 %v4471_v17, %v4544_v33  ;;  %v695_v60 = vld [vmem:[%s4461_s16 + $0x1e0] sm:$0xff]  ;;  %v1732_v63 = vmul.f32 %v4471_v17, %v4625_v24 }
 0x11a   : > { %v4716_v36 = vpop.permute.xlu2 %1354  ;;  %v4718_v21 = vpop.permute.xlu1 %1299  ;;  %3832 = vtanh.f32 %v1842_v23  ;;  %v1863_v27 = vadd.f32 %v1735_v22, %v835_v6  ;;  %v1010_v6 = vld [vmem:[%s4366_s14 + $0x2b8] sm:$0xff] }
 0x11b   : > { %v4723_v5 = vpop.permute.xlu0 %1294  ;;  %3577 = vmatpush.xpose.msk.msra.mxu1 %vm2087_vm0, %v3823_v13  ;;  %3834 = vtanh.f32 %v1867_v57  ;;  %v834_v57 = vadd.f32 %v4613_v8, %v674_v41  ;;  %v994_v22 = vld [vmem:[%s4366_s14 + $0x238] sm:$0xff] }
 0x11c   : > { %3836 = vtanh.f32 %v1841_v45 }
 0x11d   : > { %v3827_v37 = vpop.eup %3826  ;;  %3838 = vtanh.f32 %v1866_v39  ;;  %v1011_v39 = vld [vmem:[%s4366_s14 + $0x2c0] sm:$0xff]  ;;  %v1862_v0 = vadd.f32 %v1734_v28, %v834_v57 }
 0x11e   : > { %3586 = vmatpush.xpose.msk.msra.mxu2 %vm2087_vm0, %v3827_v37  ;;  %v3829_v44 = vpop.eup %3828  ;;  %3840 = vtanh.f32 %v1840_v47  ;;  %v857_v37 = vadd.f32 %v4766_v50, %v697_v40  ;;  %v1756_v47 = vmul.f32 %v4471_v17, %v4693_v62 }
 0x11f   : > { %3578 = vmatpush.xpose.msk.msra.mxu1 %vm2087_vm0, %v3825_v16  ;;  %v3831_v61 = vpop.eup %3830  ;;  %3842 = vtanh.f32 %v1865_v49 }
 0x120   : > { %1499 = vperm.xlu2 %3760, %v1012_v30   ;;  %v3833_v54 = vpop.eup %3832  ;;  %3844 = vtanh.f32 %v1839_v34  ;;  %v673_v30 = vld [vmem:[%s4461_s16 + $0x130] sm:$0xff]  ;;  %v1023_v34 = vld [vmem:[%s4366_s14 + $0x320] sm:$0xff] }
 0x121   : > { %1419 = vperm.xlu1 %3759, %v996_v31   ;;  %1649 = vperm.xlu0 %3758, %v1042_v38   ;;  %v3835_v2 = vpop.eup %3834  ;;  %3846 = vtanh.f32 %v1864_v11  ;;  %v1040_v38 = vld [vmem:[%s4366_s14 + $0x3a8] sm:$0xff]  ;;  %v833_v18 = vadd.f32 %v4613_v8, %v673_v30  ;;  %v694_v11 = vld [vmem:[%s4461_s16 + $0x1d8] sm:$0xff] }
 0x122   : > { %v4744_v51 = vpop.permute.xlu2 %1349  ;;  %v4746_v56 = vpop.permute.xlu1 %1314  ;;  %3587 = vmatpush.xpose.msk.msra.mxu2 %vm2087_vm0, %v3831_v61  ;;  %3848 = vtanh.f32 %v1863_v27  ;;  %v856_v61 = vadd.f32 %v4766_v50, %v696_v32  ;;  %v854_v40 = vadd.f32 %v4766_v50, %v694_v11  ;;  %v1009_v32 = vld [vmem:[%s4366_s14 + $0x2b0] sm:$0xff]  ;;  %v4880_v11 = vld [vmem:[%s4360_s26 + $0x5] ss:$0 sm:$0xff] }
 0x123   : > { %v4751_v55 = vpop.permute.xlu0 %1309  ;;  %3579 = vmatpush.xpose.msk.msra.mxu1 %vm2087_vm0, %v3829_v44  ;;  %v3837_v12 = vpop.eup %3836  ;;  %v1861_v62 = vadd.f32 %v1733_v19, %v833_v18 }
 0x124   : > { %v3839_v13 = vpop.eup %3838 }
 0x125   : > { %v3841_v29 = vpop.eup %3840 }
 0x126   : > { %3588 = vmatpush.xpose.msk.msra.mxu2 %vm2087_vm0, %v3835_v2  ;;  %v3843_v59 = vpop.eup %3842  ;;  %v1884_v2 = vadd.f32 %v1756_v47, %v856_v61 }
 0x127   : > { %3580 = vmatpush.xpose.msk.msra.mxu1 %vm2087_vm0, %v3833_v54  ;;  %v3845_v44 = vpop.eup %3844  ;;  %v832_v54 = vadd.f32 %v4613_v8, %v672_v46 }
 0x128   : > { %1414 = vperm.xlu2 %3760, %v995_v20   ;;  %v3847_v9 = vpop.eup %3846  ;;  %v671_v20 = vld [vmem:[%s4461_s16 + $0x120] sm:$0xff] }
 0x129   : > { %1644 = vperm.xlu1 %3759, %v1041_v3   ;;  %1564 = vperm.xlu0 %3758, %v1025_v7   ;;  %v855_v3 = vadd.f32 %v4766_v50, %v695_v60  ;;  %v1755_v7 = vmul.f32 %v4471_v17, %v4716_v36  ;;  %v3849_v10 = vpop.eup %3848  ;;  %v1860_v24 = vadd.f32 %v1732_v63, %v832_v54  ;;  %v670_v36 = vld [vmem:[%s4461_s16 + $0x118] sm:$0xff]  ;;  %v4859_v60 = vld [vmem:[%s4360_s26 + $0x6] ss:$0 sm:$0xff] }
 0x12a   : > { %v4772_v23 = vpop.permute.xlu2 %1344  ;;  %v1365_v35 = vpop.permute.xlu1 %1364  ;;  %3589 = vmatpush.xpose.msk.msra.mxu2 %vm2087_vm0, %v3839_v13  ;;  %v1731_v13 = vmul.f32 %v4471_v17, %v4629_v26 }
 0x12b   : > { %v1370_v52 = vpop.permute.xlu0 %1369  ;;  %3581 = vmatpush.xpose.msk.msra.mxu1 %vm2087_vm0, %v3837_v12  ;;  %v1757_v31 = vmul.f32 %v4471_v17, %v1365_v35  ;;  %v831_v12 = vadd.f32 %v4613_v8, %v671_v20  ;;  %v1883_v35 = vadd.f32 %v1755_v7, %v855_v3  ;;  %v746_v20 = vld [vmem:[%s4461_s16 + $0x378] sm:$0xff]  ;;  %v4873_v3 = vld [vmem:[%s5853_s8] ss:$0 sm:$0xff] }
 0x12c   : > { %v1758_v16 = vmul.f32 %v4471_v17, %v1370_v52  ;;  %v693_v52 = vld [vmem:[%s4461_s16 + $0x1d0] sm:$0xff]  ;;  %v1727_v7 = vmul.f32 %v4873_v3, %v4506_v58 }
 0x12d   : > { %v1885_v53 = vadd.f32 %v1757_v31, %v857_v37  ;;  %v1859_v30 = vadd.f32 %v1731_v13, %v831_v12  ;;  %v669_v37 = vld [vmem:[%s4461_s16 + $0x110] sm:$0xff]  ;;  %v714_v12 = vld [vmem:[%s4461_s16 + $0x278] sm:$0xff]  ;;  %v4889_v13 = vld [vmem:[%s4360_s26 + $0x4] ss:$0 sm:$0xff] }
 0x12e   : > { %v1886_v45 = vadd.f32 %v1758_v16, %v858_v25  ;;  %3590 = vmatpush.xpose.msk.msra.mxu2 %vm2087_vm0, %v3843_v59  ;;  %v1754_v25 = vmul.f32 %v4471_v17, %v4744_v51  ;;  %v1730_v51 = vmul.f32 %v4471_v17, %v4525_v15  ;;  %v1753_v59 = vmul.f32 %v4471_v17, %v4772_v23  ;;  %v713_v58 = vld [vmem:[%s4461_s16 + $0x270] sm:$0xff] }
 0x12f   : > { %3582 = vmatpush.xpose.msk.msra.mxu1 %vm2087_vm0, %v3841_v29  ;;  %v830_v29 = vadd.f32 %v4613_v8, %v670_v36  ;;  %v829_v19 = vadd.f32 %v4613_v8, %v669_v37 }
 0x130   : > { %1639 = vperm.xlu2 %3760, %v1040_v38   ;;  %3850 = vtanh.f32 %v1886_v45  ;;  %v1882_v31 = vadd.f32 %v1754_v25, %v854_v40  ;;  %v853_v38 = vadd.f32 %v4766_v50, %v693_v52  ;;  %v745_v40 = vld [vmem:[%s4461_s16 + $0x370] sm:$0xff] }
 0x131   : > { %1559 = vperm.xlu1 %3759, %v1024_v4   ;;  %1494 = vperm.xlu0 %3758, %v1011_v39   ;;  %3852 = vtanh.f32 %v1862_v0  ;;  %v993_v4 = vld [vmem:[%s4366_s14 + $0x230] sm:$0xff]  ;;  %v1039_v39 = vld [vmem:[%s4366_s14 + $0x3a0] sm:$0xff]  ;;  %v1858_v15 = vadd.f32 %v1730_v51, %v830_v29  ;;  %v1729_v0 = vmul.f32 %v4471_v17, %v4594_v42  ;;  %v1728_v42 = vmul.f32 %v4471_v17, %v4596_v43 }
 0x132   : > { %v4799_v1 = vpop.permute.xlu2 %1594  ;;  %v4801_v33 = vpop.permute.xlu1 %1689  ;;  %3591 = vmatpush.xpose.msk.msra.mxu2 %vm2087_vm0, %v3847_v9  ;;  %3854 = vtanh.f32 %v1885_v53  ;;  %v1881_v23 = vadd.f32 %v1753_v59, %v853_v38  ;;  %v667_v53 = vld [vmem:[%s4461_s16 + $0x100] sm:$0xff]  ;;  %v905_v59 = vadd.f32 %v4859_v60, %v745_v40 }
 0x133   : > { %v4803_v49 = vpop.permute.xlu0 %1609  ;;  %3583 = vmatpush.xpose.msk.msra.mxu1 %vm2087_vm0, %v3845_v44  ;;  %3856 = vtanh.f32 %v1861_v62  ;;  %v668_v44 = vld [vmem:[%s4461_s16 + $0x108] sm:$0xff]  ;;  %v1857_v63 = vadd.f32 %v1729_v0, %v829_v19  ;;  %v827_v43 = vadd.f32 %v4613_v8, %v667_v53  ;;  %v743_v53 = vld [vmem:[%s4461_s16 + $0x360] sm:$0xff] }
 0x134   : > { %3858 = vtanh.f32 %v1884_v2  ;;  %v828_v9 = vadd.f32 %v4613_v8, %v668_v44  ;;  %v992_v2 = vld [vmem:[%s4366_s14 + $0x228] sm:$0xff]  ;;  %v1806_v8 = vmul.f32 %v4873_v3, %v4803_v49 }
 0x135   : > { %3860 = vtanh.f32 %v1860_v24  ;;  %v730_v24 = vld [vmem:[%s4461_s16 + $0x2f8] sm:$0xff]  ;;  %v1008_v19 = vld [vmem:[%s4366_s14 + $0x2a8] sm:$0xff] }
 0x136   : > { %v3851_v41 = vpop.eup %3850  ;;  %3592 = vmatpush.xpose.msk.msra.mxu2 %vm2087_vm0, %v3849_v10  ;;  %3862 = vtanh.f32 %v1883_v35  ;;  %v1022_v10 = vld [vmem:[%s4366_s14 + $0x318] sm:$0xff]  ;;  %v1855_v35 = vadd.f32 %v1727_v7, %v827_v43  ;;  %v890_v49 = vadd.f32 %v4880_v11, %v730_v24  ;;  %v692_v0 = vld [vmem:[%s4461_s16 + $0x1c8] sm:$0xff]  ;;  %v903_v43 = vadd.f32 %v4859_v60, %v743_v53  ;;  %v991_v24 = vld [vmem:[%s4366_s14 + $0x220] sm:$0xff] }
 0x137   : > { %3602 = vmatpush.xpose.msk.msra.mxu3 %vm2087_vm0, %v3851_v41  ;;  %v3853_v57 = vpop.eup %3852  ;;  %3864 = vtanh.f32 %v1859_v30  ;;  %v906_v41 = vadd.f32 %v4859_v60, %v746_v20  ;;  %v873_v30 = vadd.f32 %v4889_v13, %v713_v58  ;;  %v1803_v7 = vmul.f32 %v4873_v3, %v4799_v1  ;;  %v742_v1 = vld [vmem:[%s4461_s16 + $0x358] sm:$0xff]  ;;  %v729_v58 = vld [vmem:[%s4461_s16 + $0x2f0] sm:$0xff] }
 0x138   : > { %1554 = vperm.xlu2 %3760, %v1023_v34   ;;  %v3855_v28 = vpop.eup %3854  ;;  %3866 = vtanh.f32 %v1882_v31  ;;  %v1038_v34 = vld [vmem:[%s4366_s14 + $0x398] sm:$0xff] }
 0x139   : > { %1489 = vperm.xlu1 %3759, %v1010_v6   ;;  %1409 = vperm.xlu0 %3758, %v994_v22   ;;  %v3857_v45 = vpop.eup %3856  ;;  %3868 = vtanh.f32 %v1858_v15  ;;  %v1856_v22 = vadd.f32 %v1728_v42, %v828_v9  ;;  %v852_v42 = vadd.f32 %v4766_v50, %v692_v0  ;;  %v1931_v40 = vadd.f32 %v1803_v7, %v903_v43  ;;  %v712_v0 = vld [vmem:[%s4461_s16 + $0x268] sm:$0xff] }
 0x13a   : > { %v4828_v27 = vpop.permute.xlu2 %1444  ;;  %v4830_v26 = vpop.permute.xlu1 %1684  ;;  %3593 = vmatpush.xpose.msk.msra.mxu2 %vm2087_vm0, %v3853_v57  ;;  %3870 = vtanh.f32 %v1881_v23  ;;  %v874_v57 = vadd.f32 %v4889_v13, %v714_v12 }
 0x13b   : > { %v4832_v16 = vpop.permute.xlu0 %1604  ;;  %3603 = vmatpush.xpose.msk.msra.mxu3 %vm2087_vm0, %v3855_v28  ;;  %v3859_v18 = vpop.eup %3858  ;;  %3872 = vtanh.f32 %v1857_v63  ;;  %v1934_v28 = vadd.f32 %v1806_v8, %v906_v41  ;;  %v1773_v37 = vmul.f32 %v4873_v3, %v4828_v27  ;;  %v1021_v27 = vld [vmem:[%s4366_s14 + $0x310] sm:$0xff]  ;;  %v1020_v41 = vld [vmem:[%s4366_s14 + $0x308] sm:$0xff]  ;;  %v1007_v8 = vld [vmem:[%s4366_s14 + $0x2a0] sm:$0xff] }
 0x13c   : > { %v3861_v46 = vpop.eup %3860  ;;  %3874 = vtanh.f32 %v1856_v22 }
 0x13d   : > { %v3863_v47 = vpop.eup %3862  ;;  %3876 = vtanh.f32 %v1855_v35  ;;  %v1901_v44 = vadd.f32 %v1773_v37, %v873_v30  ;;  %v2079_v35 = vld [vmem:[%s5854_s9] sm:$0x1] }
 0x13e   : > { %3594 = vmatpush.xpose.msk.msra.mxu2 %vm2087_vm0, %v3857_v45  ;;  %v3865_v17 = vpop.eup %3864  ;;  %v1037_v45 = vld [vmem:[%s4366_s14 + $0x390] sm:$0xff]  ;;  %3878 = vtanh.f32 %v1934_v28  ;;  %v902_v28 = vadd.f32 %v4859_v60, %v742_v1  ;;  %3567 = vmatmul.msk.f32.vlgmr.msra.gmra.mxu0 %vm2087_vm0, %v2079_v35 }
 0x13f   : > { %3604 = vmatpush.xpose.msk.msra.mxu3 %vm2087_vm0, %v3859_v18  ;;  %v3867_v6 = vpop.eup %3866 }
 0x140   : > { %1484 = vperm.xlu2 %3760, %v1009_v32   ;;  %v3869_v36 = vpop.eup %3868  ;;  %v1805_v32 = vmul.f32 %v4873_v3, %v4832_v16 }
 0x141   : > { %1404 = vperm.xlu1 %3759, %v993_v4   ;;  %1634 = vperm.xlu0 %3758, %v1039_v39   ;;  %v3871_v52 = vpop.eup %3870  ;;  %v744_v39 = vld [vmem:[%s4461_s16 + $0x368] sm:$0xff] }
 0x142   : > { %v4852_v61 = vpop.permute.xlu2 %1669  ;;  %v4861_v62 = vpop.permute.xlu1 %1679  ;;  %3595 = vmatpush.xpose.msk.msra.mxu2 %vm2087_vm0, %v3861_v46  ;;  %v1933_v46 = vadd.f32 %v1805_v32, %v905_v59  ;;  %v904_v16 = vadd.f32 %v4859_v60, %v744_v39 }
 0x143   : > { %v4863_v54 = vpop.permute.xlu0 %1599  ;;  %3605 = vmatpush.xpose.msk.msra.mxu3 %vm2087_vm0, %v3863_v47  ;;  %v3873_v4 = vpop.eup %3872 }
 0x144   : > { %v3875_v23 = vpop.eup %3874  ;;  %v1804_v47 = vmul.f32 %v4873_v3, %v4863_v54 }
 0x146   : > { %3596 = vmatpush.xpose.msk.msra.mxu2 %vm2087_vm0, %v3865_v17 }
 0x147   : > { %3606 = vmatpush.xpose.msk.msra.mxu3 %vm2087_vm0, %v3867_v6 }
 0x148   : > { %1399 = vperm.xlu2 %3760, %v992_v2   ;;  %v3877_v2 = vpop.eup %3876 }
 0x149   : > { %1629 = vperm.xlu1 %3759, %v1038_v34   ;;  %1549 = vperm.xlu0 %3758, %v1022_v10   ;;  %v3879_v17 = vpop.eup %3878  ;;  %v1932_v34 = vadd.f32 %v1804_v47, %v904_v16  ;;  %v2080_v10 = vld [vmem:[%s5854_s9 + $0x1] sm:$0x1]  ;;  %v872_v16 = vadd.f32 %v4889_v13, %v712_v0 }
 0x14a   : > { %v4894_v25 = vpop.permute.xlu2 %1519  ;;  %v1530_v29 = vpop.permute.xlu1 %1529  ;;  %3597 = vmatpush.xpose.msk.msra.mxu2 %vm2087_vm0, %v3869_v36  ;;  %3584 = vmatmul.msk.f32.vlgmr.msra.gmra.mxu1 %vm2087_vm0, %v2080_v10  ;;  %v2081_v36 = vld [vmem:[%s5854_s9 + $0x2] sm:$0x1] }
 0x14b   : > { %v1450_v51 = vpop.permute.xlu0 %1449  ;;  %v1790_v31 = vmul.f32 %v4873_v3, %v1530_v29  ;;  %3607 = vmatpush.xpose.msk.msra.mxu3 %vm2087_vm0, %v3871_v52  ;;  %v889_v29 = vadd.f32 %v4880_v11, %v729_v58  ;;  %v1788_v32 = vmul.f32 %v4873_v3, %v4894_v25  ;;  %v690_v25 = vld [vmem:[%s4461_s16 + $0x1b8] sm:$0xff] }
 0x14c   : > { %v1774_v38 = vmul.f32 %v4873_v3, %v1450_v51 }
 0x14d   : > { %v1918_v18 = vadd.f32 %v1790_v31, %v890_v49 }
 0x14e   : > { %v1902_v15 = vadd.f32 %v1774_v38, %v874_v57  ;;  %3598 = vmatpush.xpose.msk.msra.mxu2 %vm2087_vm0, %v3873_v4  ;;  %v728_v57 = vld [vmem:[%s4461_s16 + $0x2e8] sm:$0xff] }
 0x14f   : > { %3880 = vtanh.f32 %v1918_v18  ;;  %v888_v59 = vadd.f32 %v4880_v11, %v728_v57  ;;  %v1006_v18 = vld [vmem:[%s4366_s14 + $0x298] sm:$0xff] }
 0x150   : > { %1624 = vperm.xlu2 %3760, %v1037_v45   ;;  %3882 = vtanh.f32 %v1902_v15  ;;  %v990_v15 = vld [vmem:[%s4366_s14 + $0x218] sm:$0xff] }
 0x151   : > { %1544 = vperm.xlu1 %3759, %v1021_v27   ;;  %1479 = vperm.xlu0 %3758, %v1008_v19   ;;  %3884 = vtanh.f32 %v1901_v44  ;;  %v1036_v19 = vld [vmem:[%s4366_s14 + $0x388] sm:$0xff]  ;;  %v691_v44 = vld [vmem:[%s4461_s16 + $0x1c0] sm:$0xff] }
 0x152   : > { %v4918_v9 = vpop.permute.xlu2 %1329  ;;  %v1340_v63 = vpop.permute.xlu1 %1339  ;;  %3599 = vmatpush.xpose.msk.msra.mxu2 %vm2087_vm0, %v3875_v23  ;;  %3886 = vtanh.f32 %v1933_v46  ;;  %v1916_v23 = vadd.f32 %v1788_v32, %v888_v59  ;;  %v851_v47 = vadd.f32 %v4766_v50, %v691_v44  ;;  %v727_v59 = vld [vmem:[%s4461_s16 + $0x2e0] sm:$0xff] }
 0x153   : > { %v4921_v20 = vpop.permute.xlu0 %1674  ;;  %v1752_v54 = vmul.f32 %v4873_v3, %v1340_v63  ;;  %v1750_v43 = vmul.f32 %v4873_v3, %v4918_v9  ;;  %v740_v9 = vld [vmem:[%s4461_s16 + $0x348] sm:$0xff]  ;;  %v711_v32 = vld [vmem:[%s4461_s16 + $0x260] sm:$0xff] }
 0x154   : > { %v900_v57 = vadd.f32 %v4859_v60, %v740_v9 }
 0x155   : > { %v3881_v6 = vpop.eup %3880  ;;  %v1880_v22 = vadd.f32 %v1752_v54, %v852_v42 }
 0x156   : > { %v3883_v12 = vpop.eup %3882  ;;  %3600 = vmatpush.xpose.msk.msra.mxu2 %vm2087_vm0, %v3877_v2  ;;  %3636 = vmatpush.xpose.msk.msrb.mxu1 %vm2087_vm0, %v3881_v6  ;;  %v989_v6 = vld [vmem:[%s4366_s14 + $0x210] sm:$0xff] }
 0x157   : > { %3888 = vtanh.f32 %v1880_v22  ;;  %3619 = vmatpush.xpose.msk.msrb.mxu0 %vm2087_vm0, %v3883_v12  ;;  %v3885_v49 = vpop.eup %3884  ;;  %v1035_v22 = vld [vmem:[%s4366_s14 + $0x380] sm:$0xff] }
 0x158   : > { %3890 = vtanh.f32 %v1932_v34  ;;  %1539 = vperm.xlu2 %3760, %v1020_v41   ;;  %v3887_v51 = vpop.eup %3886 }
 0x159   : > { %1474 = vperm.xlu1 %3759, %v1007_v8   ;;  %1394 = vperm.xlu0 %3758, %v991_v24   ;;  %3892 = vtanh.f32 %v1931_v40  ;;  %v1019_v8 = vld [vmem:[%s4366_s14 + $0x300] sm:$0xff]  ;;  %v741_v24 = vld [vmem:[%s4461_s16 + $0x350] sm:$0xff] }
 0x15a   : > { %3653 = vmatpush.xpose.msk.msrb.mxu2 %vm2087_vm0, %v3879_v17  ;;  %v4948_v52 = vpop.permute.xlu2 %1579  ;;  %v1590_v30 = vpop.permute.xlu1 %1589  ;;  %v850_v17 = vadd.f32 %v4766_v50, %v690_v25  ;;  %v901_v58 = vadd.f32 %v4859_v60, %v741_v24 }
 0x15b   : > { %3601 = vmatmul.msk.f32.vlgmr.msra.gmra.mxu2 %vm2087_vm0, %v2081_v36  ;;  %v1525_v37 = vpop.permute.xlu0 %1524  ;;  %v1802_v31 = vmul.f32 %v4873_v3, %v1590_v30  ;;  %3620 = vmatpush.xpose.msk.msrb.mxu0 %vm2087_vm0, %v3885_v49  ;;  %v1004_v30 = vld [vmem:[%s4366_s14 + $0x288] sm:$0xff] }
 0x15c   : > { %v1789_v38 = vmul.f32 %v4873_v3, %v1525_v37  ;;  %v1878_v12 = vadd.f32 %v1750_v43, %v850_v17  ;;  %v988_v37 = vld [vmem:[%s4366_s14 + $0x208] sm:$0xff] }
 0x15d   : > { %v3889_v45 = vpop.eup %3888  ;;  %v1930_v4 = vadd.f32 %v1802_v31, %v902_v28  ;;  %v1800_v28 = vmul.f32 %v4873_v3, %v4948_v52 }
 0x15e   : > { %3654 = vmatpush.xpose.msk.msrb.mxu2 %vm2087_vm0, %v3887_v51  ;;  %v1917_v39 = vadd.f32 %v1789_v38, %v889_v29  ;;  %v3891_v27 = vpop.eup %3890  ;;  %3608 = vmatpush.xpose.msk.msra.mxu3 %vm2087_vm0, %v3889_v45  ;;  %v1005_v38 = vld [vmem:[%s4366_s14 + $0x290] sm:$0xff] }
 0x15f   : > { %3894 = vtanh.f32 %v1930_v4  ;;  %v3893_v53 = vpop.eup %3892  ;;  %v1928_v45 = vadd.f32 %v1800_v28, %v900_v57  ;;  %v710_v4 = vld [vmem:[%s4461_s16 + $0x258] sm:$0xff] }
 0x160   : > { %3896 = vtanh.f32 %v1917_v39  ;;  %1469 = vperm.xlu2 %3760, %v1006_v18   ;;  %v887_v39 = vadd.f32 %v4880_v11, %v727_v59  ;;  %v871_v18 = vadd.f32 %v4889_v13, %v711_v32  ;;  %v686_v57 = vld [vmem:[%s4461_s16 + $0x198] sm:$0xff] }
 0x161   : > { %1389 = vperm.xlu1 %3759, %v990_v15   ;;  %1619 = vperm.xlu0 %3758, %v1036_v19   ;;  %3898 = vtanh.f32 %v1916_v23  ;;  %v870_v23 = vadd.f32 %v4889_v13, %v710_v4  ;;  %v738_v28 = vld [vmem:[%s4461_s16 + $0x338] sm:$0xff] }
 0x162   : > { %3655 = vmatpush.xpose.msk.msrb.mxu2 %vm2087_vm0, %v3891_v27  ;;  %v4969_v46 = vpop.permute.xlu2 %1429  ;;  %v1440_v42 = vpop.permute.xlu1 %1439  ;;  %v898_v4 = vadd.f32 %v4859_v60, %v738_v28  ;;  %v708_v28 = vld [vmem:[%s4461_s16 + $0x248] sm:$0xff] }
 0x163   : > { %v1335_v63 = vpop.permute.xlu0 %1334  ;;  %v1772_v2 = vmul.f32 %v4873_v3, %v1440_v42  ;;  %v1770_v25 = vmul.f32 %v4873_v3, %v4969_v46 }
 0x164   : > { %v1751_v54 = vmul.f32 %v4873_v3, %v1335_v63  ;;  %v987_v63 = vld [vmem:[%s4366_s14 + $0x200] sm:$0xff] }
 0x165   : > { %v3895_v7 = vpop.eup %3894  ;;  %v1900_v34 = vadd.f32 %v1772_v2, %v872_v16  ;;  %v689_v2 = vld [vmem:[%s4461_s16 + $0x1b0] sm:$0xff]  ;;  %v1898_v17 = vadd.f32 %v1770_v25, %v870_v23  ;;  %v684_v23 = vld [vmem:[%s4461_s16 + $0x188] sm:$0xff] }
 0x166   : > { %3656 = vmatpush.xpose.msk.msrb.mxu2 %vm2087_vm0, %v3893_v53  ;;  %v1879_v10 = vadd.f32 %v1751_v54, %v851_v47  ;;  %v3897_v41 = vpop.eup %3896  ;;  %v1003_v53 = vld [vmem:[%s4366_s14 + $0x280] sm:$0xff]  ;;  %v688_v54 = vld [vmem:[%s4461_s16 + $0x1a8] sm:$0xff] }
 0x167   : > { %3900 = vtanh.f32 %v1900_v34  ;;  %3637 = vmatpush.xpose.msk.msrb.mxu1 %vm2087_vm0, %v3897_v41  ;;  %v3899_v36 = vpop.eup %3898  ;;  %v848_v34 = vadd.f32 %v4766_v50, %v688_v54  ;;  %v687_v41 = vld [vmem:[%s4461_s16 + $0x1a0] sm:$0xff] }
 0x168   : > { %3902 = vtanh.f32 %v1879_v10  ;;  %1384 = vperm.xlu2 %3760, %v989_v6   ;;  %v1748_v10 = vmul.f32 %v4873_v3, %v4670_v14  ;;  %v1747_v14 = vmul.f32 %v4873_v3, %v4746_v56  ;;  %v846_v56 = vadd.f32 %v4766_v50, %v686_v57 }
 0x169   : > { %1614 = vperm.xlu1 %3759, %v1035_v22   ;;  %1534 = vperm.xlu0 %3758, %v1019_v8   ;;  %3904 = vtanh.f32 %v1878_v12 }
 0x16a   : > { %3657 = vmatpush.xpose.msk.msrb.mxu2 %vm2087_vm0, %v3895_v7  ;;  %v4986_v1 = vpop.permute.xlu2 %1654  ;;  %v4989_v35 = vpop.permute.xlu1 %1664  ;;  %v849_v7 = vadd.f32 %v4766_v50, %v689_v2 }
 0x16b   : > { %v1585_v40 = vpop.permute.xlu0 %1584  ;;  %3638 = vmatpush.xpose.msk.msrb.mxu1 %vm2087_vm0, %v3899_v36  ;;  %v847_v36 = vadd.f32 %v4766_v50, %v687_v41 }
 0x16c   : > { %v1801_v49 = vmul.f32 %v4873_v3, %v1585_v40  ;;  %v739_v40 = vld [vmem:[%s4461_s16 + $0x340] sm:$0xff] }
 0x16d   : > { %v3901_v29 = vpop.eup %3900 }
 0x16e   : > { %v1929_v51 = vadd.f32 %v1801_v49, %v901_v58  ;;  %v3903_v31 = vpop.eup %3902  ;;  %3621 = vmatpush.xpose.msk.msrb.mxu0 %vm2087_vm0, %v3901_v29  ;;  %v1876_v58 = vadd.f32 %v1748_v10, %v848_v34  ;;  %v726_v49 = vld [vmem:[%s4461_s16 + $0x2d8] sm:$0xff] }
 0x16f   : > { %3609 = vmatpush.xpose.msk.msra.mxu3 %vm2087_vm0, %v3903_v31  ;;  %v3905_v15 = vpop.eup %3904  ;;  %v1875_v31 = vadd.f32 %v1747_v14, %v847_v36 }
 0x170   : > { %3906 = vtanh.f32 %v1929_v51  ;;  %1459 = vperm.xlu2 %3760, %v1004_v30   ;;  %v899_v51 = vadd.f32 %v4859_v60, %v739_v40  ;;  %v886_v30 = vadd.f32 %v4880_v11, %v726_v49 }
 0x171   : > { %1379 = vperm.xlu1 %3759, %v988_v37   ;;  %1464 = vperm.xlu0 %3758, %v1005_v38   ;;  %3908 = vtanh.f32 %v1928_v45  ;;  %v1746_v38 = vmul.f32 %v4873_v3, %v4751_v55  ;;  %v685_v45 = vld [vmem:[%s4461_s16 + $0x190] sm:$0xff] }
 0x172   : > { %v1570_v52 = vpop.permute.xlu2 %1569  ;;  %v1515_v27 = vpop.permute.xlu1 %1514  ;;  %v845_v55 = vadd.f32 %v4766_v50, %v685_v45 }
 0x173   : > { %v1435_v19 = vpop.permute.xlu0 %1434  ;;  %v1787_v0 = vmul.f32 %v4873_v3, %v1515_v27  ;;  %3610 = vmatpush.xpose.msk.msra.mxu3 %vm2087_vm0, %v3905_v15  ;;  %v1874_v25 = vadd.f32 %v1746_v38, %v846_v56  ;;  %v707_v56 = vld [vmem:[%s4461_s16 + $0x240] sm:$0xff]  ;;  %v761_v38 = vld [vmem:[%s4461_s16 + $0x3f0] sm:$0xff] }
 0x174   : > { %v1771_v44 = vmul.f32 %v4873_v3, %v1435_v19 }
 0x175   : > { %v1915_v16 = vadd.f32 %v1787_v0, %v887_v39  ;;  %v1798_v39 = vmul.f32 %v4873_v3, %v1570_v52  ;;  %v725_v52 = vld [vmem:[%s4461_s16 + $0x2d0] sm:$0xff] }
 0x176   : > { %v1899_v47 = vadd.f32 %v1771_v44, %v871_v18  ;;  %v3907_v42 = vpop.eup %3906  ;;  %v1745_v44 = vmul.f32 %v4873_v3, %v4648_v48  ;;  %v885_v48 = vadd.f32 %v4880_v11, %v725_v52 }
 0x177   : > { %3910 = vtanh.f32 %v1915_v16  ;;  %3658 = vmatpush.xpose.msk.msrb.mxu2 %vm2087_vm0, %v3907_v42  ;;  %v3909_v46 = vpop.eup %3908  ;;  %v709_v16 = vld [vmem:[%s4461_s16 + $0x250] sm:$0xff] }
 0x178   : > { %3912 = vtanh.f32 %v1899_v47  ;;  %v1926_v47 = vadd.f32 %v1798_v39, %v898_v4  ;;  %v869_v54 = vadd.f32 %v4889_v13, %v709_v16  ;;  %v1820_v16 = vmul.f32 %v4873_v3, %v4861_v62 }
 0x179   : > { %1454 = vperm.xlu1 %3759, %v1003_v53   ;;  %1374 = vperm.xlu0 %3758, %v987_v63   ;;  %3914 = vtanh.f32 %v1898_v17  ;;  %v724_v53 = vld [vmem:[%s4461_s16 + $0x2c8] sm:$0xff]  ;;  %v844_v63 = vadd.f32 %v4766_v50, %v684_v23  ;;  %v1873_v17 = vadd.f32 %v1745_v44, %v845_v55 }
 0x17a   : > { %v5017_v43 = vpop.permute.xlu2 %1499 }
 0x17b   : > { %v1325_v6 = vpop.permute.xlu1 %1324  ;;  %v5023_v22 = vpop.permute.xlu0 %1659  ;;  %3659 = vmatpush.xpose.msk.msrb.mxu2 %vm2087_vm0, %v3909_v46  ;;  %v884_v46 = vadd.f32 %v4880_v11, %v724_v53  ;;  %v1784_v41 = vmul.f32 %v4873_v3, %v5017_v43  ;;  %v1743_v43 = vmul.f32 %v4873_v3, %v4723_v5  ;;  %v868_v5 = vadd.f32 %v4889_v13, %v708_v28 }
 0x17c   : > { %v1749_v8 = vmul.f32 %v4873_v3, %v1325_v6  ;;  %v683_v6 = vld [vmem:[%s4461_s16 + $0x180] sm:$0xff] }
 0x17d   : > { %v3911_v24 = vpop.eup %3910  ;;  %v843_v57 = vadd.f32 %v4766_v50, %v683_v6  ;;  %v1819_v6 = vmul.f32 %v4873_v3, %v4921_v20  ;;  %v723_v20 = vld [vmem:[%s4461_s16 + $0x2c0] sm:$0xff] }
 0x17e   : > { %v1877_v12 = vadd.f32 %v1749_v8, %v849_v7  ;;  %v3913_v9 = vpop.eup %3912  ;;  %3639 = vmatpush.xpose.msk.msrb.mxu1 %vm2087_vm0, %v3911_v24  ;;  %v1744_v7 = vmul.f32 %v4873_v3, %v4718_v21  ;;  %v883_v28 = vadd.f32 %v4880_v11, %v723_v20  ;;  %v704_v20 = vld [vmem:[%s4461_s16 + $0x228] sm:$0xff] }
 0x17f   : > { %3622 = vmatpush.xpose.msk.msrb.mxu0 %vm2087_vm0, %v3913_v9  ;;  %v3915_v37 = vpop.eup %3914  ;;  %v5073_v9 = vld [vmem:[%s4360_s26 + $0x7] ss:$0 sm:$0xff] }
 0x180   : > { %3916 = vtanh.f32 %v1877_v12  ;;  %v1872_v49 = vadd.f32 %v1744_v7, %v844_v63  ;;  %v759_v63 = vld [vmem:[%s4461_s16 + $0x3e0] sm:$0xff]  ;;  %v758_v7 = vld [vmem:[%s4461_s16 + $0x3d8] sm:$0xff] }
 0x181   : > { %3918 = vtanh.f32 %v1876_v58  ;;  %v762_v58 = vld [vmem:[%s4461_s16 + $0x3f8] sm:$0xff] }
 0x182   : > { %v5037_v29 = vpop.permute.xlu2 %1414  ;;  %3920 = vtanh.f32 %v1875_v31  ;;  %v1822_v31 = vmul.f32 %v4873_v3, %v4801_v33  ;;  %v867_v33 = vadd.f32 %v4889_v13, %v707_v56  ;;  %v756_v56 = vld [vmem:[%s4461_s16 + $0x3c8] sm:$0xff] }
 0x183   : > { %v1575_v59 = vpop.permute.xlu1 %1574  ;;  %v1510_v32 = vpop.permute.xlu0 %1509  ;;  %3623 = vmatpush.xpose.msk.msrb.mxu0 %vm2087_vm0, %v3915_v37  ;;  %v922_v37 = vadd.f32 %v5073_v9, %v762_v58  ;;  %v1767_v4 = vmul.f32 %v4873_v3, %v5037_v29  ;;  %v737_v29 = vld [vmem:[%s4461_s16 + $0x330] sm:$0xff] }
 0x184   : > { %v1799_v18 = vmul.f32 %v4873_v3, %v1575_v59  ;;  %v1786_v15 = vmul.f32 %v4873_v3, %v1510_v32  ;;  %v1871_v59 = vadd.f32 %v1743_v43, %v843_v57 }
 0x186   : > { %v3917_v27 = vpop.eup %3916  ;;  %v1927_v19 = vadd.f32 %v1799_v18, %v899_v51  ;;  %v1914_v0 = vadd.f32 %v1786_v15, %v886_v30  ;;  %v1912_v51 = vadd.f32 %v1784_v41, %v884_v46  ;;  %v1950_v15 = vadd.f32 %v1822_v31, %v922_v37 }
 0x187   : > { %3611 = vmatpush.xpose.msk.msra.mxu3 %vm2087_vm0, %v3917_v27  ;;  %v3919_v42 = vpop.eup %3918  ;;  %v921_v27 = vadd.f32 %v5073_v9, %v761_v38 }
 0x188   : > { %3922 = vtanh.f32 %v1927_v19  ;;  %v3921_v12 = vpop.eup %3920  ;;  %v1821_v19 = vmul.f32 %v4873_v3, %v4830_v26 }
 0x189   : > { %3924 = vtanh.f32 %v1914_v0  ;;  %v760_v0 = vld [vmem:[%s4461_s16 + $0x3e8] sm:$0xff] }
 0x18a   : > { %v5059_v2 = vpop.permute.xlu2 %1639  ;;  %3926 = vtanh.f32 %v1874_v25  ;;  %v920_v52 = vadd.f32 %v5073_v9, %v760_v0  ;;  %v1949_v53 = vadd.f32 %v1821_v19, %v921_v27  ;;  %v916_v27 = vadd.f32 %v5073_v9, %v756_v56  ;;  %v722_v0 = vld [vmem:[%s4461_s16 + $0x2b8] sm:$0xff] }
 0x18b   : > { %v1505_v34 = vpop.permute.xlu1 %1504  ;;  %v1425_v10 = vpop.permute.xlu0 %1424  ;;  %3612 = vmatpush.xpose.msk.msra.mxu3 %vm2087_vm0, %v3919_v42  ;;  %3928 = vtanh.f32 %v1926_v47  ;;  %v1895_v47 = vadd.f32 %v1767_v4, %v867_v33  ;;  %v1817_v33 = vmul.f32 %v4873_v3, %v4989_v35  ;;  %v1816_v19 = vmul.f32 %v4873_v3, %v5023_v22 }
 0x18c   : > { %v1785_v8 = vmul.f32 %v4873_v3, %v1505_v34  ;;  %v1769_v24 = vmul.f32 %v4873_v3, %v1425_v10  ;;  %3930 = vtanh.f32 %v1873_v17  ;;  %v1948_v62 = vadd.f32 %v1820_v16, %v920_v52 }
 0x18d   : > { %v919_v10 = vadd.f32 %v5073_v9, %v759_v63  ;;  %v882_v52 = vadd.f32 %v4880_v11, %v722_v0  ;;  %v1944_v22 = vadd.f32 %v1816_v19, %v916_v27  ;;  %v864_v56 = vadd.f32 %v4889_v13, %v704_v20  ;;  %v719_v20 = vld [vmem:[%s4461_s16 + $0x2a0] sm:$0xff] }
 0x18e   : > { %v3923_v21 = vpop.eup %3922  ;;  %v1913_v36 = vadd.f32 %v1785_v8, %v885_v48  ;;  %v1897_v14 = vadd.f32 %v1769_v24, %v869_v54  ;;  %v897_v48 = vadd.f32 %v4859_v60, %v737_v29  ;;  %v755_v29 = vld [vmem:[%s4461_s16 + $0x3c0] sm:$0xff] }
 0x18f   : > { %v3925_v40 = vpop.eup %3924  ;;  %3613 = vmatpush.xpose.msk.msra.mxu3 %vm2087_vm0, %v3921_v12  ;;  %3660 = vmatpush.xpose.msk.msrb.mxu2 %vm2087_vm0, %v3923_v21  ;;  %v918_v12 = vadd.f32 %v5073_v9, %v758_v7  ;;  %v1818_v21 = vmul.f32 %v4873_v3, %v4852_v61  ;;  %v757_v61 = vld [vmem:[%s4461_s16 + $0x3d0] sm:$0xff] }
 0x190   : > { %3932 = vtanh.f32 %v1913_v36  ;;  %3640 = vmatpush.xpose.msk.msrb.mxu1 %vm2087_vm0, %v3925_v40  ;;  %v3927_v30 = vpop.eup %3926  ;;  %v2082_v36 = vld [vmem:[%s5854_s9 + $0x3] sm:$0x1]  ;;  %v1947_v40 = vadd.f32 %v1819_v6, %v919_v10 }
 0x191   : > { %3934 = vtanh.f32 %v1897_v14  ;;  %v3929_v50 = vpop.eup %3928  ;;  %v736_v14 = vld [vmem:[%s4461_s16 + $0x328] sm:$0xff] }
 0x192   : > { %3936 = vtanh.f32 %v1872_v49  ;;  %v3931_v18 = vpop.eup %3930  ;;  %v1555_v55 = vpop.permute.xlu2 %1554  ;;  %v735_v49 = vld [vmem:[%s4461_s16 + $0x320] sm:$0xff]  ;;  %v896_v43 = vadd.f32 %v4859_v60, %v736_v14 }
 0x193   : > { %v1420_v32 = vpop.permute.xlu1 %1419  ;;  %v5089_v45 = vpop.permute.xlu0 %1649  ;;  %3614 = vmatpush.xpose.msk.msra.mxu3 %vm2087_vm0, %v3927_v30  ;;  %3661 = vmatpush.xpose.msk.msrb.mxu2 %vm2087_vm0, %v3929_v50  ;;  %3938 = vtanh.f32 %v1912_v51  ;;  %v1946_v30 = vadd.f32 %v1818_v21, %v918_v12  ;;  %v895_v50 = vadd.f32 %v4859_v60, %v735_v49  ;;  %v1795_v38 = vmul.f32 %v4873_v3, %v1555_v55  ;;  %v706_v55 = vld [vmem:[%s4461_s16 + $0x238] sm:$0xff] }
 0x194   : > { %v1768_v39 = vmul.f32 %v4873_v3, %v1420_v32  ;;  %3940 = vtanh.f32 %v1871_v59  ;;  %v917_v32 = vadd.f32 %v5073_v9, %v757_v61  ;;  %v866_v16 = vadd.f32 %v4889_v13, %v706_v55 }
 0x195   : > { %v1814_v21 = vmul.f32 %v4873_v3, %v5089_v45 }
 0x196   : > { %v3933_v44 = vpop.eup %3932  ;;  %v1896_v23 = vadd.f32 %v1768_v39, %v868_v5  ;;  %v1945_v35 = vadd.f32 %v1817_v33, %v917_v32  ;;  %v1812_v32 = vmul.f32 %v4873_v3, %v5059_v2 }
 0x197   : > { %v3935_v25 = vpop.eup %3934  ;;  %3615 = vmatpush.xpose.msk.msra.mxu3 %vm2087_vm0, %v3931_v18  ;;  %3641 = vmatpush.xpose.msk.msrb.mxu1 %vm2087_vm0, %v3933_v44  ;;  %v1923_v44 = vadd.f32 %v1795_v38, %v895_v50 }
 0x198   : > { %3942 = vtanh.f32 %v1896_v23  ;;  %3624 = vmatpush.xpose.msk.msrb.mxu0 %vm2087_vm0, %v3935_v25  ;;  %v3937_v26 = vpop.eup %3936  ;;  %v721_v23 = vld [vmem:[%s4461_s16 + $0x2b0] sm:$0xff] }
 0x199   : > { %3944 = vtanh.f32 %v1950_v15  ;;  %v3939_v42 = vpop.eup %3938 }
 0x19a   : > { %3946 = vtanh.f32 %v1895_v47  ;;  %v3941_v34 = vpop.eup %3940  ;;  %v1485_v58 = vpop.permute.xlu2 %1484 }
 0x19b   : > { %v5110_v54 = vpop.permute.xlu1 %1644  ;;  %v1565_v17 = vpop.permute.xlu0 %1564  ;;  %3616 = vmatpush.xpose.msk.msra.mxu3 %vm2087_vm0, %v3937_v26  ;;  %3642 = vmatpush.xpose.msk.msrb.mxu1 %vm2087_vm0, %v3939_v42  ;;  %3948 = vtanh.f32 %v1949_v53  ;;  %v881_v26 = vadd.f32 %v4880_v11, %v721_v23  ;;  %v1781_v63 = vmul.f32 %v4873_v3, %v1485_v58 }
 0x19c   : > { %v1797_v46 = vmul.f32 %v4873_v3, %v1565_v17  ;;  %3950 = vtanh.f32 %v1948_v62  ;;  %v915_v62 = vadd.f32 %v5073_v9, %v755_v29 }
 0x19d   : > { %v1909_v58 = vadd.f32 %v1781_v63, %v881_v26 }
 0x19e   : > { %v3943_v41 = vpop.eup %3942  ;;  %v1925_v8 = vadd.f32 %v1797_v46, %v897_v48  ;;  %v1815_v46 = vmul.f32 %v4873_v3, %v4986_v1 }
 0x19f   : > { %v3945_v24 = vpop.eup %3944  ;;  %3617 = vmatpush.xpose.msk.msra.mxu3 %vm2087_vm0, %v3941_v34  ;;  %3625 = vmatpush.xpose.msk.msrb.mxu0 %vm2087_vm0, %v3943_v41  ;;  %v754_v34 = vld [vmem:[%s4461_s16 + $0x3b8] sm:$0xff] }
 0x1a0   : > { %3952 = vtanh.f32 %v1925_v8  ;;  %v3947_v57 = vpop.eup %3946  ;;  %v914_v12 = vadd.f32 %v5073_v9, %v754_v34  ;;  %v1943_v1 = vadd.f32 %v1815_v46, %v915_v62 }
 0x1a1   : > { %v3949_v51 = vpop.eup %3948  ;;  %3954 = vtanh.f32 %v1947_v40 }
 0x1a2   : > { %3618 = vmatmul.msk.f32.vlgmr.msra.gmra.mxu3 %vm2087_vm0, %v2082_v36  ;;  %v3951_v4 = vpop.eup %3950  ;;  %3956 = vtanh.f32 %v1946_v30  ;;  %v1400_v25 = vpop.permute.xlu2 %1399  ;;  %v753_v36 = vld [vmem:[%s4461_s16 + $0x3b0] sm:$0xff] }
 0x1a3   : > { %3670 = vmatpush.xpose.msk.msrb.mxu3 %vm2087_vm0, %v3945_v24  ;;  %v1560_v37 = vpop.permute.xlu1 %1559  ;;  %v1495_v31 = vpop.permute.xlu0 %1494  ;;  %3626 = vmatpush.xpose.msk.msrb.mxu0 %vm2087_vm0, %v3947_v57  ;;  %v705_v24 = vld [vmem:[%s4461_s16 + $0x230] sm:$0xff]  ;;  %v913_v57 = vadd.f32 %v5073_v9, %v753_v36  ;;  %v1764_v50 = vmul.f32 %v4873_v3, %v1400_v25 }
 0x1a4   : > { %v1796_v5 = vmul.f32 %v4873_v3, %v1560_v37  ;;  %v1783_v59 = vmul.f32 %v4873_v3, %v1495_v31  ;;  %v865_v40 = vadd.f32 %v4889_v13, %v705_v24  ;;  %v752_v31 = vld [vmem:[%s4461_s16 + $0x3a8] sm:$0xff]  ;;  %v734_v13 = vld [vmem:[%s4461_s16 + $0x318] sm:$0xff] }
 0x1a5   : > { %v894_v19 = vadd.f32 %v4859_v60, %v734_v13 }
 0x1a6   : > { %v1924_v39 = vadd.f32 %v1796_v5, %v896_v43  ;;  %v1911_v18 = vadd.f32 %v1783_v59, %v883_v28  ;;  %v3953_v15 = vpop.eup %3952  ;;  %v1942_v43 = vadd.f32 %v1814_v21, %v914_v12  ;;  %v1813_v28 = vmul.f32 %v4873_v3, %v5110_v54 }
 0x1a7   : > { %3671 = vmatpush.xpose.msk.msrb.mxu3 %vm2087_vm0, %v3949_v51  ;;  %3662 = vmatpush.xpose.msk.msrb.mxu2 %vm2087_vm0, %v3953_v15  ;;  %v3955_v47 = vpop.eup %3954  ;;  %v912_v54 = vadd.f32 %v5073_v9, %v752_v31 }
 0x1a8   : > { %3958 = vtanh.f32 %v1924_v39  ;;  %v3957_v7 = vpop.eup %3956  ;;  %v1941_v33 = vadd.f32 %v1813_v28, %v913_v57  ;;  %v703_v57 = vld [vmem:[%s4461_s16 + $0x220] sm:$0xff] }
 0x1a9   : > { %3960 = vtanh.f32 %v1911_v18  ;;  %v751_v18 = vld [vmem:[%s4461_s16 + $0x3a0] sm:$0xff]  ;;  %v1940_v2 = vadd.f32 %v1812_v32, %v912_v54 }
 0x1aa   : > { %3962 = vtanh.f32 %v1923_v44  ;;  %v5176_v61 = vpop.permute.xlu2 %1624  ;;  %v911_v44 = vadd.f32 %v5073_v9, %v751_v18 }
 0x1ab   : > { %3672 = vmatpush.xpose.msk.msrb.mxu3 %vm2087_vm0, %v3951_v4  ;;  %v1490_v53 = vpop.permute.xlu1 %1489  ;;  %v1410_v42 = vpop.permute.xlu0 %1409  ;;  %3964 = vtanh.f32 %v1945_v35  ;;  %v1892_v4 = vadd.f32 %v1764_v50, %v864_v56  ;;  %v750_v35 = vld [vmem:[%s4461_s16 + $0x398] sm:$0xff] }
 0x1ac   : > { %v1782_v48 = vmul.f32 %v4873_v3, %v1490_v53  ;;  %v1766_v17 = vmul.f32 %v4873_v3, %v1410_v42  ;;  %3966 = vtanh.f32 %v1944_v22  ;;  %v910_v22 = vadd.f32 %v5073_v9, %v750_v35  ;;  %v720_v53 = vld [vmem:[%s4461_s16 + $0x2a8] sm:$0xff] }
 0x1ae   : > { %v3959_v10 = vpop.eup %3958  ;;  %v1910_v6 = vadd.f32 %v1782_v48, %v882_v52  ;;  %v1894_v41 = vadd.f32 %v1766_v17, %v866_v16  ;;  %v733_v16 = vld [vmem:[%s4461_s16 + $0x310] sm:$0xff]  ;;  %v732_v48 = vld [vmem:[%s4461_s16 + $0x308] sm:$0xff]  ;;  %v5210_v17 = vld [vmem:[%s4360_s26 + $0x6] ss:$0 sm:$0xff] }
 0x1af   : > { %3673 = vmatpush.xpose.msk.msrb.mxu3 %vm2087_vm0, %v3955_v47  ;;  %v3961_v8 = vpop.eup %3960  ;;  %3663 = vmatpush.xpose.msk.msrb.mxu2 %vm2087_vm0, %v3959_v10  ;;  %v749_v47 = vld [vmem:[%s4461_s16 + $0x390] sm:$0xff]  ;;  %v880_v10 = vadd.f32 %v4880_v11, %v720_v53  ;;  %v892_v12 = vadd.f32 %v5210_v17, %v732_v48  ;;  %v5224_v11 = vld [vmem:[%s5853_s8] ss:$0 sm:$0xff] }
 0x1b0   : > { %3968 = vtanh.f32 %v1910_v6  ;;  %3643 = vmatpush.xpose.msk.msrb.mxu1 %vm2087_vm0, %v3961_v8  ;;  %v3963_v14 = vpop.eup %3962  ;;  %v909_v46 = vadd.f32 %v5073_v9, %v749_v47  ;;  %v1809_v6 = vmul.f32 %v4873_v3, %v5176_v61  ;;  %v2086_v47 = vld [vmem:[%s5854_s9 + $0x7] sm:$0x1] }
 0x1b1   : > { %3970 = vtanh.f32 %v1894_v41  ;;  %v3965_v49 = vpop.eup %3964 }
 0x1b2   : > { %3972 = vtanh.f32 %v1909_v58  ;;  %v3967_v37 = vpop.eup %3966  ;;  %v1540_v55 = vpop.permute.xlu2 %1539 }
 0x1b3   : > { %3674 = vmatpush.xpose.msk.msrb.mxu3 %vm2087_vm0, %v3957_v7  ;;  %v1405_v45 = vpop.permute.xlu1 %1404  ;;  %3664 = vmatpush.xpose.msk.msrb.mxu2 %vm2087_vm0, %v3963_v14  ;;  %v1635_v30 = vpop.permute.xlu0 %1634  ;;  %3974 = vtanh.f32 %v1943_v1  ;;  %v893_v7 = vadd.f32 %v5210_v17, %v733_v16  ;;  %v1792_v21 = vmul.f32 %v5224_v11, %v1540_v55  ;;  %v595_v55 = vld [vmem:[%s5266_s6 + $0x1] sm:$0x1]  ;;  %v596_v16 = vld [vmem:[%s5266_s6 + $0x2] sm:$0x1] }
 0x1b4   : > { %v1765_v51 = vmul.f32 %v4873_v3, %v1405_v45  ;;  %3976 = vtanh.f32 %v1942_v43  ;;  %v1811_v23 = vmul.f32 %v4873_v3, %v1635_v30  ;;  %v718_v45 = vld [vmem:[%s4461_s16 + $0x298] sm:$0xff]  ;;  %v5236_v43 = vld [vmem:[%s4360_s26 + $0x5] ss:$0 sm:$0xff] }
 0x1b5   : > { %v1920_v61 = vadd.f32 %v1792_v21, %v892_v12  ;;  %v879_v28 = vadd.f32 %v5236_v43, %v719_v20  ;;  %v878_v56 = vadd.f32 %v5236_v43, %v718_v45 }
 0x1b6   : > { %v3969_v38 = vpop.eup %3968  ;;  %v1893_v5 = vadd.f32 %v1765_v51, %v865_v40  ;;  %v1939_v42 = vadd.f32 %v1811_v23, %v911_v44 }
 0x1b7   : > { %3675 = vmatpush.xpose.msk.msrb.mxu3 %vm2087_vm0, %v3965_v49  ;;  %v3971_v59 = vpop.eup %3970  ;;  %3644 = vmatpush.xpose.msk.msrb.mxu1 %vm2087_vm0, %v3969_v38  ;;  %v1937_v49 = vadd.f32 %v1809_v6, %v909_v46 }
 0x1b8   : > { %3627 = vmatpush.xpose.msk.msrb.mxu0 %vm2087_vm0, %v3971_v59  ;;  %3978 = vtanh.f32 %v1893_v5  ;;  %v3973_v39 = vpop.eup %3972 }
 0x1b9   : > { %v3975_v15 = vpop.eup %3974  ;;  %3980 = vtanh.f32 %v1941_v33 }
 0x1ba   : > { %3982 = vtanh.f32 %v1892_v4  ;;  %v3977_v60 = vpop.eup %3976  ;;  %v1470_v1 = vpop.permute.xlu2 %1469  ;;  %v702_v4 = vld [vmem:[%s4461_s16 + $0x218] sm:$0xff] }
 0x1bb   : > { %3676 = vmatpush.xpose.msk.msrb.mxu3 %vm2087_vm0, %v3967_v37  ;;  %v1630_v27 = vpop.permute.xlu1 %1629  ;;  %3645 = vmatpush.xpose.msk.msrb.mxu1 %vm2087_vm0, %v3973_v39  ;;  %v1550_v0 = vpop.permute.xlu0 %1549  ;;  %3984 = vtanh.f32 %v1940_v2  ;;  %v5240_v37 = vld [vmem:[%s4360_s26 + $0x4] ss:$0 sm:$0xff]  ;;  %v1778_v50 = vmul.f32 %v5224_v11, %v1470_v1  ;;  %s5250_s26 = sand.u32 1, %s4209_s28   ;;  %v5270_v2 = vstv %s5233_s17 }
 0x1bc   : > { %v1794_v25 = vmul.f32 %v4873_v3, %v1550_v0  ;;  %v1810_v26 = vmul.f32 %v4873_v3, %v1630_v27  ;;  %v863_v31 = vadd.f32 %v5240_v37, %v703_v57  ;;  %v748_v27 = vld [vmem:[%s4461_s16 + $0x388] sm:$0xff]  ;;  %v579_v0 = vld [vmem:[%s5260_s24 + $0x1] sm:$0x1]  ;;  %v862_v23 = vadd.f32 %v5240_v37, %v702_v4  ;;  %s5279_s3 = sshll.u32 %s5250_s26, 3 }
 0x1bd   : > { %v1906_v18 = vadd.f32 %v1778_v50, %v878_v56  ;;  %vm587_vm1 = vcmp.ne.s32.totalorder %v579_v0, 0  ;;  %vm604_vm2 = vcmp.eq.s32.totalorder %v595_v55, %v5270_v2  ;;  %vm605_vm8 = vcmp.eq.s32.totalorder %v596_v16, %v5270_v2  ;;  %s5308_s17 = scalar_lea.vmem [#allocation9], %s5279_s3  ;;  %s5595_s14 = scalar_lea.vmem [#allocation8], %s5279_s3 }
 0x1be   : > { %v3979_v29 = vpop.eup %3978  ;;  %v1922_v52 = vadd.f32 %v1794_v25, %v894_v19  ;;  %v1938_v41 = vadd.f32 %v1810_v26, %v910_v22  ;;  %vm5283_vm3 = vmand %vm587_vm1, %vm604_vm2 }
 0x1bf   : > { %3677 = vmatpush.xpose.msk.msrb.mxu3 %vm2087_vm0, %v3975_v15  ;;  %3628 = vmatpush.xpose.msk.msrb.mxu0 %vm2087_vm0, %v3979_v29  ;;  %v3981_v63 = vpop.eup %3980  ;;  %v701_v15 = vld [vmem:[%s4461_s16 + $0x210] sm:$0xff]  ;;  %v908_v29 = vadd.f32 %v5073_v9, %v748_v27 }
 0x1c0   : > { %3986 = vtanh.f32 %v1922_v52  ;;  %v3983_v62 = vpop.eup %3982  ;;  %v861_v25 = vadd.f32 %v5240_v37, %v701_v15  ;;  %v580_v52 = vld [vmem:[%s5260_s24 + $0x2] sm:$0x1] }
 0x1c1   : > { %3988 = vtanh.f32 %v1939_v42  ;;  %v3985_v36 = vpop.eup %3984  ;;  %v4220_v42 = vmov 0.0   ;;  %vm588_vm7 = vcmp.ne.s32.totalorder %v580_v52, 0 }
 0x1c2   : > { %3990 = vtanh.f32 %v1938_v41  ;;  %v1385_v19 = vpop.permute.xlu2 %1384  ;;  %vm5328_vm10 = vmand %vm588_vm7, %vm605_vm8 }
 0x1c3   : > { %3678 = vmatpush.xpose.msk.msrb.mxu3 %vm2087_vm0, %v3977_v60  ;;  %v1545_v34 = vpop.permute.xlu1 %1544  ;;  %v1480_v24 = vpop.permute.xlu0 %1479  ;;  %3629 = vmatpush.xpose.msk.msrb.mxu0 %vm2087_vm0, %v3983_v62  ;;  %v1761_v22 = vmul.f32 %v5224_v11, %v1385_v19  ;;  %v594_v62 = vld [vmem:[%s5266_s6] sm:$0x1] }
 0x1c4   : > { %v1793_v8 = vmul.f32 %v4873_v3, %v1545_v34  ;;  %v1780_v58 = vmul.f32 %v5224_v11, %v1480_v24  ;;  %vm603_vm5 = vcmp.eq.s32.totalorder %v594_v62, %v5270_v2  ;;  %v747_v24 = vld [vmem:[%s4461_s16 + $0x380] sm:$0xff] }
 0x1c6   : > { %v1921_v3 = vadd.f32 %v1793_v8, %v893_v7  ;;  %v1908_v14 = vadd.f32 %v1780_v58, %v880_v10  ;;  %v3987_v40 = vpop.eup %3986  ;;  %v578_v7 = vld [vmem:[%s5260_s24] sm:$0x1]  ;;  %v1889_v58 = vadd.f32 %v1761_v22, %v861_v25 }
 0x1c7   : > { %3679 = vmatpush.xpose.msk.msrb.mxu3 %vm2087_vm0, %v3981_v63  ;;  %3665 = vmatpush.xpose.msk.msrb.mxu2 %vm2087_vm0, %v3987_v40  ;;  %v3989_v51 = vpop.eup %3988  ;;  %v5294_v63 = vsel %vm5283_vm3, 1.0, %v4220_v42  ;;  %v2227_v48 = vpop.f32.mrf.mxu1  ;;  %vm586_vm4 = vcmp.ne.s32.totalorder %v578_v7, 0  ;;  %v907_v40 = vadd.f32 %v5073_v9, %v747_v24  ;;  %v715_v22 = vld [vmem:[%s4461_s16 + $0x280] sm:$0xff] }
 0x1c8   : > { %3992 = vtanh.f32 %v1921_v3  ;;  %v3991_v54 = vpop.eup %3990  ;;  %v3211_v34 = vmul.f32 %v5294_v63, %v2227_v48  ;;  %vm5301_vm6 = vmand %vm586_vm4, %vm603_vm5  ;;  %v731_v3 = vld [vmem:[%s4461_s16 + $0x300] sm:$0xff]  ;;  %v5360_v15 = vsel %vm5283_vm3, %v2227_v48, -1e+30  ;;  %v875_v7 = vadd.f32 %v5236_v43, %v715_v22 }
 0x1c9   : > { %3994 = vtanh.f32 %v1908_v14  ;;  %v5314_v12 = vsel %vm5301_vm6, 1.0, %v4220_v42  ;;  %v891_v45 = vadd.f32 %v5210_v17, %v731_v3  ;;  %v2668_v25 = vsel %vm2664_vm9, %v5360_v15, -inf  ;;  %v2084_v3 = vld [vmem:[%s5854_s9 + $0x5] sm:$0x1] }
 0x1ca   : > { %3996 = vtanh.f32 %v1937_v49  ;;  %3219 = vst [vmem:[%s5308_s17 + $0x1] sm:$0x1] %v3211_v34  ;;  %v1460_v4 = vpop.permute.xlu2 %1459 }
 0x1cb   : > { %3680 = vmatpush.xpose.msk.msrb.mxu3 %vm2087_vm0, %v3985_v36  ;;  %v1475_v30 = vpop.permute.xlu1 %1474  ;;  %v1395_v5 = vpop.permute.xlu0 %1394  ;;  %3998 = vtanh.f32 %v1920_v61 }
 0x1cc   : > { %v1779_v38 = vmul.f32 %v5224_v11, %v1475_v30  ;;  %v1763_v59 = vmul.f32 %v5224_v11, %v1395_v5  ;;  %v2156_v36 = vpop.f32.mrf.mxu0 }
 0x1cd   : > { %v3210_v1 = vmul.f32 %v5314_v12, %v2156_v36  ;;  %v5322_v14 = vsel %vm5301_vm6, %v2156_v36, -1e+30  ;;  %v581_v36 = vld [vmem:[%s5260_s24 + $0x3] sm:$0x1] }
 0x1ce   : > { %v1907_v32 = vadd.f32 %v1779_v38, %v879_v28  ;;  %v3993_v33 = vpop.eup %3992  ;;  %v1891_v13 = vadd.f32 %v1763_v59, %v863_v31  ;;  %v2665_v57 = vsel %vm2664_vm9, %v5322_v14, -inf  ;;  %v5338_v28 = vsel %vm5328_vm10, 1.0, %v4220_v42 }
 0x1cf   : > { %3681 = vmatpush.xpose.msk.msrb.mxu3 %vm2087_vm0, %v3989_v51  ;;  %v3995_v39 = vpop.eup %3994  ;;  %3666 = vmatpush.xpose.msk.msrb.mxu2 %vm2087_vm0, %v3993_v33  ;;  %3218 = vst [vmem:[%s5308_s17] sm:$0x1] %v3210_v1  ;;  %v717_v33 = vld [vmem:[%s4461_s16 + $0x290] sm:$0xff]  ;;  %v597_v1 = vld [vmem:[%s5266_s6 + $0x3] sm:$0x1]  ;;  %vm589_vm11 = vcmp.ne.s32.totalorder %v581_v36, 0  ;;  %v2912_v36 = vld [vmem:[%s5490_s25 + $0xf8] sm:$0xff] }
 0x1d0   : > { %4000 = vtanh.f32 %v1907_v32  ;;  %3646 = vmatpush.xpose.msk.msrb.mxu1 %vm2087_vm0, %v3995_v39  ;;  %v3997_v44 = vpop.eup %3996  ;;  %2666 = vmax.xlane.f32.xlu1 %v2665_v57  ;;  %v716_v39 = vld [vmem:[%s4461_s16 + $0x288] sm:$0xff]  ;;  %v877_v19 = vadd.f32 %v5236_v43, %v717_v33  ;;  %vm606_vm12 = vcmp.eq.s32.totalorder %v597_v1, %v5270_v2  ;;  %v2924_v1 = vld [vmem:[%s5490_s25 + $0x158] sm:$0xff] }
 0x1d1   : > { %4002 = vtanh.f32 %v1891_v13  ;;  %v3999_v35 = vpop.eup %3998  ;;  %vm614_vm13 = vmand %vm589_vm11, %vm606_vm12 }
 0x1d2   : > { %4004 = vtanh.f32 %v1906_v18 }
 0x1d3   : > { %3682 = vmatpush.xpose.msk.msrb.mxu3 %vm2087_vm0, %v3991_v54  ;;  %v1390_v60 = vpop.permute.xlu1 %1389  ;;  %v1620_v53 = vpop.permute.xlu0 %1619  ;;  %3667 = vmatpush.xpose.msk.msrb.mxu2 %vm2087_vm0, %v3999_v35  ;;  %v700_v54 = vld [vmem:[%s4461_s16 + $0x208] sm:$0xff] }
 0x1d4   : > { %v1762_v26 = vmul.f32 %v5224_v11, %v1390_v60  ;;  %v1808_v46 = vmul.f32 %v5224_v11, %v1620_v53  ;;  %v860_v18 = vadd.f32 %v5240_v37, %v700_v54  ;;  %v699_v53 = vld [vmem:[%s4461_s16 + $0x200] sm:$0xff]  ;;  %s5578_s16 = scalar_lea.vmem %s5866_s7, %s4351_s22  ;;  %s5589_s22 = scalar_lea.vmem [#allocation6], %s5279_s3 }
 0x1d5   : > { %s3269_s4 = sshll.u32 %s5589_s22, 4  ;;  %s4083_s7 = scalar_lea.hbm %s5867_s11, 16  ;;  %s3270_s4 = int_to_ptr.vmem [resolvable:$true] %s3269_s4 }
 0x1d6   : > { %v1890_v10 = vadd.f32 %v1762_v26, %v862_v23  ;;  %v4001_v41 = vpop.eup %4000  ;;  %v1936_v8 = vadd.f32 %v1808_v46, %v908_v29  ;;  %v1776_v23 = vmul.f32 %v5224_v11, %v1460_v4  ;;  %v2085_v26 = vld [vmem:[%s5854_s9 + $0x6] sm:$0x1]  ;;  %v859_v46 = vadd.f32 %v5240_v37, %v699_v53 }
 0x1d7   : > { %3683 = vmatpush.xpose.msk.msrb.mxu3 %vm2087_vm0, %v3997_v44  ;;  %v4003_v21 = vpop.eup %4002  ;;  %3647 = vmatpush.xpose.msk.msrb.mxu1 %vm2087_vm0, %v4001_v41  ;;  %v876_v44 = vadd.f32 %v5236_v43, %v716_v39 }
 0x1d8   : > { %4006 = vtanh.f32 %v1890_v10  ;;  %3630 = vmatpush.xpose.msk.msrb.mxu0 %vm2087_vm0, %v4003_v21  ;;  %v4005_v20 = vpop.eup %4004 }
 0x1d9   : > { %4008 = vtanh.f32 %v1936_v8  ;;  %v1904_v48 = vadd.f32 %v1776_v23, %v876_v44 }
 0x1da   : > { %4010 = vtanh.f32 %v1889_v58 }
 0x1db   : > { %v1615_v61 = vpop.permute.xlu1 %1614  ;;  %v1535_v51 = vpop.permute.xlu0 %1534  ;;  %3648 = vmatpush.xpose.msk.msrb.mxu1 %vm2087_vm0, %v4005_v20  ;;  %v5403_v20 = vsel %vm614_vm13, 1.0, %v4220_v42 }
 0x1dc   : > { %v1807_v9 = vmul.f32 %v5224_v11, %v1615_v61  ;;  %v1791_v30 = vmul.f32 %v5224_v11, %v1535_v51  ;;  %v584_v51 = vld [vmem:[%s5260_s24 + $0x6] sm:$0x1] }
 0x1dd   : > { %vm592_vm14 = vcmp.ne.s32.totalorder %v584_v51, 0  ;;  %v2909_v51 = vld [vmem:[%s5490_s25 + $0xe0] sm:$0xff] }
 0x1de   : > { %v2298_v31 = vpop.f32.mrf.mxu2  ;;  %v4007_v17 = vpop.eup %4006  ;;  %v1935_v56 = vadd.f32 %v1807_v9, %v907_v40  ;;  %v1919_v59 = vadd.f32 %v1791_v30, %v891_v45  ;;  %v600_v30 = vld [vmem:[%s5266_s6 + $0x6] sm:$0x1] }
 0x1df   : > { %v3212_v50 = vmul.f32 %v5338_v28, %v2298_v31  ;;  %v5347_v38 = vsel %vm5328_vm10, %v2298_v31, -1e+30  ;;  %v4009_v5 = vpop.eup %4008  ;;  %3631 = vmatpush.xpose.msk.msrb.mxu0 %vm2087_vm0, %v4007_v17  ;;  %v585_v31 = vld [vmem:[%s5260_s24 + $0x7] sm:$0x1]  ;;  %vm609_vm15 = vcmp.eq.s32.totalorder %v600_v30, %v5270_v2 }
 0x1e0   : > { %v2671_v32 = vsel %vm2664_vm9, %v5347_v38, -inf  ;;  %4012 = vtanh.f32 %v1935_v56  ;;  %3684 = vmatpush.xpose.msk.msrb.mxu3 %vm2087_vm0, %v4009_v5  ;;  %v4011_v13 = vpop.eup %4010  ;;  %v601_v17 = vld [vmem:[%s5266_s6 + $0x7] sm:$0x1]  ;;  %vm5418_vm2 = vmand %vm592_vm14, %vm609_vm15  ;;  %v2907_v5 = vld [vmem:[%s5490_s25 + $0xd0] sm:$0xff] }
 0x1e1   : > { %3220 = vst [vmem:[%s5308_s17 + $0x2] sm:$0x1] %v3212_v50  ;;  %2672 = vmax.xlane.f32.xlu2 %v2671_v32  ;;  %4014 = vtanh.f32 %v1919_v59  ;;  %vm610_vm1 = vcmp.eq.s32.totalorder %v601_v17, %v5270_v2  ;;  %v582_v32 = vld [vmem:[%s5260_s24 + $0x4] sm:$0x1]  ;;  %v5430_v33 = vsel %vm5418_vm2, 1.0, %v4220_v42  ;;  %v2908_v17 = vld [vmem:[%s5490_s25 + $0xd8] sm:$0xff] }
 0x1e2   : > { %vm590_vm4 = vcmp.ne.s32.totalorder %v582_v32, 0  ;;  %v2921_v30 = vld [vmem:[%s5490_s25 + $0x140] sm:$0xff]  ;;  %v2906_v32 = vld [vmem:[%s5490_s25 + $0xc8] sm:$0xff] }
 0x1e3   : > { %v1380_v27 = vpop.permute.xlu1 %1379  ;;  %3632 = vmatpush.xpose.msk.msrb.mxu0 %vm2087_vm0, %v4011_v13  ;;  %v1465_v55 = vpop.permute.xlu0 %1464  ;;  %v598_v13 = vld [vmem:[%s5266_s6 + $0x4] sm:$0x1] }
 0x1e4   : > { %v1760_v0 = vmul.f32 %v5224_v11, %v1380_v27  ;;  %v1777_v35 = vmul.f32 %v5224_v11, %v1465_v55  ;;  %v599_v27 = vld [vmem:[%s5266_s6 + $0x5] sm:$0x1]  ;;  %vm607_vm5 = vcmp.eq.s32.totalorder %v598_v13, %v5270_v2  ;;  %v2918_v13 = vld [vmem:[%s5490_s25 + $0x128] sm:$0xff]  ;;  %s5725_s6 = scalar_lea.sflag [#allocation7], %s3231_s23 }
 0x1e5   : > { %vm608_vm7 = vcmp.eq.s32.totalorder %v599_v27, %v5270_v2  ;;  %vm615_vm8 = vmand %vm590_vm4, %vm607_vm5  ;;  %v2889_v27 = vld [vmem:[%s5490_s25 + $0x40] sm:$0xff] }
 0x1e6   : > { %v4013_v60 = vpop.eup %4012  ;;  %v1888_v29 = vadd.f32 %v1760_v0, %v860_v18  ;;  %v1905_v16 = vadd.f32 %v1777_v35, %v877_v19  ;;  %v583_v18 = vld [vmem:[%s5260_s24 + $0x5] sm:$0x1]  ;;  %s3268_s24 = scalar_lea.hbm %s5867_s11, %s4347_s21 }
 0x1e7   : > { %v4015_v52 = vpop.eup %4014  ;;  %3685 = vmatpush.xpose.msk.msrb.mxu3 %vm2087_vm0, %v4013_v60  ;;  %vm591_vm6 = vcmp.ne.s32.totalorder %v583_v18, 0  ;;  %v2917_v18 = vld [vmem:[%s5490_s25 + $0x120] sm:$0xff] }
 0x1e8   : > { %4016 = vtanh.f32 %v1888_v29  ;;  %3668 = vmatpush.xpose.msk.msrb.mxu2 %vm2087_vm0, %v4015_v52  ;;  %vm616_vm10 = vmand %vm591_vm6, %vm608_vm7  ;;  %v5457_v52 = vsel %vm615_vm8, 1.0, %v4220_v42 }
 0x1e9   : > { %2669 = vmax.xlane.f32.xlu2 %v2668_v25  ;;  %4018 = vtanh.f32 %v1905_v16  ;;  %v5460_v16 = vsel %vm616_vm10, 1.0, %v4220_v42 }
 0x1ea   : > { %3686 = vmatmul.msk.f32.vlgmr.msrb.gmra.mxu3 %vm2087_vm0, %v2086_v47  ;;  %4020 = vtanh.f32 %v1904_v48 }
 0x1eb   : > { %3669 = vmatmul.msk.f32.vlgmr.msrb.gmra.mxu2 %vm2087_vm0, %v2085_v26  ;;  %v1455_v62 = vpop.permute.xlu1 %1454  ;;  %v1375_v10 = vpop.permute.xlu0 %1374 }
 0x1ec   : > { %v1775_v34 = vmul.f32 %v5224_v11, %v1455_v62  ;;  %v1759_v6 = vmul.f32 %v5224_v11, %v1375_v10  ;;  %v2083_v11 = vld [vmem:[%s5854_s9 + $0x4] sm:$0x1] }
 0x1ee   : > { %v4017_v41 = vpop.eup %4016  ;;  %v1903_v8 = vadd.f32 %v1775_v34, %v875_v7  ;;  %v1887_v21 = vadd.f32 %v1759_v6, %v859_v46 }
 0x1ef   : > { %v4019_v24 = vpop.eup %4018  ;;  %3633 = vmatpush.xpose.msk.msrb.mxu0 %vm2087_vm0, %v4017_v41 }
 0x1f0   : > { %4022 = vtanh.f32 %v1903_v8  ;;  %3649 = vmatpush.xpose.msk.msrb.mxu1 %vm2087_vm0, %v4019_v24  ;;  %v4021_v43 = vpop.eup %4020 }
 0x1f1   : > { %4024 = vtanh.f32 %v1887_v21 }
 0x1f4   : > { %3650 = vmatpush.xpose.msk.msrb.mxu1 %vm2087_vm0, %v4021_v43 }
 0x1f6   : > { %v4023_v37 = vpop.eup %4022 }
 0x1f7   : > { %v4025_v58 = vpop.eup %4024 }
 0x1f8   : > { %3634 = vmatpush.xpose.msk.msrb.mxu0 %vm2087_vm0, %v4025_v58  ;;  %3651 = vmatpush.xpose.msk.msrb.mxu1 %vm2087_vm0, %v4023_v37  ;;  %v2927_v58 = vld [vmem:[%s5490_s25 + $0x170] sm:$0xff] }
 0x1fb   : > { %3635 = vmatmul.msk.f32.vlgmr.msrb.gmra.mxu0 %vm2087_vm0, %v2083_v11  ;;  %3652 = vmatmul.msk.f32.vlgmr.msrb.gmra.mxu1 %vm2087_vm0, %v2084_v3  ;;  %vm593_vm0 = vcmp.ne.s32.totalorder %v585_v31, 0  ;;  %v2926_v11 = vld [vmem:[%s5490_s25 + $0x168] sm:$0xff]  ;;  %v2925_v3 = vld [vmem:[%s5490_s25 + $0x160] sm:$0xff] }
 0x1fc   : > { %vm618_vm3 = vmand %vm593_vm0, %vm610_vm1  ;;  %3029 = vmatpush.msra.mxu1 %v2912_v36  ;;  %v2893_v31 = vld [vmem:[%s5490_s25 + $0x60] sm:$0xff] }
 0x1fd   : > { %v5424_v54 = vsel %vm618_vm3, 1.0, %v4220_v42 }
 0x225   : > { %v2369_v40 = vpop.f32.mrf.mxu3 }
 0x226   : > { %v3213_v49 = vmul.f32 %v5403_v20, %v2369_v40  ;;  %v5406_v57 = vsel %vm614_vm13, %v2369_v40, -1e+30  ;;  %v2911_v40 = vld [vmem:[%s5490_s25 + $0xf0] sm:$0xff] }
 0x227   : > { %v2674_v61 = vsel %vm2664_vm9, %v5406_v57, -inf  ;;  %3030 = vmatpush.msra.mxu1 %v2911_v40 }
 0x228   : > { %3221 = vst [vmem:[%s5308_s17 + $0x3] sm:$0x1] %v3213_v49  ;;  %2675 = vmax.xlane.f32.xlu0 %v2674_v61  ;;  %v2923_v49 = vld [vmem:[%s5490_s25 + $0x150] sm:$0xff]  ;;  %v2910_v61 = vld [vmem:[%s5490_s25 + $0xe8] sm:$0xff] }
 0x229   : > { %3031 = vmatpush.msra.mxu1 %v2910_v61 }
 0x22b   : > { %3032 = vmatpush.msra.mxu1 %v2909_v51 }
 0x22d   : > { %3033 = vmatpush.msra.mxu1 %v2908_v17 }
 0x22f   : > { %3034 = vmatpush.msra.mxu1 %v2907_v5 }
 0x231   : > { %3035 = vmatpush.msra.mxu1 %v2906_v32 }
 0x243   : > { %v2667_v59 = vpop.xlane.xlu1 %2666 }
 0x244   : > { %v2689_v4 = vsub.f32 %v5322_v14, %v2667_v59  ;;  %v2891_v59 = vld [vmem:[%s5490_s25 + $0x50] sm:$0xff] }
 0x246   : > { %v2697_v60 = vmul.f32 1.442695, %v2689_v4  ;;  %v2890_v4 = vld [vmem:[%s5490_s25 + $0x48] sm:$0xff] }
 0x254   : > { %v2673_v45 = vpop.xlane.xlu2 %2672 }
 0x255   : > { %v2691_v9 = vsub.f32 %v5347_v38, %v2673_v45  ;;  %v2922_v45 = vld [vmem:[%s5490_s25 + $0x148] sm:$0xff] }
 0x257   : > { %v2701_v56 = vmul.f32 1.442695, %v2691_v9  ;;  %v2894_v9 = vld [vmem:[%s5490_s25 + $0x68] sm:$0xff] }
 0x259   : > { %4026 = vpow2.f32 %v2701_v56  ;;  %v2920_v56 = vld [vmem:[%s5490_s25 + $0x138] sm:$0xff] }
 0x25c   : > { %v2670_v50 = vpop.xlane.xlu2 %2669 }
 0x25d   : > { %v2690_v38 = vsub.f32 %v5360_v15, %v2670_v50  ;;  %v2892_v50 = vld [vmem:[%s5490_s25 + $0x58] sm:$0xff] }
 0x25f   : > { %v2699_v19 = vmul.f32 1.442695, %v2690_v38  ;;  %v4027_v14 = vpop.eup %4026  ;;  %v2919_v38 = vld [vmem:[%s5490_s25 + $0x130] sm:$0xff] }
 0x260   : > { %v5454_v29 = vmul.f32 %v4027_v14, %v5338_v28  ;;  %v2887_v14 = vld [vmem:[%s5490_s25 + $0x30] sm:$0xff] }
 0x261   : > { %4028 = vpow2.f32 %v2699_v19  ;;  %v2904_v19 = vld [vmem:[%s5490_s25 + $0xb8] sm:$0xff] }
 0x262   : > { %4030 = vpow2.f32 %v2697_v60  ;;  %v2727_v2 = vsel %vm2664_vm9, %v5454_v29, 0.0  ;;  %v2914_v60 = vld [vmem:[%s5490_s25 + $0x108] sm:$0xff] }
 0x267   : > { %v4029_v47 = vpop.eup %4028 }
 0x268   : > { %v4031_v46 = vpop.eup %4030  ;;  %v5476_v34 = vmul.f32 %v4029_v47, %v5294_v63  ;;  %v2928_v63 = vld [vmem:[%s5490_s25 + $0x178] sm:$0xff]  ;;  %v2901_v47 = vld [vmem:[%s5490_s25 + $0xa0] sm:$0xff] }
 0x269   : > { %v5480_v10 = vmul.f32 %v4031_v46, %v5314_v12  ;;  %3049 = vmatpush.msra.mxu2 %v2928_v63 }
 0x26a   : > { %v2724_v6 = vsel %vm2664_vm9, %v5476_v34, 0.0 }
 0x26b   : > { %v2721_v41 = vsel %vm2664_vm9, %v5480_v10, 0.0  ;;  %3050 = vmatpush.msra.mxu2 %v2927_v58 }
 0x26d   : > { %v2653_v39 = vpop.f32.mrf.mxu3  ;;  %3051 = vmatpush.msra.mxu2 %v2926_v11 }
 0x26e   : > { %v2582_v15 = vpop.f32.mrf.mxu2  ;;  %v3217_v0 = vmul.f32 %v5424_v54, %v2653_v39  ;;  %v5437_v55 = vsel %vm618_vm3, %v2653_v39, -1e+30  ;;  %v2905_v39 = vld [vmem:[%s5490_s25 + $0xc0] sm:$0xff] }
 0x26f   : > { %v3216_v44 = vmul.f32 %v5430_v33, %v2582_v15  ;;  %v2686_v23 = vsel %vm2664_vm9, %v5437_v55, -inf  ;;  %v5444_v35 = vsel %vm5418_vm2, %v2582_v15, -1e+30  ;;  %3052 = vmatpush.msra.mxu2 %v2925_v3  ;;  %3036 = vmatpush.msra.mxu1 %v2905_v39  ;;  %v2916_v15 = vld [vmem:[%s5490_s25 + $0x118] sm:$0xff] }
 0x270   : > { %3225 = vst [vmem:[%s5308_s17 + $0x7] sm:$0x1] %v3217_v0  ;;  %2687 = vmax.xlane.f32.xlu0 %v2686_v23  ;;  %v2683_v25 = vsel %vm2664_vm9, %v5444_v35, -inf  ;;  %v2888_v0 = vld [vmem:[%s5490_s25 + $0x38] sm:$0xff]  ;;  %v2915_v23 = vld [vmem:[%s5490_s25 + $0x110] sm:$0xff] }
 0x271   : > { %3224 = vst [vmem:[%s5308_s17 + $0x6] sm:$0x1] %v3216_v44  ;;  %2684 = vmax.xlane.f32.xlu2 %v2683_v25  ;;  %3053 = vmatpush.msra.mxu2 %v2924_v1  ;;  %v2903_v44 = vld [vmem:[%s5490_s25 + $0xb0] sm:$0xff]  ;;  %v2902_v25 = vld [vmem:[%s5490_s25 + $0xa8] sm:$0xff]  ;;  %v2944_v1 = vld [vmem:[%s5490_s25 + $0x1f8] sm:$0xff] }
 0x272   : > { %3037 = vmatpush.msra.mxu1 %v2904_v19  ;;  %3069 = vmatpush.msra.mxu3 %v2944_v1  ;;  %v2935_v1 = vld [vmem:[%s5490_s25 + $0x1b0] sm:$0xff] }
 0x273   : > { %3054 = vmatpush.msra.mxu2 %v2923_v49 }
 0x274   : > { %3038 = vmatpush.msra.mxu1 %v2903_v44 }
 0x275   : > { %3055 = vmatpush.msra.mxu2 %v2922_v45 }
 0x276   : > { %3039 = vmatpush.msra.mxu1 %v2902_v25 }
 0x277   : > { %3056 = vmatpush.msra.mxu2 %v2921_v30 }
 0x278   : > { %v2440_v22 = vpop.f32.mrf.mxu0  ;;  %v2511_v26 = vpop.f32.mrf.mxu1  ;;  %2728 = vadd.xlane.f32.xlu0 %v2727_v2  ;;  %v2886_v2 = vld [vmem:[%s5490_s25 + $0x28] sm:$0xff]  ;;  %3040 = vmatpush.msra.mxu1 %v2901_v47 }
 0x279   : > { %v3214_v53 = vmul.f32 %v5457_v52, %v2440_v22  ;;  %v3215_v28 = vmul.f32 %v5460_v16, %v2511_v26  ;;  %v5466_v48 = vsel %vm616_vm10, %v2511_v26, -1e+30  ;;  %v5468_v7 = vsel %vm615_vm8, %v2440_v22, -1e+30  ;;  %3057 = vmatpush.msra.mxu2 %v2920_v56  ;;  %v2913_v22 = vld [vmem:[%s5490_s25 + $0x100] sm:$0xff] }
 0x27a   : > { %v2680_v42 = vsel %vm2664_vm9, %v5466_v48, -inf  ;;  %v2677_v62 = vsel %vm2664_vm9, %v5468_v7, -inf }
 0x27b   : > { %3222 = vst [vmem:[%s5308_s17 + $0x4] sm:$0x1] %v3214_v53  ;;  %2681 = vmax.xlane.f32.xlu2 %v2680_v42  ;;  %2678 = vmax.xlane.f32.xlu1 %v2677_v62  ;;  %v2885_v53 = vld [vmem:[%s5490_s25 + $0x20] sm:$0xff] }
 0x27c   : > { %3223 = vst [vmem:[%s5308_s17 + $0x5] sm:$0x1] %v3215_v28  ;;  %3058 = vmatpush.msra.mxu2 %v2919_v38  ;;  %v2900_v28 = vld [vmem:[%s5490_s25 + $0x98] sm:$0xff] }
 0x27d   : > { %3041 = vmatpush.msra.mxu1 %v2900_v28 }
 0x27e   : > { %3059 = vmatpush.msra.mxu2 %v2918_v13 }
 0x280   : > { %2725 = vadd.xlane.f32.xlu0 %v2724_v6  ;;  %3060 = vmatpush.msra.mxu2 %v2917_v18  ;;  %v2884_v6 = vld [vmem:[%s5490_s25 + $0x18] sm:$0xff] }
 0x282   : > { %3061 = vmatpush.msra.mxu2 %v2916_v15 }
 0x283   : > { %2722 = vadd.xlane.f32.xlu2 %v2721_v41  ;;  %v2899_v41 = vld [vmem:[%s5490_s25 + $0x90] sm:$0xff] }
 0x284   : > { %3062 = vmatpush.msra.mxu2 %v2915_v23  ;;  %3042 = vmatpush.msra.mxu1 %v2899_v41 }
 0x286   : > { %3063 = vmatpush.msra.mxu2 %v2914_v60  ;;  %v3188_v60 = vld [vmem:[%s5578_s16 + $0x2] sm:$0x1] }
 0x288   : > { %3064 = vmatpush.msra.mxu2 %v2913_v22 }
 0x29b   : > { %v2676_v12 = vpop.xlane.xlu0 %2675 }
 0x29c   : > { %v2692_v8 = vsub.f32 %v5406_v57, %v2676_v12  ;;  %v2895_v57 = vld [vmem:[%s5490_s25 + $0x70] sm:$0xff] }
 0x29d   : > { %v2883_v12 = vld [vmem:[%s5490_s25 + $0x10] sm:$0xff] }
 0x29e   : > { %v2703_v24 = vmul.f32 1.442695, %v2692_v8  ;;  %v2898_v8 = vld [vmem:[%s5490_s25 + $0x88] sm:$0xff] }
 0x29f   : > { %3043 = vmatpush.msra.mxu1 %v2898_v8 }
 0x2a0   : > { %4032 = vpow2.f32 %v2703_v24 }
 0x2a6   : > { %v4033_v21 = vpop.eup %4032 }
 0x2a7   : > { %v5495_v43 = vmul.f32 %v4033_v21, %v5403_v20  ;;  %v2896_v20 = vld [vmem:[%s5490_s25 + $0x78] sm:$0xff]  ;;  %v2882_v21 = vld [vmem:[%s5490_s25 + $0x8] sm:$0xff] }
 0x2a8   : > { %3009 = vmatpush.msra.mxu0 %v2896_v20  ;;  %v2943_v20 = vld [vmem:[%s5490_s25 + $0x1f0] sm:$0xff] }
 0x2a9   : > { %v2730_v37 = vsel %vm2664_vm9, %v5495_v43, 0.0  ;;  %3070 = vmatpush.msra.mxu3 %v2943_v20 }
 0x2aa   : > { %2731 = vadd.xlane.f32.xlu1 %v2730_v37  ;;  %3010 = vmatpush.msra.mxu0 %v2895_v57  ;;  %v2897_v37 = vld [vmem:[%s5490_s25 + $0x80] sm:$0xff] }
 0x2ab   : > { %3044 = vmatpush.msra.mxu1 %v2897_v37 }
 0x2ac   : > { %3011 = vmatpush.msra.mxu0 %v2894_v9  ;;  %v2942_v9 = vld [vmem:[%s5490_s25 + $0x1e8] sm:$0xff] }
 0x2ad   : > { %3071 = vmatpush.msra.mxu3 %v2942_v9  ;;  %v2934_v9 = vld [vmem:[%s5490_s25 + $0x1a8] sm:$0xff] }
 0x2ae   : > { %3012 = vmatpush.msra.mxu0 %v2893_v31 }
 0x2b0   : > { %3013 = vmatpush.msra.mxu0 %v2892_v50 }
 0x2b2   : > { %3014 = vmatpush.msra.mxu0 %v2891_v59 }
 0x2b4   : > { %3015 = vmatpush.msra.mxu0 %v2890_v4 }
 0x2b6   : > { %3016 = vmatpush.msra.mxu0 %v2889_v27 }
 0x2b8   : > { %3017 = vmatpush.msra.mxu0 %v2888_v0 }
 0x2ba   : > { %3018 = vmatpush.msra.mxu0 %v2887_v14 }
 0x2bc   : > { %3019 = vmatpush.msra.mxu0 %v2886_v2 }
 0x2be   : > { %3020 = vmatpush.msra.mxu0 %v2885_v53 }
 0x2c0   : > { %3021 = vmatpush.msra.mxu0 %v2884_v6  ;;  %v2938_v6 = vld [vmem:[%s5490_s25 + $0x1c8] sm:$0xff] }
 0x2c2   : > { %3022 = vmatpush.msra.mxu0 %v2883_v12  ;;  %v2937_v12 = vld [vmem:[%s5490_s25 + $0x1c0] sm:$0xff] }
 0x2c4   : > { %3023 = vmatpush.msra.mxu0 %v2882_v21 }
 0x2e3   : > { %v2688_v26 = vpop.xlane.xlu0 %2687 }
 0x2e4   : > { %v2696_v42 = vsub.f32 %v5437_v55, %v2688_v26  ;;  %v2685_v62 = vpop.xlane.xlu2 %2684  ;;  %v2939_v26 = vld [vmem:[%s5490_s25 + $0x1d0] sm:$0xff] }
 0x2e5   : > { %v2695_v46 = vsub.f32 %v5444_v35, %v2685_v62  ;;  %v2881_v35 = vld [vmem:[%s5490_s25] sm:$0xff] }
 0x2e6   : > { %v2711_v63 = vmul.f32 1.442695, %v2696_v42  ;;  %3024 = vmatpush.msra.mxu0 %v2881_v35 }
 0x2e7   : > { %v2709_v24 = vmul.f32 1.442695, %v2695_v46 }
 0x2e8   : > { %4034 = vpow2.f32 %v2711_v63 }
 0x2e9   : > { %4036 = vpow2.f32 %v2709_v24 }
 0x2eb   : > { %v2729_v55 = vpop.xlane.xlu0 %2728 }
 0x2ec   : > { %vm2747_vm11 = vcmp.gt.f32.partialorder %v2729_v55, 0.0 }
 0x2ed   : > { %v2755_v58 = vsel %vm2747_vm11, %v2729_v55, 1.0  ;;  %v2936_v55 = vld [vmem:[%s5490_s25 + $0x1b8] sm:$0xff] }
 0x2ee   : > { %v4035_v11 = vpop.eup %4034  ;;  %4038 = vrcp.f32 %v2755_v58  ;;  %v2682_v3 = vpop.xlane.xlu2 %2681  ;;  %v2802_v59 = vand.u32 2147483648, %v2755_v58  ;;  %v2800_v39 = vand.u32 2147483647, %v2755_v58  ;;  %vm2796_vm15 = vweird.f32 %v2755_v58 }
 0x2ef   : > { %v2679_v36 = vpop.xlane.xlu1 %2678  ;;  %v4037_v40 = vpop.eup %4036  ;;  %v2694_v49 = vsub.f32 %v5466_v48, %v2682_v3  ;;  %v5553_v61 = vmul.f32 %v4035_v11, %v5424_v54  ;;  %v3187_v11 = vld [vmem:[%s5578_s16 + $0x1] sm:$0x1] }
 0x2f0   : > { %v2693_v57 = vsub.f32 %v5468_v7, %v2679_v36  ;;  %v5556_v45 = vmul.f32 %v4037_v40, %v5430_v33  ;;  %v2941_v7 = vld [vmem:[%s5490_s25 + $0x1e0] sm:$0xff]  ;;  %v2940_v33 = vld [vmem:[%s5490_s25 + $0x1d8] sm:$0xff]  ;;  %v2803_v44 = vor.u32 1.1754944e-38, %v2802_v59  ;;  %vm2801_vm1 = vcmp.eq.f32.partialorder %v2800_v39, 8.507059e+37 }
 0x2f1   : > { %v2707_v51 = vmul.f32 1.442695, %v2694_v49  ;;  %v2742_v31 = vsel %vm2664_vm9, %v5553_v61, 0.0  ;;  %3072 = vmatpush.msra.mxu3 %v2941_v7  ;;  %v2930_v7 = vld [vmem:[%s5490_s25 + $0x188] sm:$0xff]  ;;  %v3005_v59 = vld [vmem:[%s5490_s25 + $0x3e0] sm:$0xff] }
 0x2f2   : > { %v2705_v30 = vmul.f32 1.442695, %v2693_v57  ;;  %2743 = vadd.xlane.f32.xlu2 %v2742_v31  ;;  %v2739_v48 = vsel %vm2664_vm9, %v5556_v45, 0.0  ;;  %v3186_v57 = vld [vmem:[%s5578_s16] sm:$0x1]  ;;  %v2932_v31 = vld [vmem:[%s5490_s25 + $0x198] sm:$0xff] }
 0x2f3   : > { %4040 = vpow2.f32 %v2707_v51  ;;  %2740 = vadd.xlane.f32.xlu1 %v2739_v48  ;;  %v2726_v54 = vpop.xlane.xlu0 %2725  ;;  %3073 = vmatpush.msra.mxu3 %v2940_v33  ;;  %v2931_v48 = vld [vmem:[%s5490_s25 + $0x190] sm:$0xff] }
 0x2f4   : > { %v4039_v17 = vpop.eup %4038  ;;  %4042 = vpow2.f32 %v2705_v30  ;;  %vm2746_vm12 = vcmp.gt.f32.partialorder %v2726_v54, 0.0  ;;  %v2991_v33 = vld [vmem:[%s5490_s25 + $0x370] sm:$0xff] }
 0x2f5   : > { %v2792_v56 = vmul.f32 %v4039_v17, %v2755_v58  ;;  %v2754_v50 = vsel %vm2746_vm12, %v2726_v54, 1.0  ;;  %vm2797_vm14 = vweird.f32 %v4039_v17  ;;  %3074 = vmatpush.msra.mxu3 %v2939_v26  ;;  %v2992_v54 = vld [vmem:[%s5490_s25 + $0x378] sm:$0xff] }
 0x2f6   : > { %4044 = vrcp.f32 %v2754_v50  ;;  %v2723_v5 = vpop.xlane.xlu2 %2722  ;;  %vm2798_vm0 = vmor %vm2796_vm15, %vm2797_vm14  ;;  %v2787_v53 = vand.u32 2147483648, %v2754_v50  ;;  %v2785_v62 = vand.u32 2147483647, %v2754_v50  ;;  %3129 = vmatpush.msrb.mxu2 %v2992_v54  ;;  %v2960_v26 = vld [vmem:[%s5490_s25 + $0x278] sm:$0xff]  ;;  %v2995_v54 = vld [vmem:[%s5490_s25 + $0x390] sm:$0xff] }
 0x2f7   : > { %v2793_v38 = vsub.f32 1.0, %v2792_v56  ;;  %vm2745_vm13 = vcmp.gt.f32.partialorder %v2723_v5, 0.0  ;;  %3075 = vmatpush.msra.mxu3 %v2938_v6  ;;  %v3007_v56 = vld [vmem:[%s5490_s25 + $0x3f0] sm:$0xff]  ;;  %3089 = vmatpush.msrb.mxu0 %v2960_v26  ;;  %v3002_v6 = vld [vmem:[%s5490_s25 + $0x3c8] sm:$0xff] }
 0x2f8   : > { %v5565_v32 = vsel %vm2745_vm13, %v2723_v5, 1.0  ;;  %v2788_v8 = vor.u32 1.1754944e-38, %v2787_v53  ;;  %vm2786_vm5 = vcmp.eq.f32.partialorder %v2785_v62, 8.507059e+37  ;;  %v3006_v5 = vld [vmem:[%s5490_s25 + $0x3e8] sm:$0xff]  ;;  %3130 = vmatpush.msrb.mxu2 %v2991_v33  ;;  %v2976_v53 = vld [vmem:[%s5490_s25 + $0x2f8] sm:$0xff]  ;;  %v2959_v62 = vld [vmem:[%s5490_s25 + $0x270] sm:$0xff] }
 0x2f9   : > { %v4041_v13 = vpop.eup %4040  ;;  %v2794_v4 = vmul.f32 %v4039_v17, %v2793_v38  ;;  %4046 = vrcp.f32 %v5565_v32  ;;  %v2772_v63 = vand.u32 2147483648, %v5565_v32  ;;  %v2770_v21 = vand.u32 2147483647, %v5565_v32  ;;  %3076 = vmatpush.msra.mxu3 %v2937_v12  ;;  %v2989_v38 = vld [vmem:[%s5490_s25 + $0x360] sm:$0xff]  ;;  %3109 = vmatpush.msrb.mxu1 %v2976_v53  ;;  %v2967_v33 = vld [vmem:[%s5490_s25 + $0x2b0] sm:$0xff] }
 0x2fa   : > { %v4043_v18 = vpop.eup %4042  ;;  %v5569_v27 = vmul.f32 %v4041_v13, %v5460_v16  ;;  %vm2766_vm6 = vweird.f32 %v5565_v32  ;;  %v3004_v13 = vld [vmem:[%s5490_s25 + $0x3d8] sm:$0xff]  ;;  %3090 = vmatpush.msrb.mxu0 %v2959_v62  ;;  %v3001_v12 = vld [vmem:[%s5490_s25 + $0x3c0] sm:$0xff] }
 0x2fb   : > { %v2795_v19 = vadd.f32 %v4039_v17, %v2794_v4  ;;  %v5572_v15 = vmul.f32 %v4043_v18, %v5457_v52  ;;  %3077 = vmatpush.msra.mxu3 %v2936_v55  ;;  %v2773_v3 = vor.u32 1.1754944e-38, %v2772_v63  ;;  %vm2771_vm8 = vcmp.eq.f32.partialorder %v2770_v21, 8.507059e+37  ;;  %v2985_v63 = vld [vmem:[%s5490_s25 + $0x340] sm:$0xff]  ;;  %v2984_v21 = vld [vmem:[%s5490_s25 + $0x338] sm:$0xff] }
 0x2fc   : > { %v4045_v0 = vpop.eup %4044  ;;  %v2736_v23 = vsel %vm2664_vm9, %v5569_v27, 0.0  ;;  %v2956_v55 = vld [vmem:[%s5490_s25 + $0x258] sm:$0xff] }
 0x2fd   : > { %v2777_v16 = vmul.f32 %v4045_v0, %v2754_v50  ;;  %2737 = vadd.xlane.f32.xlu1 %v2736_v23  ;;  %v2733_v52 = vsel %vm2664_vm9, %v5572_v15, 0.0  ;;  %v2799_v14 = vsel %vm2798_vm0, %v4039_v17, %v2795_v19  ;;  %vm2782_vm2 = vweird.f32 %v4045_v0  ;;  %3078 = vmatpush.msra.mxu3 %v2935_v1  ;;  %v3008_v17 = vld [vmem:[%s5490_s25 + $0x3f8] sm:$0xff]  ;;  %v2982_v1 = vld [vmem:[%s5490_s25 + $0x328] sm:$0xff] }
 0x2fe   : > { %2734 = vadd.xlane.f32.xlu0 %v2733_v52  ;;  %v2804_v25 = vsel %vm2801_vm1, %v2803_v44, %v2799_v14  ;;  %vm2781_vm9 = vweird.f32 %v2754_v50  ;;  %v2990_v50 = vld [vmem:[%s5490_s25 + $0x368] sm:$0xff] }
 0x2ff   : > { %v4047_v2 = vpop.eup %4046  ;;  %v2778_v47 = vsub.f32 1.0, %v2777_v16  ;;  %v2805_v22 = vmul.f32 %v2804_v25, %v5454_v29  ;;  %vm2783_vm3 = vmor %vm2781_vm9, %vm2782_vm2  ;;  %3079 = vmatpush.msra.mxu3 %v2934_v9  ;;  %3131 = vmatpush.msrb.mxu2 %v2990_v50  ;;  %v2997_v9 = vld [vmem:[%s5490_s25 + $0x3a0] sm:$0xff]  ;;  %v2994_v50 = vld [vmem:[%s5490_s25 + $0x388] sm:$0xff] }
 0x300   : > { %v2762_v28 = vmul.f32 %v4047_v2, %v5565_v32  ;;  %vm2767_vm4 = vweird.f32 %v4047_v2  ;;  %v2988_v32 = vld [vmem:[%s5490_s25 + $0x358] sm:$0xff] }
 0x301   : > { %v2779_v42 = vmul.f32 %v4045_v0, %v2778_v47  ;;  %3065 = vmatmul.f32.vlgmr.msra.gmra.mxu2 %v2805_v22  ;;  %3180 = vst [vmem:[%s5589_s22 + $0x2] sm:$0x1] %v2805_v22  ;;  %v3196_v46 = vadd.f32 %v3188_v60, %v2805_v22  ;;  %vm2768_vm7 = vmor %vm2766_vm6, %vm2767_vm4 }
 0x302   : > { %v2763_v41 = vsub.f32 1.0, %v2762_v28  ;;  %3132 = vmatpush.msrb.mxu2 %v2989_v38  ;;  %v2987_v28 = vld [vmem:[%s5490_s25 + $0x350] sm:$0xff]  ;;  %v2966_v38 = vld [vmem:[%s5490_s25 + $0x2a8] sm:$0xff] }
 0x303   : > { %v2780_v29 = vadd.f32 %v4045_v0, %v2779_v42  ;;  %3204 = vst [vmem:[%s5595_s14 + $0x2] sm:$0x1] %v3196_v46  ;;  %v3003_v42 = vld [vmem:[%s5490_s25 + $0x3d0] sm:$0xff]  ;;  %v2986_v46 = vld [vmem:[%s5490_s25 + $0x348] sm:$0xff] }
 0x304   : > { %v2764_v24 = vmul.f32 %v4047_v2, %v2763_v41  ;;  %3133 = vmatpush.msrb.mxu2 %v2988_v32  ;;  %v2958_v41 = vld [vmem:[%s5490_s25 + $0x268] sm:$0xff]  ;;  %v2993_v32 = vld [vmem:[%s5490_s25 + $0x380] sm:$0xff] }
 0x305   : > { %v2784_v37 = vsel %vm2783_vm3, %v4045_v0, %v2780_v29  ;;  %v2974_v29 = vld [vmem:[%s5490_s25 + $0x2e8] sm:$0xff]  ;;  %3091 = vmatpush.msrb.mxu0 %v2958_v41 }
 0x306   : > { %v2765_v35 = vadd.f32 %v4047_v2, %v2764_v24  ;;  %v2789_v58 = vsel %vm2786_vm5, %v2788_v8, %v2784_v37  ;;  %3134 = vmatpush.msrb.mxu2 %v2987_v28  ;;  %v2957_v8 = vld [vmem:[%s5490_s25 + $0x260] sm:$0xff]  ;;  %v3000_v37 = vld [vmem:[%s5490_s25 + $0x3b8] sm:$0xff] }
 0x307   : > { %v2790_v36 = vmul.f32 %v2789_v58, %v5476_v34  ;;  %v2933_v34 = vld [vmem:[%s5490_s25 + $0x1a0] sm:$0xff]  ;;  %3092 = vmatpush.msrb.mxu0 %v2957_v8  ;;  %v2983_v58 = vld [vmem:[%s5490_s25 + $0x330] sm:$0xff] }
 0x308   : > { %v2769_v20 = vsel %vm2768_vm7, %v4047_v2, %v2765_v35  ;;  %3080 = vmatpush.msra.mxu3 %v2933_v34  ;;  %v3189_v2 = vld [vmem:[%s5578_s16 + $0x3] sm:$0x1]  ;;  %3135 = vmatpush.msrb.mxu2 %v2986_v46  ;;  %v2972_v35 = vld [vmem:[%s5490_s25 + $0x2d8] sm:$0xff] }
 0x309   : > { %3045 = vmatmul.f32.vlgmr.msra.gmra.mxu1 %v2790_v36  ;;  %3179 = vst [vmem:[%s5589_s22 + $0x1] sm:$0x1] %v2790_v36  ;;  %v3195_v40 = vadd.f32 %v3187_v11, %v2790_v36  ;;  %v2774_v49 = vsel %vm2771_vm8, %v2773_v3, %v2769_v20  ;;  %v2973_v24 = vld [vmem:[%s5490_s25 + $0x2e0] sm:$0xff]  ;;  %3093 = vmatpush.msrb.mxu0 %v2956_v55  ;;  %v2999_v11 = vld [vmem:[%s5490_s25 + $0x3b0] sm:$0xff]  ;;  %v2998_v20 = vld [vmem:[%s5490_s25 + $0x3a8] sm:$0xff] }
 0x30a   : > { %v2775_v51 = vmul.f32 %v2774_v49, %v5480_v10  ;;  %3081 = vmatpush.msra.mxu3 %v2932_v31  ;;  %v2929_v10 = vld [vmem:[%s5490_s25 + $0x180] sm:$0xff]  ;;  %3136 = vmatpush.msrb.mxu2 %v2985_v63  ;;  %v2955_v3 = vld [vmem:[%s5490_s25 + $0x250] sm:$0xff]  ;;  %v2970_v49 = vld [vmem:[%s5490_s25 + $0x2c8] sm:$0xff] }
 0x30b   : > { %3203 = vst [vmem:[%s5595_s14 + $0x1] sm:$0x1] %v3195_v40  ;;  %v2971_v36 = vld [vmem:[%s5490_s25 + $0x2d0] sm:$0xff]  ;;  %3094 = vmatpush.msrb.mxu0 %v2955_v3  ;;  %v2954_v40 = vld [vmem:[%s5490_s25 + $0x248] sm:$0xff]  ;;  %v2969_v34 = vld [vmem:[%s5490_s25 + $0x2c0] sm:$0xff] }
 0x30c   : > { %3025 = vmatmul.f32.vlgmr.msra.gmra.mxu0 %v2775_v51  ;;  %3178 = vst [vmem:[%s5589_s22] sm:$0x1] %v2775_v51  ;;  %v3194_v30 = vadd.f32 %v3186_v57, %v2775_v51  ;;  %3082 = vmatpush.msra.mxu3 %v2931_v48  ;;  %v2981_v57 = vld [vmem:[%s5490_s25 + $0x320] sm:$0xff]  ;;  %v2996_v31 = vld [vmem:[%s5490_s25 + $0x398] sm:$0xff] }
 0x30d   : > { %3137 = vmatpush.msrb.mxu2 %v2984_v21  ;;  %3095 = vmatpush.msrb.mxu0 %v2954_v40  ;;  %v2953_v51 = vld [vmem:[%s5490_s25 + $0x240] sm:$0xff]  ;;  %v2952_v48 = vld [vmem:[%s5490_s25 + $0x238] sm:$0xff] }
 0x30e   : > { %3202 = vst [vmem:[%s5595_s14] sm:$0x1] %v3194_v30  ;;  %3083 = vmatpush.msra.mxu3 %v2930_v7  ;;  %v2980_v30 = vld [vmem:[%s5490_s25 + $0x318] sm:$0xff]  ;;  %v3193_v3 = vld [vmem:[%s5578_s16 + $0x7] sm:$0x1] }
 0x30f   : > { %3138 = vmatpush.msrb.mxu2 %v2983_v58  ;;  %3096 = vmatpush.msrb.mxu0 %v2953_v51  ;;  %v2968_v7 = vld [vmem:[%s5490_s25 + $0x2b8] sm:$0xff] }
 0x310   : > { %3084 = vmatpush.msra.mxu3 %v2929_v10  ;;  %v2979_v10 = vld [vmem:[%s5490_s25 + $0x310] sm:$0xff] }
 0x311   : > { %3139 = vmatpush.msrb.mxu2 %v2982_v1  ;;  %3097 = vmatpush.msrb.mxu0 %v2952_v48 }
 0x312   : > { %3149 = vmatpush.msrb.mxu3 %v3008_v17  ;;  %v2951_v17 = vld [vmem:[%s5490_s25 + $0x230] sm:$0xff] }
 0x313   : > { %3140 = vmatpush.msrb.mxu2 %v2981_v57  ;;  %3098 = vmatpush.msrb.mxu0 %v2951_v17 }
 0x314   : > { %3150 = vmatpush.msrb.mxu3 %v3007_v56  ;;  %v2978_v56 = vld [vmem:[%s5490_s25 + $0x308] sm:$0xff] }
 0x315   : > { %3141 = vmatpush.msrb.mxu2 %v2980_v30 }
 0x316   : > { %3151 = vmatpush.msrb.mxu3 %v3006_v5  ;;  %v2950_v5 = vld [vmem:[%s5490_s25 + $0x228] sm:$0xff] }
 0x317   : > { %3142 = vmatpush.msrb.mxu2 %v2979_v10  ;;  %3099 = vmatpush.msrb.mxu0 %v2950_v5 }
 0x318   : > { %3152 = vmatpush.msrb.mxu3 %v3005_v59  ;;  %v2977_v59 = vld [vmem:[%s5490_s25 + $0x300] sm:$0xff] }
 0x319   : > { %3143 = vmatpush.msrb.mxu2 %v2978_v56 }
 0x31a   : > { %3153 = vmatpush.msrb.mxu3 %v3004_v13  ;;  %v2949_v13 = vld [vmem:[%s5490_s25 + $0x220] sm:$0xff] }
 0x31b   : > { %3144 = vmatpush.msrb.mxu2 %v2977_v59  ;;  %3100 = vmatpush.msrb.mxu0 %v2949_v13 }
 0x31c   : > { %3154 = vmatpush.msrb.mxu3 %v3003_v42 }
 0x31d   : > { %v2732_v4 = vpop.xlane.xlu1 %2731 }
 0x31e   : > { %vm2748_vm10 = vcmp.gt.f32.partialorder %v2732_v4, 0.0  ;;  %3155 = vmatpush.msrb.mxu3 %v3002_v6 }
 0x31f   : > { %v2756_v39 = vsel %vm2748_vm10, %v2732_v4, 1.0  ;;  %v2965_v4 = vld [vmem:[%s5490_s25 + $0x2a0] sm:$0xff] }
 0x320   : > { %4048 = vrcp.f32 %v2756_v39  ;;  %v2817_v44 = vand.u32 2147483648, %v2756_v39  ;;  %v2815_v16 = vand.u32 2147483647, %v2756_v39  ;;  %vm2811_vm12 = vweird.f32 %v2756_v39  ;;  %3156 = vmatpush.msrb.mxu3 %v3001_v12 }
 0x322   : > { %v2818_v14 = vor.u32 1.1754944e-38, %v2817_v44  ;;  %vm2816_vm14 = vcmp.eq.f32.partialorder %v2815_v16, 8.507059e+37  ;;  %3157 = vmatpush.msrb.mxu3 %v3000_v37  ;;  %v2946_v44 = vld [vmem:[%s5490_s25 + $0x208] sm:$0xff] }
 0x324   : > { %3158 = vmatpush.msrb.mxu3 %v2999_v11 }
 0x326   : > { %v4049_v18 = vpop.eup %4048  ;;  %3159 = vmatpush.msrb.mxu3 %v2998_v20 }
 0x327   : > { %v2807_v19 = vmul.f32 %v4049_v18, %v2756_v39  ;;  %vm2812_vm11 = vweird.f32 %v4049_v18  ;;  %v2948_v39 = vld [vmem:[%s5490_s25 + $0x218] sm:$0xff] }
 0x328   : > { %vm2813_vm13 = vmor %vm2811_vm12, %vm2812_vm11  ;;  %3160 = vmatpush.msrb.mxu3 %v2997_v9  ;;  %3101 = vmatpush.msrb.mxu0 %v2948_v39  ;;  %v3192_v9 = vld [vmem:[%s5578_s16 + $0x6] sm:$0x1] }
 0x329   : > { %v2808_v0 = vsub.f32 1.0, %v2807_v19  ;;  %v2947_v19 = vld [vmem:[%s5490_s25 + $0x210] sm:$0xff] }
 0x32a   : > { %3161 = vmatpush.msrb.mxu3 %v2996_v31  ;;  %3102 = vmatpush.msrb.mxu0 %v2947_v19  ;;  %v3190_v19 = vld [vmem:[%s5578_s16 + $0x4] sm:$0x1] }
 0x32b   : > { %v2809_v23 = vmul.f32 %v4049_v18, %v2808_v0  ;;  %v2963_v0 = vld [vmem:[%s5490_s25 + $0x290] sm:$0xff] }
 0x32c   : > { %3162 = vmatpush.msrb.mxu3 %v2995_v54  ;;  %3103 = vmatpush.msrb.mxu0 %v2946_v44 }
 0x32d   : > { %v2810_v52 = vadd.f32 %v4049_v18, %v2809_v23  ;;  %v2962_v23 = vld [vmem:[%s5490_s25 + $0x288] sm:$0xff] }
 0x32e   : > { %3163 = vmatpush.msrb.mxu3 %v2994_v50 }
 0x32f   : > { %v2814_v25 = vsel %vm2813_vm13, %v4049_v18, %v2810_v52  ;;  %v2964_v18 = vld [vmem:[%s5490_s25 + $0x298] sm:$0xff]  ;;  %v2945_v52 = vld [vmem:[%s5490_s25 + $0x200] sm:$0xff] }
 0x330   : > { %v2819_v60 = vsel %vm2816_vm14, %v2818_v14, %v2814_v25  ;;  %3164 = vmatpush.msrb.mxu3 %v2993_v32  ;;  %v2961_v14 = vld [vmem:[%s5490_s25 + $0x280] sm:$0xff]  ;;  %3104 = vmatpush.msrb.mxu0 %v2945_v52 }
 0x331   : > { %v2820_v47 = vmul.f32 %v2819_v60, %v5495_v43  ;;  %v2975_v43 = vld [vmem:[%s5490_s25 + $0x2f0] sm:$0xff]  ;;  %s5703_s25 = scalar_lea.vmem [#allocation4], %s5279_s3  ;;  %s5712_s3 = sshll.u32 %s3268_s24, 4  ;;  %s3272_s3 = int_to_ptr.hbm [resolvable:$true] %s5712_s3 }
 0x332   : > { %3110 = vmatpush.msrb.mxu1 %v2975_v43  ;;  %s4077_s2 = sshra.s32 %s3272_s3, 4  ;;  %s4078_s2 = int_to_ptr.hbm [resolvable:$true] %s4077_s2 }
 0x333   : > { %3085 = vmatmul.f32.vlgmr.msra.gmra.mxu3 %v2820_v47  ;;  %3181 = vst [vmem:[%s5589_s22 + $0x3] sm:$0x1] %v2820_v47  ;;  %v3197_v22 = vadd.f32 %v3189_v2, %v2820_v47  ;;  %p4084_p0 = scmp.lt.s32.totalorder %s4078_s2, %s5867_s11 }
 0x334   : > { %3111 = vmatpush.msrb.mxu1 %v2974_v29 }
 0x335   : > { %3205 = vst [vmem:[%s5595_s14 + $0x3] sm:$0x1] %v3197_v22 }
 0x336   : > { %3112 = vmatpush.msrb.mxu1 %v2973_v24 }
 0x338   : > { %3113 = vmatpush.msrb.mxu1 %v2972_v35 }
 0x33a   : > { %3114 = vmatpush.msrb.mxu1 %v2971_v36 }
 0x33c   : > { %3115 = vmatpush.msrb.mxu1 %v2970_v49 }
 0x33e   : > { %3116 = vmatpush.msrb.mxu1 %v2969_v34 }
 0x340   : > { %3117 = vmatpush.msrb.mxu1 %v2968_v7 }
 0x342   : > { %3118 = vmatpush.msrb.mxu1 %v2967_v33 }
 0x344   : > { %3119 = vmatpush.msrb.mxu1 %v2966_v38 }
 0x346   : > { %3120 = vmatpush.msrb.mxu1 %v2965_v4  ;;  %v3191_v4 = vld [vmem:[%s5578_s16 + $0x5] sm:$0x1] }
 0x348   : > { %3121 = vmatpush.msrb.mxu1 %v2964_v18 }
 0x34a   : > { %3122 = vmatpush.msrb.mxu1 %v2963_v0 }
 0x34c   : > { %3123 = vmatpush.msrb.mxu1 %v2962_v23 }
 0x34e   : > { %3124 = vmatpush.msrb.mxu1 %v2961_v14 }
 0x365   : > { %v2744_v16 = vpop.xlane.xlu2 %2743 }
 0x366   : > { %vm2752_vm15 = vcmp.gt.f32.partialorder %v2744_v16, 0.0  ;;  %v2741_v25 = vpop.xlane.xlu1 %2740 }
 0x367   : > { %v2760_v60 = vsel %vm2752_vm15, %v2744_v16, 1.0  ;;  %vm2751_vm0 = vcmp.gt.f32.partialorder %v2741_v25, 0.0 }
 0x368   : > { %4050 = vrcp.f32 %v2760_v60  ;;  %v2759_v2 = vsel %vm2751_vm0, %v2741_v25, 1.0  ;;  %v2875_v42 = vand.u32 2147483647, %v2760_v60  ;;  %v2877_v46 = vand.u32 2147483648, %v2760_v60 }
 0x369   : > { %4052 = vrcp.f32 %v2759_v2  ;;  %vm2871_vm3 = vweird.f32 %v2760_v60  ;;  %v2862_v12 = vand.u32 2147483648, %v2759_v2  ;;  %v2860_v21 = vand.u32 2147483647, %v2759_v2 }
 0x36a   : > { %v2878_v37 = vor.u32 1.1754944e-38, %v2877_v46  ;;  %vm2876_vm6 = vcmp.eq.f32.partialorder %v2875_v42, 8.507059e+37  ;;  %vm2856_vm7 = vweird.f32 %v2759_v2 }
 0x36b   : > { %v2863_v58 = vor.u32 1.1754944e-38, %v2862_v12  ;;  %vm2861_vm10 = vcmp.eq.f32.partialorder %v2860_v21, 8.507059e+37 }
 0x36e   : > { %v4051_v47 = vpop.eup %4050 }
 0x36f   : > { %v2867_v22 = vmul.f32 %v4051_v47, %v2760_v60  ;;  %v4053_v26 = vpop.eup %4052  ;;  %vm2872_vm2 = vweird.f32 %v4051_v47 }
 0x370   : > { %v2738_v53 = vpop.xlane.xlu1 %2737  ;;  %v2852_v62 = vmul.f32 %v4053_v26, %v2759_v2  ;;  %vm2857_vm4 = vweird.f32 %v4053_v26  ;;  %vm2873_vm5 = vmor %vm2871_vm3, %vm2872_vm2  ;;  %vm3169_vm2 = vcmask 253952  }
 0x371   : > { %v2868_v28 = vsub.f32 1.0, %v2867_v22  ;;  %v2735_v43 = vpop.xlane.xlu0 %2734  ;;  %vm2750_vm1 = vcmp.gt.f32.partialorder %v2738_v53, 0.0  ;;  %vm2858_vm8 = vmor %vm2856_vm7, %vm2857_vm4 }
 0x372   : > { %vm2749_vm9 = vcmp.gt.f32.partialorder %v2735_v43, 0.0  ;;  %v2758_v6 = vsel %vm2750_vm1, %v2738_v53, 1.0  ;;  %v2853_v29 = vsub.f32 1.0, %v2852_v62 }
 0x373   : > { %v2869_v41 = vmul.f32 %v4051_v47, %v2868_v28  ;;  %v2757_v63 = vsel %vm2749_vm9, %v2735_v43, 1.0  ;;  %4054 = vrcp.f32 %v2758_v6  ;;  %v2847_v7 = vand.u32 2147483648, %v2758_v6 }
 0x374   : > { %4056 = vrcp.f32 %v2757_v63  ;;  %v2854_v24 = vmul.f32 %v4053_v26, %v2853_v29  ;;  %v2832_v54 = vand.u32 2147483648, %v2757_v63  ;;  %v2845_v17 = vand.u32 2147483647, %v2758_v6 }
 0x375   : > { %v2870_v8 = vadd.f32 %v4051_v47, %v2869_v41  ;;  %v2830_v56 = vand.u32 2147483647, %v2757_v63  ;;  %vm2841_vm13 = vweird.f32 %v2758_v6  ;;  %vm2826_vm14 = vweird.f32 %v2757_v63 }
 0x376   : > { %v2855_v35 = vadd.f32 %v4053_v26, %v2854_v24  ;;  %v2848_v5 = vor.u32 1.1754944e-38, %v2847_v7  ;;  %v2833_v38 = vor.u32 1.1754944e-38, %v2832_v54  ;;  %vm2846_vm1 = vcmp.eq.f32.partialorder %v2845_v17, 8.507059e+37 }
 0x377   : > { %v2874_v55 = vsel %vm2873_vm5, %v4051_v47, %v2870_v8  ;;  %vm2831_vm9 = vcmp.eq.f32.partialorder %v2830_v56, 8.507059e+37 }
 0x378   : > { %v2879_v11 = vsel %vm2876_vm6, %v2878_v37, %v2874_v55  ;;  %v2859_v1 = vsel %vm2858_vm8, %v4053_v26, %v2855_v35 }
 0x379   : > { %v4055_v36 = vpop.eup %4054  ;;  %v2880_v20 = vmul.f32 %v2879_v11, %v5553_v61  ;;  %v2864_v57 = vsel %vm2861_vm10, %v2863_v58, %v2859_v1 }
 0x37a   : > { %v4057_v40 = vpop.eup %4056  ;;  %v2837_v49 = vmul.f32 %v4055_v36, %v2758_v6  ;;  %v2865_v34 = vmul.f32 %v2864_v57, %v5556_v45  ;;  %vm2842_vm11 = vweird.f32 %v4055_v36 }
 0x37b   : > { %v2822_v51 = vmul.f32 %v4057_v40, %v2757_v63  ;;  %3165 = vmatmul.f32.vlgmr.msrb.gmra.mxu3 %v2880_v20  ;;  %3185 = vst [vmem:[%s5589_s22 + $0x7] sm:$0x1] %v2880_v20  ;;  %v3201_v30 = vadd.f32 %v3193_v3, %v2880_v20  ;;  %vm2827_vm12 = vweird.f32 %v4057_v40  ;;  %vm2843_vm15 = vmor %vm2841_vm13, %vm2842_vm11 }
 0x37c   : > { %v2838_v31 = vsub.f32 1.0, %v2837_v49  ;;  %3145 = vmatmul.f32.vlgmr.msrb.gmra.mxu2 %v2865_v34  ;;  %3184 = vst [vmem:[%s5589_s22 + $0x6] sm:$0x1] %v2865_v34  ;;  %v3200_v10 = vadd.f32 %v3192_v9, %v2865_v34  ;;  %vm2828_vm0 = vmor %vm2826_vm14, %vm2827_vm12 }
 0x37d   : > { %v2823_v48 = vsub.f32 1.0, %v2822_v51  ;;  %3209 = vst [vmem:[%s5595_s14 + $0x7] sm:$0x1] %v3201_v30 }
 0x37e   : > { %v2839_v61 = vmul.f32 %v4055_v36, %v2838_v31  ;;  %3208 = vst [vmem:[%s5595_s14 + $0x6] sm:$0x1] %v3200_v10 }
 0x37f   : > { %v2824_v33 = vmul.f32 %v4057_v40, %v2823_v48 }
 0x380   : > { %v2840_v45 = vadd.f32 %v4055_v36, %v2839_v61 }
 0x381   : > { %v2825_v50 = vadd.f32 %v4057_v40, %v2824_v33 }
 0x382   : > { %v2844_v59 = vsel %vm2843_vm15, %v4055_v36, %v2840_v45 }
 0x383   : > { %v2829_v32 = vsel %vm2828_vm0, %v4057_v40, %v2825_v50  ;;  %v2849_v13 = vsel %vm2846_vm1, %v2848_v5, %v2844_v59 }
 0x384   : > { %v3066_v39 = vpop.f32.mrf.mxu2  ;;  %v2834_v18 = vsel %vm2831_vm9, %v2833_v38, %v2829_v32  ;;  %v2850_v0 = vmul.f32 %v2849_v13, %v5569_v27 }
 0x385   : > { %3172 = vst.msk [vmem:[%s5703_s25 + $0x2] sm:$0x1] %vm3169_vm2, %v3066_v39  ;;  %v2835_v44 = vmul.f32 %v2834_v18, %v5572_v15 }
 0x386   : > { %3125 = vmatmul.f32.vlgmr.msrb.gmra.mxu1 %v2850_v0  ;;  %3183 = vst [vmem:[%s5589_s22 + $0x5] sm:$0x1] %v2850_v0  ;;  %v3199_v23 = vadd.f32 %v3191_v4, %v2850_v0  ;;  %v3046_v16 = vpop.f32.mrf.mxu1 }
 0x387   : > { %3105 = vmatmul.f32.vlgmr.msrb.gmra.mxu0 %v2835_v44  ;;  %3182 = vst [vmem:[%s5589_s22 + $0x4] sm:$0x1] %v2835_v44  ;;  %v3198_v27 = vadd.f32 %v3190_v19, %v2835_v44  ;;  %s4079_s22 = scalar_lea.hbm %s4078_s2, 8 }
 0x388   : > { %3207 = vst [vmem:[%s5595_s14 + $0x5] sm:$0x1] %v3199_v23  ;;  %p4080_p11 = scmp.ne.s32.totalorder %s4078_s2, %s4079_s22  ;;  %p4085_p1 = scmp.lt.s32.totalorder %s4083_s7, %s4079_s22 }
 0x389   : > { %3206 = vst [vmem:[%s5595_s14 + $0x4] sm:$0x1] %v3198_v27  ;;  %v3026_v52 = vpop.f32.mrf.mxu0 }
 0x38a   : > { %3171 = vst.msk [vmem:[%s5703_s25 + $0x1] sm:$0x1] %vm3169_vm2, %v3046_v16  ;;  %p4081_p12 = pnand %p4080_p11, %p4336_p5  ;;  %p4086_p2 = por %p4085_p1, %p4084_p0 }
 0x38b   : > { %3170 = vst.msk [vmem:[%s5703_s25] sm:$0x1] %vm3169_vm2, %v3026_v52 }
 0x38c   : > { %p4082_p13 = pneg %p4081_p12 }
 0x38e   : > { %p4087_p3 = pnand %p4086_p2, %p4082_p13 }
 0x390   : > { %4090 = shalt.err (!%p4087_p3)
}
 0x391   : > { %s4221_s23 = smov 16   ;;  %s4222_s0 = smov 1  }
 0x392   : > { %3701 = dma.vmem_to_hbm [thread:$0]  (%p4336_p5), %s3270_s4, 128, %s3272_s3, %s5725_s6, %s4221_s23, %s4221_s23, %s4222_s0  }
 0x393   : > { %s3285_s5 = sshll.u32 %s5595_s14, 4  ;;  %s3287_s16 = sshll.u32 %s3284_s1, 4  ;;  %s3286_s5 = int_to_ptr.vmem [resolvable:$true] %s3285_s5  ;;  %s3288_s16 = int_to_ptr.hbm [resolvable:$true] %s3287_s16 }
 0x394   : > { %s4105_s2 = sshra.s32 %s3288_s16, 4  ;;  %s4111_s22 = scalar_lea.hbm %s5835_s12, 16  ;;  %s4106_s2 = int_to_ptr.hbm [resolvable:$true] %s4105_s2 }
 0x395   : > { %s4107_s7 = scalar_lea.hbm %s4106_s2, 8  ;;  %p4112_p9 = scmp.lt.s32.totalorder %s4106_s2, %s5835_s12 }
 0x396   : > { %p4108_p4 = scmp.ne.s32.totalorder %s4106_s2, %s4107_s7  ;;  %p4113_p10 = scmp.lt.s32.totalorder %s4111_s22, %s4107_s7 }
 0x398   : > { %p4109_p7 = pnand %p4108_p4, %p4336_p5  ;;  %p4114_p11 = por %p4113_p10, %p4112_p9 }
 0x39a   : > { %p4110_p8 = pneg %p4109_p7 }
 0x39c   : > { %p4115_p12 = pnand %p4114_p11, %p4110_p8 }
 0x39e   : > { %4118 = shalt.err (!%p4115_p12)
}
 0x39f   : > { %3702 = dma.vmem_to_hbm [thread:$0]  (%p4336_p5), %s3286_s5, 128, %s3288_s16, %s5725_s6, %s4221_s23, %s4221_s23, %s4222_s0  }
 0x3a0   : > { %s3300_s11 = scalar_lea.hbm %s5836_s13, %s4347_s21  ;;  %s3301_s3 = sshll.u32 %s5308_s17, 4  ;;  %s3302_s3 = int_to_ptr.vmem [resolvable:$true] %s3301_s3 }
 0x3a1   : > { %s3303_s1 = sshll.u32 %s3300_s11, 4  ;;  %s3242_s2 = scalar_lea.sflag [#allocation10], %s5250_s26  ;;  %s3304_s1 = int_to_ptr.hbm [resolvable:$true] %s3303_s1 }
 0x3a2   : > { %s4133_s7 = sshra.s32 %s3304_s1, 4  ;;  %s4139_s6 = scalar_lea.hbm %s5836_s13, 16  ;;  %s4134_s7 = int_to_ptr.hbm [resolvable:$true] %s4133_s7 }
 0x3a3   : > { %s4135_s8 = scalar_lea.hbm %s4134_s7, 8  ;;  %p4140_p2 = scmp.lt.s32.totalorder %s4134_s7, %s5836_s13 }
 0x3a4   : > { %p4136_p13 = scmp.ne.s32.totalorder %s4134_s7, %s4135_s8  ;;  %p4141_p3 = scmp.lt.s32.totalorder %s4139_s6, %s4135_s8 }
 0x3a6   : > { %p4137_p0 = pnand %p4136_p13, %p4336_p5  ;;  %p4142_p4 = por %p4141_p3, %p4140_p2 }
 0x3a8   : > { %p4138_p1 = pneg %p4137_p0 }
 0x3aa   : > { %p4143_p7 = pnand %p4142_p4, %p4138_p1 }
 0x3ac   : > { %4146 = shalt.err (!%p4143_p7)
}
 0x3ad   : > { %3703 = dma.vmem_to_hbm [thread:$0]  (%p4336_p5), %s3302_s3, 128, %s3304_s1, %s3242_s2, %s4221_s23, %s4221_s23, %s4222_s0  }
 0x3ae   : > { %s3252_s14 = scalar_lea.hbm %s5833_s10, %s4347_s21  ;;  %s3253_s4 = sshll.u32 %s5703_s25, 4  ;;  %s3254_s4 = int_to_ptr.vmem [resolvable:$true] %s3253_s4 }
 0x3af   : > { %s3255_s11 = sshll.u32 %s3252_s14, 4  ;;  %s3227_s3 = scalar_lea.sflag [#allocation5], %s5250_s26  ;;  %s3256_s11 = int_to_ptr.hbm [resolvable:$true] %s3255_s11 }
 0x3b0   : > { %s4161_s1 = sshra.s32 %s3256_s11, 4  ;;  %s4167_s8 = scalar_lea.hbm %s5833_s10, 16  ;;  %s4162_s1 = int_to_ptr.hbm [resolvable:$true] %s4161_s1 }
 0x3b1   : > { %s4163_s21 = scalar_lea.hbm %s4162_s1, 8  ;;  %p4168_p11 = scmp.lt.s32.totalorder %s4162_s1, %s5833_s10 }
 0x3b2   : > { %p4164_p8 = scmp.ne.s32.totalorder %s4162_s1, %s4163_s21  ;;  %p4169_p12 = scmp.lt.s32.totalorder %s4167_s8, %s4163_s21 }
 0x3b4   : > { %p4165_p9 = pnand %p4164_p8, %p4336_p5  ;;  %p4170_p13 = por %p4169_p12, %p4168_p11 }
 0x3b6   : > { %v3086_v15 = vpop.f32.mrf.mxu3  ;;  %p4166_p10 = pneg %p4165_p9 }
 0x3b7   : > { %3173 = vst.msk [vmem:[%s5703_s25 + $0x3] sm:$0x1] %vm3169_vm2, %v3086_v15 }
 0x3b8   : > { %p4171_p0 = pnand %p4170_p13, %p4166_p10 }
 0x3fe   : > { %v3166_v14 = vpop.f32.mrf.mxu3 }
 0x3ff   : > { %3177 = vst.msk [vmem:[%s5703_s25 + $0x7] sm:$0x1] %vm3169_vm2, %v3166_v14  ;;  %v3146_v25 = vpop.f32.mrf.mxu2 }
 0x400   : > { %3176 = vst.msk [vmem:[%s5703_s25 + $0x6] sm:$0x1] %vm3169_vm2, %v3146_v25 }
 0x403   : > { %v3126_v60 = vpop.f32.mrf.mxu1 }
 0x404   : > { %v3106_v2 = vpop.f32.mrf.mxu0  ;;  %3175 = vst.msk [vmem:[%s5703_s25 + $0x5] sm:$0x1] %vm3169_vm2, %v3126_v60 }
 0x405   : > { %3174 = vst.msk [vmem:[%s5703_s25 + $0x4] sm:$0x1] %vm3169_vm2, %v3106_v2 }
 0x406   : > { %4174 = shalt.err (!%p4171_p0)
}
 0x407   : > { %3700 = dma.vmem_to_hbm [thread:$0]  (%p4336_p5), %s3254_s4, 128, %s3256_s11, %s3227_s3, %s4221_s23, %s4221_s23, %s4222_s0  }
 0x408 PF: > { %p3721_p1 = scmp.ge.s32.totalorder %s4217_s30, 2  ;;  %s3318_s26 = sand.u32 1, %s4205_s27  }
 0x409   : > { %s3319_s25 = scalar_lea.sflag [#allocation5], %s3318_s26 }
 0x40a   : > { %p3709_p2 = pnand %p3721_p1, %p4340_p6 }
 0x40c   : > { %p3710_p3 = pneg %p3709_p2 }
 0x40e   : > { %4192 = dma.done.wait (%p3710_p3), %s3319_s25, 128  }
 0x40f   : > { %4194 = vsyncadd (%p3710_p3), %s3319_s25, 4294967168  ;;  %s5868_s6 = sadd.s32 4294967294, %s4217_s30  }
 0x410   : > { %s3328_s5 = sand.u32 1, %s5868_s6  }
 0x411   : > { %s3329_s19 = scalar_lea.sflag [#allocation7], %s3328_s5 }
 0x412   : > { %4196 = dma.done.wait (%p3710_p3), %s3329_s19, 256  }
 0x413   : > { %4198 = vsyncadd (%p3710_p3), %s3329_s19, 4294967040  ;;  %s3349_s16 = scalar_lea.sflag [#allocation10], %s3318_s26 }
 0x414   : > { %4200 = dma.done.wait (%p3710_p3), %s3349_s16, 128  }
 0x415   : > { %4202 = vsyncadd (%p3710_p3), %s3349_s16, 4294967168  ;;  %p31_p5 = scmp.ge.s32.totalorder %s4321_s15, 4   ;;  %s5869_s27 = smov %s4209_s28 }
 0x416   : > { %s5870_s28 = smov %s4213_s29  ;;  %s5871_s29 = smov %s4334_s18 }
 0x417   : > { %s5872_s30 = smov %s4321_s15  ;;  %33 = sbr.rel (!%p31_p5) target bundleno = 19 (0x13), region = 158 }
 0x41c   :  { %3355 = vsyncpa [#allocation5], 1 }
 0x41d   :  { %3357 = vsyncpa [#allocation5 + $0x1], 1 }
 0x41e   :  { %3358 = vsyncpa [#allocation7], 1 }
 0x41f   :  { %3360 = vsyncpa [#allocation7 + $0x1], 1 }
 0x420   :  { %3361 = vsyncpa [#allocation10], 1 }
 0x421   :  { %3363 = vsyncpa [#allocation10 + $0x1], 1 }

</bundles_post_ra>
